<compile_context>
chip_gen: v6e
topology: v6e:2x2x1
jax: 0.10.0
libtpu: 0.0.40
codegen_flags: <defaults>
</compile_context>

<pallas_src>
import jax
import jax.numpy as jnp
from jax.experimental import pallas as pl
from jax.experimental.pallas import tpu as pltpu

EPS = 1e-5  # nn.BatchNorm1d default eps

# Conservative per-step VMEM budget (bytes) the auto G-selection stays under,
# so we never depend on raising the scoped-VMEM default (16 MiB on v5e).
_VMEM_BUDGET = 12 * 1024 * 1024


def _context_gating(x3, w, gamma, beta):
    """One ContextGating block on a (G, B, D) stack of G independent instances."""
    G, B, D = x3.shape
    # Linear (MXU): stack all G*B rows into one matmul so M = G*B feeds the
    # MXU properly; bf16 inputs, f32 accumulation.  The Linear bias is omitted
    # -- training-mode BatchNorm's mean subtraction cancels it exactly.
    y = jnp.dot(x3.reshape(G * B, D).astype(jnp.bfloat16), w,
                preferred_element_type=jnp.float32).reshape(G, B, D)
    # BatchNorm1d, training mode: biased one-pass batch stats PER INSTANCE
    # (axis=1 is each instance's batch axis), folded into scale/shift.
    mean = jnp.mean(y, axis=1, keepdims=True)                    # (G, 1, D)
    var = jnp.mean(y * y, axis=1, keepdims=True) - mean * mean   # one-pass var
    var = jnp.maximum(var, 0.0)   # guard f32 cancellation -> negative var -> NaN
    scale = gamma * jax.lax.rsqrt(var + EPS)                     # (G, 1, D)
    shift = beta - mean * scale
    # GLU over the concat axis == elementwise gate: x * sigmoid(y_hat)
    return x3 * jax.nn.sigmoid(y * scale + shift)


def spatial_mlp_kernel(x_ref, w1_ref, w2_ref, bn_ref, o_ref):
    x = x_ref[...]                 # (G, B, D) f32
    bn = bn_ref[...]               # (8, D) f32: [gamma1, beta1, gamma2, beta2, pad*4]
    h = _context_gating(x, w1_ref[...], bn[0:1], bn[1:2])
    out = _context_gating(h, w2_ref[...], bn[2:3], bn[3:4])
    o_ref[...] = out.astype(o_ref.dtype)


def _min_grid_steps():
    """Minimum grid steps so dimension_semantics=('parallel',) can feed every core."""
    try:
        kind = jax.devices()[0].device_kind.lower()
    except Exception:
        return 1
    # v7x has 2 TensorCores; v4/v5p are megacore (2 cores).  v5e/v6e: 1 core,
    # so a single big step minimizes per-step overhead.
    return 2 if ("v7" in kind or "v4" in kind or "v5p" in kind) else 1


def _pick_group(N, B, D, cap_instances, min_steps):
    """Largest divisor G of N with G <= caps and N // G >= min_steps."""
    per_instance = 2 * 2 * B * D * 4             # (x + out) blocks, double-buffered, f32
    fixed = 2 * 2 * D * D * 2 + 2 * 8 * D * 4    # two bf16 weights + BN pack (2-buf)
    vmem_cap = max(1, (_VMEM_BUDGET - fixed) // per_instance)
    cap = max(1, min(N, cap_instances, vmem_cap))
    best = 1
    for g in range(1, cap + 1):
        if N % g == 0 and N // g >= min_steps:
            best = g
    return best


def spatial_mlp(x, params, *, instances_per_block=None):
    """Apply SpatialMLP independently to each (B, D) instance in x.

    x: (N, B, D) float32, or (B, D) for a single instance.
    """
    squeeze = x.ndim == 2
    if squeeze:
        x = x[None]
    N, B, D = x.shape

    min_steps = min(_min_grid_steps(), N)
    if instances_per_block is None:
        # Target M = G*B >= 256 rows per matmul; happily take all of N in one
        # step on single-core chips (per-step overhead dominates here).
        instances_per_block = max(N, -(-256 // B))
    G = _pick_group(N, B, D, instances_per_block, min_steps)
    grid = (N // G,)

    x_spec = pl.BlockSpec((G, B, D), lambda n: (n, 0, 0))
    # Constant index_maps -> weight / BN blocks stay VMEM-resident (no re-DMA).
    w_spec = pl.BlockSpec((D, D), lambda n: (0, 0))
    bn_spec = pl.BlockSpec((8, D), lambda n: (0, 0))

    cost = pl.CostEstimate(
        flops=4 * N * B * D * D + 12 * N * B * D,
        transcendentals=2 * N * B * D + 2 * N * D,
        bytes_accessed=2 * N * B * D * 4 + 2 * D * D * 2 + 8 * D * 4,
    )

    # Only raise the scoped-VMEM limit if the chosen block actually needs it
    # (never at these shapes; _pick_group already keeps blocks under budget).
    need = 2 * 2 * G * B * D * 4 + 2 * 2 * D * D * 2 + 2 * 8 * D * 4
    cp_kwargs = dict(dimension_semantics=("parallel",))
    if need > _VMEM_BUDGET:
        cp_kwargs["vmem_limit_bytes"] = int(need + (2 << 20))

    out = pl.pallas_call(
        spatial_mlp_kernel,
        out_shape=jax.ShapeDtypeStruct((N, B, D), x.dtype),
        grid=grid,
        in_specs=[x_spec, w_spec, w_spec, bn_spec],
        out_specs=x_spec,
        compiler_params=pltpu.CompilerParams(**cp_kwargs),
        cost_estimate=cost,
    )(x, params["w1"], params["w2"], params["bn"])
    return out[0] if squeeze else out


def init_params(key, dim):
    k1, k2, k3, k4 = jax.random.split(key, 4)
    bound = float(dim) ** -0.5
    # PyTorch-style Linear init ~ U(-1/sqrt(D), 1/sqrt(D)); weights stored as
    # bf16 (kernel payload).  Biases are kept only for the PyTorch-faithful
    # reference since they cancel under training-mode BatchNorm.
    w1 = jax.random.uniform(k1, (dim, dim), jnp.float32, -bound, bound)
    w2 = jax.random.uniform(k3, (dim, dim), jnp.float32, -bound, bound)
    b1 = jax.random.uniform(k2, (1, dim), jnp.float32, -bound, bound)
    b2 = jax.random.uniform(k4, (1, dim), jnp.float32, -bound, bound)
    # BatchNorm affine params: PyTorch defaults gamma=1, beta=0.
    g1 = jnp.ones((1, dim), jnp.float32)
    be1 = jnp.zeros((1, dim), jnp.float32)
    g2 = jnp.ones((1, dim), jnp.float32)
    be2 = jnp.zeros((1, dim), jnp.float32)
    # Pack the four (1, D) BN vectors into one sublane-tile-sized (8, D) operand.
    bn_pack = jnp.concatenate(
        [g1, be1, g2, be2, jnp.zeros((4, dim), jnp.float32)], axis=0)
    return dict(
        w1=w1.astype(jnp.bfloat16), w2=w2.astype(jnp.bfloat16), bn=bn_pack,
        b1=b1, b2=b2, g1=g1, be1=be1, g2=g2, be2=be2,  # reference-only
    )


def reference(x, p):
    """PyTorch-faithful pure-JAX reference: f32 matmul (with the Linear bias),
    two-pass biased variance, applied independently per instance."""
    w1 = p["w1"].astype(jnp.float32)
    w2 = p["w2"].astype(jnp.float32)

    def cg(xi, w, b, g, be):
        y = xi @ w + b
        m = jnp.mean(y, axis=0, keepdims=True)
        v = jnp.mean((y - m) ** 2, axis=0, keepdims=True)
        y = (y - m) / jnp.sqrt(v + EPS) * g + be
        return xi * jax.nn.sigmoid(y)

    def one(xi):
        h = cg(xi, w1, p["b1"], p["g1"], p["be1"])
        return cg(h, w2, p["b2"], p["g2"], p["be2"])

    return jax.vmap(one)(x)


def reference_mirror(x, p):
    """Reference mirroring the kernel's precision choices (bf16 matmul inputs,
    f32 accumulate, bias dropped, one-pass variance) for a tight check."""
    def cg(xi, w, g, be):
        y = jnp.dot(xi.astype(jnp.bfloat16), w, preferred_element_type=jnp.float32)
        m = jnp.mean(y, axis=0, keepdims=True)
        v = jnp.maximum(jnp.mean(y * y, axis=0, keepdims=True) - m * m, 0.0)
        s = g * jax.lax.rsqrt(v + EPS)
        return xi * jax.nn.sigmoid(y * s + (be - m * s))

    def one(xi):
        h = cg(xi, p["w1"], p["g1"], p["be1"])
        return cg(h, p["w2"], p["g2"], p["be2"])

    return jax.vmap(one)(x)


if __name__ == "__main__":
    key = jax.random.PRNGKey(0)
    kx, kp = jax.random.split(key)

    D = 128   # feature dimension (BatchNorm1d => module input is 2D (batch, D))
    B = 8     # per-instance batch rows (one sublane tile)
    N = 32    # independent instances fused into one pallas_call

    x = jax.random.normal(kx, (N, B, D), jnp.float32)
    params = init_params(kp, D)

    out = jax.block_until_ready(spatial_mlp(x, params))
    assert out.shape == (N, B, D)

    # Tight check vs. a reference mirroring the kernel's bf16-matmul precision.
    mir = reference_mirror(x, params)
    assert jnp.allclose(out, mir, atol=1e-3, rtol=1e-3), "mismatch vs mirror reference"

    # Semantics check vs. the PyTorch-faithful f32 reference (includes the Linear
    # bias, which cancels exactly under training-mode BN).  Tolerance covers the
    # bf16 matmul inputs; BN/gate math is f32 in both.
    ref = reference(x, params)
    assert jnp.allclose(out, ref, atol=3e-2, rtol=3e-2), "mismatch vs f32 reference"

    print("KERNEL_OK")
</pallas_src>

<mosaic_0001>
module attributes {stable_mosaic.version = 11 : i64} {
  func.func @spatial_mlp_kernel(%arg0: i32, %arg1: memref<32x8x128xf32, #tpu.memory_space<vmem>>, %arg2: memref<128x128xbf16, #tpu.memory_space<vmem>>, %arg3: memref<128x128xbf16, #tpu.memory_space<vmem>>, %arg4: memref<8x128xf32, #tpu.memory_space<vmem>>, %arg5: memref<32x8x128xf32, #tpu.memory_space<vmem>>) attributes {dimension_semantics = [#tpu.dimension_semantics<parallel>], iteration_bounds = array<i64: 1>, scalar_prefetch = 0 : i64, scratch_operands = 0 : i64, tpu.core_type = #tpu.core_type<tc>, window_params = [{transform_indices = @transform_0, window_bounds = array<i64: 32, 8, 128>}, {pipeline_mode = #tpu.pipeline_mode<synchronous>, transform_indices = @transform_1, window_bounds = array<i64: 128, 128>}, {pipeline_mode = #tpu.pipeline_mode<synchronous>, transform_indices = @transform_2, window_bounds = array<i64: 128, 128>}, {pipeline_mode = #tpu.pipeline_mode<synchronous>, transform_indices = @transform_3, window_bounds = array<i64: 8, 128>}, {transform_indices = @transform_4, window_bounds = array<i64: 32, 8, 128>}]} {
    %c0 = arith.constant 0 : index
    %c0_0 = arith.constant 0 : index
    %c0_1 = arith.constant 0 : index
    %0 = vector.load %arg1[%c0, %c0_0, %c0_1] : memref<32x8x128xf32, #tpu.memory_space<vmem>>, vector<32x8x128xf32>
    %c0_2 = arith.constant 0 : index
    %c0_3 = arith.constant 0 : index
    %1 = vector.load %arg4[%c0_2, %c0_3] : memref<8x128xf32, #tpu.memory_space<vmem>>, vector<8x128xf32>
    %c0_4 = arith.constant 0 : index
    %c0_5 = arith.constant 0 : index
    %2 = vector.load %arg2[%c0_4, %c0_5] : memref<128x128xbf16, #tpu.memory_space<vmem>>, vector<128x128xbf16>
    %3 = vector.extract_strided_slice %1 {offsets = [0, 0], sizes = [1, 128], strides = [1, 1]} : vector<8x128xf32> to vector<1x128xf32>
    %4 = vector.extract_strided_slice %1 {offsets = [1, 0], sizes = [1, 128], strides = [1, 1]} : vector<8x128xf32> to vector<1x128xf32>
    %5 = vector.shape_cast %0 : vector<32x8x128xf32> to vector<256x128xf32>
    %6 = arith.truncf %5 : vector<256x128xf32> to vector<256x128xbf16>
    %cst = arith.constant dense<0.000000e+00> : vector<256x128xf32>
    %7 = tpu.matmul %6, %2, %cst {dimension_numbers = #tpu.dot_dimension_numbers<[1], [0], [0], [1], [0, 0, 1, 1], [], []>} : vector<256x128xbf16>, vector<128x128xbf16>, vector<256x128xf32> -> vector<256x128xf32>
    %8 = vector.shape_cast %7 : vector<256x128xf32> to vector<32x8x128xf32>
    %cst_6 = arith.constant dense<0.000000e+00> : vector<32x128xf32>
    %9 = vector.multi_reduction <add>, %8, %cst_6 [1] : vector<32x8x128xf32> to vector<32x128xf32>
    %10 = vector.shape_cast %9 : vector<32x128xf32> to vector<32x1x128xf32>
    %cst_7 = arith.constant 8.000000e+00 : f32
    %11 = vector.broadcast %cst_7 : f32 to vector<32x1x128xf32>
    %12 = arith.divf %10, %11 : vector<32x1x128xf32>
    %13 = arith.mulf %8, %8 : vector<32x8x128xf32>
    %cst_8 = arith.constant dense<0.000000e+00> : vector<32x128xf32>
    %14 = vector.multi_reduction <add>, %13, %cst_8 [1] : vector<32x8x128xf32> to vector<32x128xf32>
    %15 = vector.shape_cast %14 : vector<32x128xf32> to vector<32x1x128xf32>
    %cst_9 = arith.constant 8.000000e+00 : f32
    %16 = vector.broadcast %cst_9 : f32 to vector<32x1x128xf32>
    %17 = arith.divf %15, %16 : vector<32x1x128xf32>
    %18 = arith.mulf %12, %12 : vector<32x1x128xf32>
    %19 = arith.subf %17, %18 : vector<32x1x128xf32>
    %cst_10 = arith.constant 0.000000e+00 : f32
    %20 = vector.broadcast %cst_10 : f32 to vector<32x1x128xf32>
    %21 = arith.maximumf %19, %20 : vector<32x1x128xf32>
    %cst_11 = arith.constant 9.99999974E-6 : f32
    %22 = vector.broadcast %cst_11 : f32 to vector<32x1x128xf32>
    %23 = arith.addf %21, %22 : vector<32x1x128xf32>
    %24 = math.rsqrt %23 : vector<32x1x128xf32>
    %25 = vector.shape_cast %3 : vector<1x128xf32> to vector<1x1x128xf32>
    %26 = vector.broadcast %25 : vector<1x1x128xf32> to vector<32x1x128xf32>
    %27 = arith.mulf %26, %24 : vector<32x1x128xf32>
    %28 = arith.mulf %12, %27 : vector<32x1x128xf32>
    %29 = vector.shape_cast %4 : vector<1x128xf32> to vector<1x1x128xf32>
    %30 = vector.broadcast %29 : vector<1x1x128xf32> to vector<32x1x128xf32>
    %31 = arith.subf %30, %28 : vector<32x1x128xf32>
    %32 = vector.broadcast %27 : vector<32x1x128xf32> to vector<32x8x128xf32>
    %33 = arith.mulf %8, %32 : vector<32x8x128xf32>
    %34 = vector.broadcast %31 : vector<32x1x128xf32> to vector<32x8x128xf32>
    %35 = arith.addf %33, %34 : vector<32x8x128xf32>
    %36 = arith.negf %35 : vector<32x8x128xf32>
    %37 = math.exp %36 : vector<32x8x128xf32>
    %cst_12 = arith.constant 1.000000e+00 : f32
    %38 = vector.broadcast %cst_12 : f32 to vector<32x8x128xf32>
    %39 = arith.addf %38, %37 : vector<32x8x128xf32>
    %40 = arith.divf %38, %39 : vector<32x8x128xf32>
    %41 = arith.mulf %0, %40 : vector<32x8x128xf32>
    %c0_13 = arith.constant 0 : index
    %c0_14 = arith.constant 0 : index
    %42 = vector.load %arg3[%c0_13, %c0_14] : memref<128x128xbf16, #tpu.memory_space<vmem>>, vector<128x128xbf16>
    %43 = vector.extract_strided_slice %1 {offsets = [2, 0], sizes = [1, 128], strides = [1, 1]} : vector<8x128xf32> to vector<1x128xf32>
    %44 = vector.extract_strided_slice %1 {offsets = [3, 0], sizes = [1, 128], strides = [1, 1]} : vector<8x128xf32> to vector<1x128xf32>
    %45 = vector.shape_cast %41 : vector<32x8x128xf32> to vector<256x128xf32>
    %46 = arith.truncf %45 : vector<256x128xf32> to vector<256x128xbf16>
    %cst_15 = arith.constant dense<0.000000e+00> : vector<256x128xf32>
    %47 = tpu.matmul %46, %42, %cst_15 {dimension_numbers = #tpu.dot_dimension_numbers<[1], [0], [0], [1], [0, 0, 1, 1], [], []>} : vector<256x128xbf16>, vector<128x128xbf16>, vector<256x128xf32> -> vector<256x128xf32>
    %48 = vector.shape_cast %47 : vector<256x128xf32> to vector<32x8x128xf32>
    %cst_16 = arith.constant dense<0.000000e+00> : vector<32x128xf32>
    %49 = vector.multi_reduction <add>, %48, %cst_16 [1] : vector<32x8x128xf32> to vector<32x128xf32>
    %50 = vector.shape_cast %49 : vector<32x128xf32> to vector<32x1x128xf32>
    %cst_17 = arith.constant 8.000000e+00 : f32
    %51 = vector.broadcast %cst_17 : f32 to vector<32x1x128xf32>
    %52 = arith.divf %50, %51 : vector<32x1x128xf32>
    %53 = arith.mulf %48, %48 : vector<32x8x128xf32>
    %cst_18 = arith.constant dense<0.000000e+00> : vector<32x128xf32>
    %54 = vector.multi_reduction <add>, %53, %cst_18 [1] : vector<32x8x128xf32> to vector<32x128xf32>
    %55 = vector.shape_cast %54 : vector<32x128xf32> to vector<32x1x128xf32>
    %cst_19 = arith.constant 8.000000e+00 : f32
    %56 = vector.broadcast %cst_19 : f32 to vector<32x1x128xf32>
    %57 = arith.divf %55, %56 : vector<32x1x128xf32>
    %58 = arith.mulf %52, %52 : vector<32x1x128xf32>
    %59 = arith.subf %57, %58 : vector<32x1x128xf32>
    %cst_20 = arith.constant 0.000000e+00 : f32
    %60 = vector.broadcast %cst_20 : f32 to vector<32x1x128xf32>
    %61 = arith.maximumf %59, %60 : vector<32x1x128xf32>
    %cst_21 = arith.constant 9.99999974E-6 : f32
    %62 = vector.broadcast %cst_21 : f32 to vector<32x1x128xf32>
    %63 = arith.addf %61, %62 : vector<32x1x128xf32>
    %64 = math.rsqrt %63 : vector<32x1x128xf32>
    %65 = vector.shape_cast %43 : vector<1x128xf32> to vector<1x1x128xf32>
    %66 = vector.broadcast %65 : vector<1x1x128xf32> to vector<32x1x128xf32>
    %67 = arith.mulf %66, %64 : vector<32x1x128xf32>
    %68 = arith.mulf %52, %67 : vector<32x1x128xf32>
    %69 = vector.shape_cast %44 : vector<1x128xf32> to vector<1x1x128xf32>
    %70 = vector.broadcast %69 : vector<1x1x128xf32> to vector<32x1x128xf32>
    %71 = arith.subf %70, %68 : vector<32x1x128xf32>
    %72 = vector.broadcast %67 : vector<32x1x128xf32> to vector<32x8x128xf32>
    %73 = arith.mulf %48, %72 : vector<32x8x128xf32>
    %74 = vector.broadcast %71 : vector<32x1x128xf32> to vector<32x8x128xf32>
    %75 = arith.addf %73, %74 : vector<32x8x128xf32>
    %76 = arith.negf %75 : vector<32x8x128xf32>
    %77 = math.exp %76 : vector<32x8x128xf32>
    %cst_22 = arith.constant 1.000000e+00 : f32
    %78 = vector.broadcast %cst_22 : f32 to vector<32x8x128xf32>
    %79 = arith.addf %78, %77 : vector<32x8x128xf32>
    %80 = arith.divf %78, %79 : vector<32x8x128xf32>
    %81 = arith.mulf %41, %80 : vector<32x8x128xf32>
    %c0_23 = arith.constant 0 : index
    %c0_24 = arith.constant 0 : index
    %c0_25 = arith.constant 0 : index
    %82 = vector.load %arg5[%c0_23, %c0_24, %c0_25] : memref<32x8x128xf32, #tpu.memory_space<vmem>>, vector<32x8x128xf32>
    tpu.vector_store %arg5[%c0_23, %c0_24, %c0_25], %81 {strides = array<i32>} : memref<32x8x128xf32, #tpu.memory_space<vmem>>, vector<32x8x128xf32>,
    return
  }
  func.func @transform_0(%arg0: i32) -> (i32, i32, i32) {
    %c0_i32 = arith.constant 0 : i32
    %c0_i32_0 = arith.constant 0 : i32
    %c0_i32_1 = arith.constant 0 : i32
    return %arg0, %c0_i32, %c0_i32_0 : i32, i32, i32
  }
  func.func @transform_1(%arg0: i32) -> (i32, i32) {
    %c0_i32 = arith.constant 0 : i32
    %c0_i32_0 = arith.constant 0 : i32
    %c0_i32_1 = arith.constant 0 : i32
    return %c0_i32, %c0_i32_0 : i32, i32
  }
  func.func @transform_2(%arg0: i32) -> (i32, i32) {
    %c0_i32 = arith.constant 0 : i32
    %c0_i32_0 = arith.constant 0 : i32
    %c0_i32_1 = arith.constant 0 : i32
    return %c0_i32, %c0_i32_0 : i32, i32
  }
  func.func @transform_3(%arg0: i32) -> (i32, i32) {
    %c0_i32 = arith.constant 0 : i32
    %c0_i32_0 = arith.constant 0 : i32
    %c0_i32_1 = arith.constant 0 : i32
    return %c0_i32, %c0_i32_0 : i32, i32
  }
  func.func @transform_4(%arg0: i32) -> (i32, i32, i32) {
    %c0_i32 = arith.constant 0 : i32
    %c0_i32_0 = arith.constant 0 : i32
    %c0_i32_1 = arith.constant 0 : i32
    return %arg0, %c0_i32, %c0_i32_0 : i32, i32, i32
  }
}

</mosaic_0001>

<bundles_post_ra>
// kernel: tpu_custom_call.1
= control target key start
LH: loop header
LB: loop body
LE: loop exit
PB: predicated region body
PF: predicated region fallthrough
CT: control target
= control target key end

     0   :  { %9 = vsyncpa [#allocation3], 0  ;;  %s5572_s0 = inlined_call_operand.hbm [shape: f32[32,8,128], index: 0, kind: input, shape index: {}]   ;;  %s5573_s1 = inlined_call_operand.hbm [shape: bf16[128,128], index: 1, kind: input, shape index: {}]   ;;  %s5574_s2 = inlined_call_operand.hbm [shape: bf16[128,128], index: 2, kind: input, shape index: {}]   ;;  %s5575_s3 = inlined_call_operand.hbm [shape: f32[8,128], index: 3, kind: input, shape index: {}]   ;;  %s5576_s4 = inlined_call_operand.hbm [shape: f32[32,8,128], index: 4, kind: output, shape index: {}]  }
   0x1   :  { %10 = vsyncpa [#allocation6], 0 }
   0x2   :  { %11 = vsyncpa [#allocation9], 0 }
   0x3   :  { %12 = vsyncpa [#allocation4], 0  ;;  %s4168_s15 = smov [#allocation5]  }
   0x4   :  { %s30_s16 = sshll.u32 %s4168_s15, 4  ;;  %s31_s16 = int_to_ptr.vmem [resolvable:$true] %s30_s16 }
   0x5   :  { %s4068_s17 = scalar_lea.vmem %s31_s16, 1024  ;;  %p4073_p1 = scmp.lt.s32.totalorder %s31_s16, %s31_s16 }
   0x6   :  { %p4069_p0 = scmp.ne.s32.totalorder %s31_s16, %s4068_s17  ;;  %p4074_p2 = scmp.lt.s32.totalorder %s4068_s17, %s4068_s17 }
   0x8   :  { %p4075_p3 = por %p4074_p2, %p4073_p1 }
   0xa   :  { %p4076_p4 = pnand %p4075_p3, %p4069_p0 }
   0xc   :  { %4079 = shalt.err (!%p4076_p4)
}
   0xd   :  { %s4169_s18 = smov 64   ;;  %s4170_s19 = smov 4  }
   0xe   :  { %36 = dma.hbm_to_vmem [thread:$0]  %s5573_s1, 1024, %s31_s16, [#allocation6], %s4169_s18, %s4169_s18, %s4170_s19  }
   0xf   :  { %s4171_s22 = smov [#allocation2]  }
  0x10   :  { %s18_s23 = sshll.u32 %s4171_s22, 4  ;;  %s19_s23 = int_to_ptr.vmem [resolvable:$true] %s18_s23 }
  0x11   :  { %s4088_s24 = scalar_lea.vmem %s19_s23, 4096  ;;  %p4093_p6 = scmp.lt.s32.totalorder %s19_s23, %s19_s23 }
  0x12   :  { %p4089_p5 = scmp.ne.s32.totalorder %s19_s23, %s4088_s24  ;;  %p4094_p7 = scmp.lt.s32.totalorder %s4088_s24, %s4088_s24 }
  0x14   :  { %p4095_p8 = por %p4094_p7, %p4093_p6 }
  0x16   :  { %p4096_p9 = pnand %p4095_p8, %p4089_p5 }
  0x18   :  { %4099 = shalt.err (!%p4096_p9)
}
  0x19   :  { %s4172_s25 = smov 128   ;;  %s4173_s26 = smov 8  }
  0x1a   :  { %24 = dma.hbm_to_vmem [thread:$0]  %s5572_s0, 4096, %s19_s23, [#allocation3], %s4172_s25, %s4172_s25, %s4173_s26  }
  0x1b   :  { %s4174_s1 = smov [#allocation7]   ;;  %s4175_s30 = smov [#allocation8]  }
  0x1c   :  { %s42_s29 = sshll.u32 %s4174_s1, 4  ;;  %s55_s5 = sshll.u32 %s4175_s30, 4  ;;  %s43_s29 = int_to_ptr.vmem [resolvable:$true] %s42_s29  ;;  %s56_s5 = int_to_ptr.vmem [resolvable:$true] %s55_s5 }
  0x1d   :  { %s4108_s6 = scalar_lea.vmem %s43_s29, 1024  ;;  %p4113_p11 = scmp.lt.s32.totalorder %s43_s29, %s43_s29 }
  0x1e   :  { %p4109_p10 = scmp.ne.s32.totalorder %s43_s29, %s4108_s6  ;;  %p4114_p12 = scmp.lt.s32.totalorder %s4108_s6, %s4108_s6 }
  0x20   :  { %p4115_p13 = por %p4114_p12, %p4113_p11 }
  0x22   :  { %p4116_p0 = pnand %p4115_p13, %p4109_p10 }
  0x24   :  { %4119 = shalt.err (!%p4116_p0)
}
  0x25   :  { %48 = dma.hbm_to_vmem [thread:$0]  %s5574_s2, 1024, %s43_s29, [#allocation6], %s4169_s18, %s4169_s18, %s4170_s19  }
  0x26   :  { %s4128_s0 = scalar_lea.vmem %s56_s5, 128  ;;  %p4133_p2 = scmp.lt.s32.totalorder %s56_s5, %s56_s5 }
  0x27   :  { %p4129_p1 = scmp.ne.s32.totalorder %s56_s5, %s4128_s0  ;;  %p4134_p3 = scmp.lt.s32.totalorder %s4128_s0, %s4128_s0 }
  0x29   :  { %p4135_p4 = por %p4134_p3, %p4133_p2 }
  0x2b   :  { %p4136_p5 = pnand %p4135_p4, %p4129_p1 }
  0x2d   :  { %4139 = shalt.err (!%p4136_p5)
}
  0x2e   :  { %58 = dma.hbm_to_vmem [thread:$0]  %s5575_s3, 128, %s56_s5, [#allocation9]  }
  0x2f   :  { %4160 = dma.done.wait [#allocation3], 4096  }
  0x30   :  { %4161 = vsyncadd [#allocation3], 4294963200 }
  0x31   :  { %4162 = dma.done.wait [#allocation6], 2048  }
  0x32   :  { %4163 = vsyncadd [#allocation6], 4294965248 }
  0x33   :  { %4164 = dma.done.wait [#allocation9], 128  }
  0x34   :  { %4165 = vsyncadd [#allocation9], 4294967168  ;;  %v3624_v0 = vld [vmem:[#allocation5 + $0x38] sm:$0xff]   ;;  %v3625_v1 = vld [vmem:[#allocation5 + $0x30] sm:$0xff]   ;;  %v1179_v59 = vlaneseq  ;;  %s4176_s2 = smov [#allocation10]  }
  0x35   :  { %3519 = vmatprep.subr.bf16.mxu0 %v3624_v0  ;;  %v3626_v2 = vld [vmem:[#allocation5 + $0x28] sm:$0xff]   ;;  %v3627_v3 = vld [vmem:[#allocation5 + $0x20] sm:$0xff]   ;;  %v3628_v7 = vld [vmem:[#allocation5 + $0x18] sm:$0xff]   ;;  %s3377_s3 = sshll.u32 %s4176_s2, 4  ;;  %s3378_s3 = int_to_ptr.vmem [resolvable:$true] %s3377_s3 }
  0x36   :  { %3520 = vmatpush3.bf16.msra.mxu0 %v3624_v0  ;;  %v72_v4 = vld [vmem:[#allocation2] sm:$0xff]  ;;  %v73_v5 = vld [vmem:[#allocation2 + $0x8] sm:$0xff]  ;;  %v3629_v8 = vld [vmem:[#allocation5 + $0x10] sm:$0xff]   ;;  %s4140_s11 = scalar_lea.vmem %s3378_s3, 4096  ;;  %p4145_p7 = scmp.lt.s32.totalorder %s3378_s3, %s3378_s3 }
  0x37   :  { %3521 = vmatprep.subr.bf16.mxu0 %v3625_v1  ;;  %v121_v6 = vpack.c.bf16 %v73_v5, %v72_v4  ;;  %v3630_v9 = vld [vmem:[#allocation5 + $0x8] sm:$0xff]   ;;  %v3631_v10 = vld [vmem:[#allocation5] sm:$0xff]   ;;  %v74_v11 = vld [vmem:[#allocation2 + $0x10] sm:$0xff]  ;;  %p4141_p6 = scmp.ne.s32.totalorder %s3378_s3, %s4140_s11  ;;  %p4146_p8 = scmp.lt.s32.totalorder %s4140_s11, %s4140_s11 }
  0x38   :  { %v75_v12 = vld [vmem:[#allocation2 + $0x18] sm:$0xff]  ;;  %v76_v13 = vld [vmem:[#allocation2 + $0x20] sm:$0xff]  ;;  %v77_v14 = vld [vmem:[#allocation2 + $0x28] sm:$0xff] }
  0x39   :  { %3535 = vmatprep.mubr.bf16.mxu0 %v121_v6  ;;  %v122_v15 = vpack.c.bf16 %v75_v12, %v74_v11  ;;  %v123_v16 = vpack.c.bf16 %v77_v14, %v76_v13  ;;  %v78_v17 = vld [vmem:[#allocation2 + $0x30] sm:$0xff]  ;;  %v79_v18 = vld [vmem:[#allocation2 + $0x38] sm:$0xff]  ;;  %v80_v19 = vld [vmem:[#allocation2 + $0x40] sm:$0xff]  ;;  %v4237_v6 = vshrl.u32 %v1179_v59, 7  ;;  %p4147_p9 = por %p4146_p8, %p4145_p7 }
  0x3a   :  { %3522 = vmatpush3.bf16.msra.mxu0 %v3625_v1  ;;  %v81_v20 = vld [vmem:[#allocation2 + $0x48] sm:$0xff]  ;;  %v124_v21 = vpack.c.bf16 %v79_v18, %v78_v17  ;;  %v82_v23 = vld [vmem:[#allocation2 + $0x50] sm:$0xff]  ;;  %v83_v24 = vld [vmem:[#allocation2 + $0x58] sm:$0xff] }
  0x3b   :  { %3523 = vmatprep.subr.bf16.mxu0 %v3626_v2  ;;  %v125_v22 = vpack.c.bf16 %v81_v20, %v80_v19  ;;  %v84_v25 = vld [vmem:[#allocation2 + $0x60] sm:$0xff]  ;;  %v85_v26 = vld [vmem:[#allocation2 + $0x68] sm:$0xff]  ;;  %v126_v27 = vpack.c.bf16 %v83_v24, %v82_v23  ;;  %v86_v29 = vld [vmem:[#allocation2 + $0x70] sm:$0xff]  ;;  %5592 = vst [vmem:[#allocation15_spill] sm:$0xff] %v4237_v6  ;;  %p4148_p10 = pnand %p4147_p9, %p4141_p6 }
  0x3c   :  { %v127_v28 = vpack.c.bf16 %v85_v26, %v84_v25  ;;  %v87_v30 = vld [vmem:[#allocation2 + $0x78] sm:$0xff]  ;;  %v88_v31 = vld [vmem:[#allocation2 + $0x80] sm:$0xff]  ;;  %v89_v32 = vld [vmem:[#allocation2 + $0x88] sm:$0xff] }
  0x3d   :  { %v128_v33 = vpack.c.bf16 %v87_v30, %v86_v29  ;;  %v129_v34 = vpack.c.bf16 %v89_v32, %v88_v31  ;;  %v90_v35 = vld [vmem:[#allocation2 + $0x90] sm:$0xff]  ;;  %v91_v36 = vld [vmem:[#allocation2 + $0x98] sm:$0xff]  ;;  %v92_v37 = vld [vmem:[#allocation2 + $0xa0] sm:$0xff] }
  0x3e   :  { %3524 = vmatpush3.bf16.msra.mxu0 %v3626_v2  ;;  %v93_v38 = vld [vmem:[#allocation2 + $0xa8] sm:$0xff]  ;;  %v130_v39 = vpack.c.bf16 %v91_v36, %v90_v35  ;;  %v94_v41 = vld [vmem:[#allocation2 + $0xb0] sm:$0xff]  ;;  %v95_v42 = vld [vmem:[#allocation2 + $0xb8] sm:$0xff] }
  0x3f   :  { %3525 = vmatprep.subr.bf16.mxu0 %v3627_v3  ;;  %v131_v40 = vpack.c.bf16 %v93_v38, %v92_v37  ;;  %v96_v43 = vld [vmem:[#allocation2 + $0xc0] sm:$0xff]  ;;  %v97_v44 = vld [vmem:[#allocation2 + $0xc8] sm:$0xff]  ;;  %v132_v45 = vpack.c.bf16 %v95_v42, %v94_v41  ;;  %v98_v47 = vld [vmem:[#allocation2 + $0xd0] sm:$0xff] }
  0x40   :  { %v133_v46 = vpack.c.bf16 %v97_v44, %v96_v43  ;;  %v99_v48 = vld [vmem:[#allocation2 + $0xd8] sm:$0xff]  ;;  %v100_v49 = vld [vmem:[#allocation2 + $0xe0] sm:$0xff]  ;;  %v101_v50 = vld [vmem:[#allocation2 + $0xe8] sm:$0xff] }
  0x41   :  { %v134_v51 = vpack.c.bf16 %v99_v48, %v98_v47  ;;  %v135_v52 = vpack.c.bf16 %v101_v50, %v100_v49  ;;  %v102_v53 = vld [vmem:[#allocation2 + $0xf0] sm:$0xff]  ;;  %v103_v54 = vld [vmem:[#allocation2 + $0xf8] sm:$0xff] }
  0x42   :  { %3526 = vmatpush3.bf16.msra.mxu0 %v3627_v3  ;;  %v136_v55 = vpack.c.bf16 %v103_v54, %v102_v53 }
  0x43   :  { %3527 = vmatprep.subr.bf16.mxu0 %v3628_v7 }
  0x46   :  { %3528 = vmatpush3.bf16.msra.mxu0 %v3628_v7 }
  0x47   :  { %3529 = vmatprep.subr.bf16.mxu0 %v3629_v8 }
  0x4a   :  { %3530 = vmatpush3.bf16.msra.mxu0 %v3629_v8 }
  0x4b   :  { %3531 = vmatprep.subr.bf16.mxu0 %v3630_v9 }
  0x4e   :  { %3532 = vmatpush3.bf16.msra.mxu0 %v3630_v9 }
  0x4f   :  { %3533 = vmatprep.subr.bf16.mxu0 %v3631_v10 }
  0x52   :  { %3534 = vmatpush3.bf16.msra.mxu0 %v3631_v10 }
  0x55   :  { %3536 = vmatmul.mubr.bf16.vlgmr.msra.gmra.mxu0 %v122_v15 }
  0x56   :  { %3539 = vmatprep.mubr.bf16.mxu0 %v123_v16 }
  0x5d   :  { %3540 = vmatmul.mubr.bf16.gmra.mxu0 %v124_v21 }
  0x5e   :  { %3543 = vmatprep.mubr.bf16.mxu0 %v125_v22 }
  0x65   :  { %3544 = vmatmul.mubr.bf16.gmra.mxu0 %v126_v27 }
  0x66   :  { %3547 = vmatprep.mubr.bf16.mxu0 %v127_v28 }
  0x6d   :  { %3548 = vmatmul.mubr.bf16.gmra.mxu0 %v128_v33 }
  0x6e   :  { %3551 = vmatprep.mubr.bf16.mxu0 %v129_v34 }
  0x75   :  { %3552 = vmatmul.mubr.bf16.gmra.mxu0 %v130_v39 }
  0x76   :  { %3555 = vmatprep.mubr.bf16.mxu0 %v131_v40 }
  0x7d   :  { %3556 = vmatmul.mubr.bf16.gmra.mxu0 %v132_v45 }
  0x7e   :  { %3559 = vmatprep.mubr.bf16.mxu0 %v133_v46 }
  0x85   :  { %3560 = vmatmul.mubr.bf16.gmra.mxu0 %v134_v51 }
  0x86   :  { %3563 = vmatprep.mubr.bf16.mxu0 %v135_v52 }
  0x8d   :  { %3564 = vmatmul.mubr.bf16.gmra.mxu0 %v136_v55 }
 0x115   :  { %v4223_v56 = vpop.f32.mrf.mxu0 }
 0x116   :  { %v358_v57 = vrot.slane %v4223_v56, 4  ;;  %v573_v58 = vmul.f32 %v4223_v56, %v4223_v56 }
 0x117   :  { %v4228_v60 = vpop.f32.mrf.mxu0 }
 0x118   :  { %v359_v61 = vadd.f32 %v4223_v56, %v358_v57  ;;  %v615_v62 = vrot.slane %v573_v58, 4  ;;  %v346_v63 = vrot.slane %v4228_v60, 4  ;;  %v571_v0 = vmul.f32 %v4228_v60, %v4228_v60 }
 0x119   :  { %v4234_v1 = vpop.f32.mrf.mxu0 }
 0x11a   :  { %v360_v2 = vrot.slane %v359_v61, 2  ;;  %v616_v3 = vadd.f32 %v615_v62, %v573_v58  ;;  %v347_v4 = vadd.f32 %v346_v63, %v4228_v60  ;;  %v603_v5 = vrot.slane %v571_v0, 4 }
 0x11b   :  { %v364_v7 = vrot.slane %v4234_v1, 4  ;;  %v574_v8 = vmul.f32 %v4234_v1, %v4234_v1  ;;  %v4242_v9 = vpop.f32.mrf.mxu0 }
 0x11c   :  { %v361_v10 = vadd.f32 %v360_v2, %v359_v61  ;;  %v617_v11 = vrot.slane %v616_v3, 2  ;;  %v348_v12 = vrot.slane %v347_v4, 2  ;;  %v604_v13 = vadd.f32 %v603_v5, %v571_v0 }
 0x11d   :  { %v365_v14 = vadd.f32 %v4234_v1, %v364_v7  ;;  %v621_v15 = vrot.slane %v574_v8, 4  ;;  %v352_v16 = vrot.slane %v4242_v9, 4  ;;  %v572_v17 = vmul.f32 %v4242_v9, %v4242_v9  ;;  %v4251_v42 = vpop.f32.mrf.mxu0 }
 0x11e   :  { %v362_v18 = vrot.slane %v361_v10, 1  ;;  %v618_v19 = vadd.f32 %v617_v11, %v616_v3  ;;  %v349_v20 = vadd.f32 %v348_v12, %v347_v4  ;;  %v605_v21 = vrot.slane %v604_v13, 2 }
 0x11f   :  { %v366_v22 = vrot.slane %v365_v14, 2  ;;  %v622_v23 = vadd.f32 %v621_v15, %v574_v8  ;;  %v353_v24 = vadd.f32 %v352_v16, %v4242_v9  ;;  %v609_v25 = vrot.slane %v572_v17, 4  ;;  %v4262_v61 = vpop.f32.mrf.mxu0 }
 0x120   :  { %v363_v26 = vadd.f32 %v362_v18, %v361_v10  ;;  %v619_v27 = vrot.slane %v618_v19, 1  ;;  %v350_v28 = vrot.slane %v349_v20, 1  ;;  %v606_v29 = vadd.f32 %v605_v21, %v604_v13 }
 0x121   :  { %v367_v30 = vadd.f32 %v366_v22, %v365_v14  ;;  %v623_v31 = vrot.slane %v622_v23, 2  ;;  %v354_v32 = vrot.slane %v353_v24, 2  ;;  %v610_v33 = vadd.f32 %v609_v25, %v572_v17  ;;  %v4274_v17 = vpop.f32.mrf.mxu0 }
 0x122   :  { %v4249_v34 = vmul.f32 0.125, %v363_v26  ;;  %v620_v35 = vadd.f32 %v619_v27, %v618_v19  ;;  %v351_v36 = vadd.f32 %v350_v28, %v349_v20  ;;  %v607_v37 = vrot.slane %v606_v29, 1 }
 0x123   :  { %v368_v38 = vrot.slane %v367_v30, 1  ;;  %v624_v39 = vadd.f32 %v623_v31, %v622_v23  ;;  %v355_v40 = vadd.f32 %v354_v32, %v353_v24  ;;  %v611_v41 = vrot.slane %v610_v33, 2  ;;  %v4280_v32 = vpop.f32.mrf.mxu0 }
 0x124   :  { %v797_v43 = vmul.f32 0.125, %v620_v35  ;;  %v829_v44 = vmul.f32 %v4249_v34, %v4249_v34  ;;  %v4255_v45 = vmul.f32 0.125, %v351_v36  ;;  %v608_v46 = vadd.f32 %v607_v37, %v606_v29 }
 0x125   :  { %v369_v47 = vadd.f32 %v368_v38, %v367_v30  ;;  %v625_v48 = vrot.slane %v624_v39, 1  ;;  %v356_v49 = vrot.slane %v355_v40, 1  ;;  %v612_v50 = vadd.f32 %v611_v41, %v610_v33 }
 0x126   :  { %v861_v51 = vsub.f32 %v797_v43, %v829_v44  ;;  %v795_v52 = vmul.f32 0.125, %v608_v46  ;;  %v827_v53 = vmul.f32 %v4255_v45, %v4255_v45  ;;  %v382_v54 = vrot.slane %v4251_v42, 4 }
 0x127   :  { %v4260_v55 = vmul.f32 0.125, %v369_v47  ;;  %v626_v57 = vadd.f32 %v625_v48, %v624_v39  ;;  %v357_v58 = vadd.f32 %v356_v49, %v355_v40  ;;  %v613_v59 = vrot.slane %v612_v50, 1 }
 0x128   :  { %v893_v62 = vmax.f32 %v861_v51, 0.0  ;;  %v859_v63 = vsub.f32 %v795_v52, %v827_v53  ;;  %v383_v0 = vadd.f32 %v4251_v42, %v382_v54  ;;  %v577_v2 = vmul.f32 %v4251_v42, %v4251_v42 }
 0x129   :  { %v798_v3 = vmul.f32 0.125, %v626_v57  ;;  %v830_v4 = vmul.f32 %v4260_v55, %v4260_v55  ;;  %v4269_v5 = vmul.f32 0.125, %v357_v58  ;;  %v614_v7 = vadd.f32 %v613_v59, %v612_v50  ;;  %v4288_v50 = vpop.f32.mrf.mxu0 }
 0x12a   :  { %v925_v8 = vadd.f32 1e-05, %v893_v62  ;;  %v891_v10 = vmax.f32 %v859_v63, 0.0  ;;  %v384_v11 = vrot.slane %v383_v0, 2  ;;  %v639_v12 = vrot.slane %v577_v2, 4 }
 0x12b   :  { %v862_v13 = vsub.f32 %v798_v3, %v830_v4  ;;  %v796_v14 = vmul.f32 0.125, %v614_v7  ;;  %v828_v15 = vmul.f32 %v4269_v5, %v4269_v5  ;;  %v370_v16 = vrot.slane %v4262_v61, 4  ;;  %v4296_v4 = vld [vmem:[#allocation8] sm:$0xff] }
 0x12c   :  { %3640 = vrsqrt.f32 %v925_v8  ;;  %v923_v18 = vadd.f32 1e-05, %v891_v10  ;;  %v385_v19 = vadd.f32 %v384_v11, %v383_v0  ;;  %v640_v20 = vadd.f32 %v639_v12, %v577_v2 }
 0x12d   :  { %v894_v21 = vmax.f32 %v862_v13, 0.0  ;;  %v860_v22 = vsub.f32 %v796_v14, %v828_v15  ;;  %v371_v23 = vadd.f32 %v370_v16, %v4262_v61  ;;  %v575_v24 = vmul.f32 %v4262_v61, %v4262_v61 }
 0x12e   :  { %3642 = vrsqrt.f32 %v923_v18  ;;  %v386_v25 = vrot.slane %v385_v19, 1  ;;  %v641_v26 = vrot.slane %v640_v20, 2  ;;  %v388_v27 = vrot.slane %v4274_v17, 4 }
 0x12f   :  { %v926_v28 = vadd.f32 1e-05, %v894_v21  ;;  %v892_v29 = vmax.f32 %v860_v22, 0.0  ;;  %v372_v30 = vrot.slane %v371_v23, 2  ;;  %v627_v31 = vrot.slane %v575_v24, 4 }
 0x130   :  { %v387_v33 = vadd.f32 %v386_v25, %v385_v19  ;;  %v642_v35 = vadd.f32 %v641_v26, %v640_v20  ;;  %v389_v36 = vadd.f32 %v4274_v17, %v388_v27  ;;  %v578_v37 = vmul.f32 %v4274_v17, %v4274_v17 }
 0x131   :  { %3644 = vrsqrt.f32 %v926_v28  ;;  %v924_v38 = vadd.f32 1e-05, %v892_v29  ;;  %v373_v39 = vadd.f32 %v372_v30, %v371_v23  ;;  %v628_v40 = vadd.f32 %v627_v31, %v575_v24 }
 0x132   :  { %v4285_v41 = vmul.f32 0.125, %v387_v33  ;;  %v643_v43 = vrot.slane %v642_v35, 1  ;;  %v390_v44 = vrot.slane %v389_v36, 2  ;;  %v645_v46 = vrot.slane %v578_v37, 4 }
 0x133   :  { %3646 = vrsqrt.f32 %v924_v38  ;;  %v374_v47 = vrot.slane %v373_v39, 1  ;;  %v629_v48 = vrot.slane %v628_v40, 2  ;;  %v376_v49 = vrot.slane %v4280_v32, 4 }
 0x134   :  { %v644_v51 = vadd.f32 %v643_v43, %v642_v35  ;;  %v833_v52 = vmul.f32 %v4285_v41, %v4285_v41  ;;  %v391_v53 = vadd.f32 %v390_v44, %v389_v36  ;;  %v646_v54 = vadd.f32 %v645_v46, %v578_v37 }
 0x135   :  { %v375_v57 = vadd.f32 %v374_v47, %v373_v39  ;;  %v630_v58 = vadd.f32 %v629_v48, %v628_v40  ;;  %v377_v59 = vadd.f32 %v376_v49, %v4280_v32  ;;  %v576_v62 = vmul.f32 %v4280_v32, %v4280_v32 }
 0x136   :  { %v801_v63 = vmul.f32 0.125, %v644_v51  ;;  %v392_v0 = vrot.slane %v391_v53, 1  ;;  %v647_v2 = vrot.slane %v646_v54, 2  ;;  %v406_v3 = vrot.slane %v4288_v50, 4 }
 0x137   :  { %v4298_v7 = vmul.f32 0.125, %v375_v57  ;;  %v631_v8 = vrot.slane %v630_v58, 1  ;;  %v378_v10 = vrot.slane %v377_v59, 2  ;;  %v633_v11 = vrot.slane %v576_v62, 4 }
 0x138   :  { %v4301_v12 = vsub.s32 0, %v4237_v6  ;;  %v865_v13 = vsub.f32 %v801_v63, %v833_v52  ;;  %v393_v14 = vadd.f32 %v392_v0, %v391_v53  ;;  %v648_v15 = vadd.f32 %v647_v2, %v646_v54 }
 0x139   :  { %v3641_v16 = vpop.eup %3640  ;;  %v632_v18 = vadd.f32 %v631_v8, %v630_v58  ;;  %v831_v19 = vmul.f32 %v4298_v7, %v4298_v7  ;;  %v379_v20 = vadd.f32 %v378_v10, %v377_v59  ;;  %v634_v21 = vadd.f32 %v633_v11, %v576_v62 }
 0x13a   :  { %v989_v22 = vmul.f32 %v3641_v16, %v4296_v4  ;;  %v897_v23 = vmax.f32 %v865_v13, 0.0  ;;  %v4306_v24 = vmul.f32 0.125, %v393_v14  ;;  %v649_v25 = vrot.slane %v648_v15, 1 }
 0x13b   :  { %v3643_v26 = vpop.eup %3642  ;;  %v4309_v27 = vsub.s32 1, %v4237_v6  ;;  %v799_v28 = vmul.f32 0.125, %v632_v18  ;;  %v380_v29 = vrot.slane %v379_v20, 1  ;;  %v407_v30 = vadd.f32 %v4288_v50, %v406_v3 }
 0x13c   :  { %v1021_v31 = vmul.f32 %v989_v22, %v4249_v34  ;;  %v987_v33 = vmul.f32 %v3643_v26, %v4296_v4  ;;  %v929_v35 = vadd.f32 1e-05, %v897_v23  ;;  %v635_v36 = vrot.slane %v634_v21, 2 }
 0x13d   :  { %v1190_v37 = vrot.slane %v989_v22, %v4301_v12  ;;  %v863_v38 = vsub.f32 %v799_v28, %v831_v19  ;;  %v650_v39 = vadd.f32 %v649_v25, %v648_v15  ;;  %v834_v40 = vmul.f32 %v4306_v24, %v4306_v24  ;;  %v4336_v19 = vpop.f32.mrf.mxu0 }
 0x13e   :  { %v3645_v43 = vpop.eup %3644  ;;  %v1085_v44 = vrot.slane %v1021_v31, 7  ;;  %v1019_v46 = vmul.f32 %v987_v33, %v4255_v45  ;;  %v1182_v47 = vrot.slane %v987_v33, %v4301_v12  ;;  %v381_v48 = vadd.f32 %v380_v29, %v379_v20 }
 0x13f   :  { %v990_v34 = vmul.f32 %v3645_v43, %v4296_v4  ;;  %3648 = vrsqrt.f32 %v929_v35  ;;  %v895_v49 = vmax.f32 %v863_v38, 0.0  ;;  %v802_v51 = vmul.f32 0.125, %v650_v39 }
 0x140   :  { %v3647_v52 = vpop.eup %3646  ;;  %v1149_v53 = vsub.f32 %v4296_v4, %v1085_v44  ;;  %v1083_v54 = vrot.slane %v1019_v46, 7  ;;  %v408_v57 = vrot.slane %v407_v30, 2  ;;  %v1309_v58 = vmul.f32 %v4223_v56, %v1190_v37 }
 0x141   :  { %v1022_v59 = vmul.f32 %v990_v34, %v4260_v55  ;;  %v4324_v62 = vmul.f32 %v3647_v52, %v4296_v4  ;;  %v927_v45 = vadd.f32 1e-05, %v895_v49  ;;  %v866_v2 = vsub.f32 %v802_v51, %v834_v40  ;;  %v4347_v40 = vpop.f32.mrf.mxu0 }
 0x142   :  { %v1350_v63 = vrot.slane %v1149_v53, %v4309_v27  ;;  %v1147_v0 = vsub.f32 %v4296_v4, %v1083_v54  ;;  %v636_v3 = vadd.f32 %v635_v36, %v634_v21  ;;  %v1307_v8 = vmul.f32 %v1182_v47, %v4228_v60 }
 0x143   :  { %v1086_v10 = vrot.slane %v1022_v59, 7  ;;  %v1020_v11 = vmul.f32 %v4324_v62, %v4269_v5  ;;  %v4331_v13 = vmul.f32 0.125, %v381_v48  ;;  %3650 = vrsqrt.f32 %v927_v45 }
 0x144   :  { %v1469_v56 = vadd.f32 %v1350_v63, %v1309_v58  ;;  %v1342_v55 = vrot.slane %v1147_v0, %v4309_v27  ;;  %v898_v14 = vmax.f32 %v866_v2, 0.0  ;;  %v1194_v16 = vrot.slane %v990_v34, %v4301_v12 }
 0x145   :  { %v1150_v15 = vsub.f32 %v4296_v4, %v1086_v10  ;;  %v637_v18 = vrot.slane %v636_v3, 1  ;;  %v1084_v21 = vrot.slane %v1020_v11, 7  ;;  %v832_v25 = vmul.f32 %v4331_v13, %v4331_v13 }
 0x146   :  { %v3401_v20 = vmul.f32 -1.442695, %v1469_v56  ;;  %v1467_v60 = vadd.f32 %v1342_v55, %v1307_v8  ;;  %v930_v22 = vadd.f32 1e-05, %v898_v14  ;;  %v409_v26 = vadd.f32 %v408_v57, %v407_v30 }
 0x147   :  { %v1354_v5 = vrot.slane %v1150_v15, %v4309_v27  ;;  %v638_v23 = vadd.f32 %v637_v18, %v636_v3  ;;  %v581_v28 = vmul.f32 %v4288_v50, %v4288_v50  ;;  %v394_v29 = vrot.slane %v4336_v19, 4 }
 0x148   :  { %3652 = vpow2.f32 %v3401_v20  ;;  %v3399_v31 = vmul.f32 -1.442695, %v1467_v60  ;;  %v1310_v33 = vmul.f32 %v4234_v1, %v1194_v16  ;;  %v1148_v36 = vsub.f32 %v4296_v4, %v1084_v21 }
 0x149   :  { %v800_v35 = vmul.f32 0.125, %v638_v23  ;;  %v410_v37 = vrot.slane %v409_v26, 1  ;;  %v663_v38 = vrot.slane %v581_v28, 4  ;;  %v395_v39 = vadd.f32 %v394_v29, %v4336_v19 }
 0x14a   :  { %v1470_v43 = vadd.f32 %v1354_v5, %v1310_v33  ;;  %3654 = vrsqrt.f32 %v930_v22  ;;  %v579_v44 = vmul.f32 %v4336_v19, %v4336_v19  ;;  %v1186_v47 = vrot.slane %v4324_v62, %v4301_v12 }
 0x14b   :  { %v864_v30 = vsub.f32 %v800_v35, %v832_v25  ;;  %v411_v1 = vadd.f32 %v410_v37, %v409_v26  ;;  %v664_v48 = vadd.f32 %v663_v38, %v581_v28  ;;  %v396_v34 = vrot.slane %v395_v39, 2 }
 0x14c   :  { %v3649_v46 = vpop.eup %3648  ;;  %3656 = vpow2.f32 %v3399_v31  ;;  %v412_v52 = vrot.slane %v4347_v40, 4  ;;  %v651_v57 = vrot.slane %v579_v44, 4  ;;  %v3402_v58 = vmul.f32 -1.442695, %v1470_v43 }
 0x14d   :  { %v993_v49 = vmul.f32 %v3649_v46, %v4296_v4  ;;  %v896_v51 = vmax.f32 %v864_v30, 0.0  ;;  %v665_v53 = vrot.slane %v664_v48, 2  ;;  %v397_v54 = vadd.f32 %v396_v34, %v395_v39 }
 0x14e   :  { %v1346_v59 = vrot.slane %v1148_v36, %v4309_v27  ;;  %v4357_v0 = vmul.f32 0.125, %v411_v1  ;;  %v652_v3 = vadd.f32 %v651_v57, %v579_v44  ;;  %v1308_v10 = vmul.f32 %v1186_v47, %v4242_v9  ;;  %v4373_v44 = vpop.f32.mrf.mxu0 }
 0x14f   :  { %v1025_v45 = vmul.f32 %v993_v49, %v4285_v41  ;;  %v928_v63 = vadd.f32 1e-05, %v896_v51  ;;  %v666_v62 = vadd.f32 %v665_v53, %v664_v48  ;;  %v398_v2 = vrot.slane %v397_v54, 1 }
 0x150   :  { %v3651_v8 = vpop.eup %3650  ;;  %v413_v56 = vadd.f32 %v4347_v40, %v412_v52  ;;  %v653_v15 = vrot.slane %v652_v3, 2  ;;  %v1468_v16 = vadd.f32 %v1346_v59, %v1308_v10  ;;  %v837_v21 = vmul.f32 %v4357_v0, %v4357_v0  ;;  %v4386_v10 = vpop.f32.mrf.mxu0 }
 0x151   :  { %v1089_v11 = vrot.slane %v1025_v45, 7  ;;  %3658 = vrsqrt.f32 %v928_v63  ;;  %v667_v55 = vrot.slane %v666_v62, 1  ;;  %v399_v14 = vadd.f32 %v398_v2, %v397_v54 }
 0x152   :  { %3660 = vpow2.f32 %v3402_v58  ;;  %v991_v41 = vmul.f32 %v3651_v8, %v4296_v4  ;;  %v414_v18 = vrot.slane %v413_v56, 2  ;;  %v1206_v9 = vrot.slane %v993_v49, %v4301_v12 }
 0x153   :  { %v1153_v20 = vsub.f32 %v4296_v4, %v1089_v11  ;;  %v668_v60 = vadd.f32 %v667_v55, %v666_v62  ;;  %v654_v22 = vadd.f32 %v653_v15, %v652_v3  ;;  %v582_v5 = vmul.f32 %v4347_v40, %v4347_v40 }
 0x154   :  { %v4368_v26 = vmul.f32 0.125, %v399_v14  ;;  %v415_v28 = vadd.f32 %v414_v18, %v413_v56  ;;  %v3400_v29 = vmul.f32 -1.442695, %v1468_v16  ;;  %v1023_v31 = vmul.f32 %v991_v41, %v4298_v7 }
 0x155   :  { %v3653_v23 = vpop.eup %3652  ;;  %v805_v25 = vmul.f32 0.125, %v668_v60  ;;  %v655_v33 = vrot.slane %v654_v22, 1  ;;  %v1366_v36 = vrot.slane %v1153_v20, %v4309_v27  ;;  %v1313_v39 = vmul.f32 %v4251_v42, %v1206_v9 }
 0x156   :  { %v1597_v38 = vadd.f32 1.0, %v3653_v23  ;;  %v669_v30 = vrot.slane %v582_v5, 4  ;;  %v1198_v47 = vrot.slane %v991_v41, %v4301_v12  ;;  %v835_v48 = vmul.f32 %v4368_v26, %v4368_v26  ;;  %v4400_v23 = vpop.f32.mrf.mxu0 }
 0x157   :  { %v3655_v35 = vpop.eup %3654  ;;  %v869_v37 = vsub.f32 %v805_v25, %v837_v21  ;;  %v656_v43 = vadd.f32 %v655_v33, %v654_v22  ;;  %v416_v7 = vrot.slane %v415_v28, 1  ;;  %3662 = vpow2.f32 %v3400_v29 }
 0x158   :  { %v1087_v34 = vrot.slane %v1023_v31, 7  ;;  %v994_v49 = vmul.f32 %v3655_v35, %v4296_v4  ;;  %v1473_v51 = vadd.f32 %v1366_v36, %v1313_v39  ;;  %v400_v42 = vrot.slane %v4373_v44, 4 }
 0x159   :  { %v3657_v46 = vpop.eup %3656  ;;  %v901_v1 = vmax.f32 %v869_v37, 0.0  ;;  %v803_v53 = vmul.f32 0.125, %v656_v43  ;;  %3664 = vrcp.f32 %v1597_v38  ;;  %v417_v57 = vadd.f32 %v416_v7, %v415_v28 }
 0x15a   :  { %v1595_v54 = vadd.f32 1.0, %v3657_v46  ;;  %v670_v58 = vadd.f32 %v669_v30, %v582_v5  ;;  %v1311_v45 = vmul.f32 %v1198_v47, %v4262_v61  ;;  %v1151_v62 = vsub.f32 %v4296_v4, %v1087_v34 }
 0x15b   :  { %v933_v52 = vadd.f32 1e-05, %v901_v1  ;;  %v867_v63 = vsub.f32 %v803_v53, %v835_v48  ;;  %v1026_v2 = vmul.f32 %v994_v49, %v4306_v24  ;;  %v3405_v56 = vmul.f32 -1.442695, %v1473_v51 }
 0x15c   :  { %v671_v8 = vrot.slane %v670_v58, 2  ;;  %v1210_v55 = vrot.slane %v994_v49, %v4301_v12  ;;  %v401_v15 = vadd.f32 %v400_v42, %v4373_v44  ;;  %v4392_v16 = vmul.f32 0.125, %v417_v57 }
 0x15d   :  { %3666 = vrsqrt.f32 %v933_v52  ;;  %v899_v14 = vmax.f32 %v867_v63, 0.0  ;;  %v580_v20 = vmul.f32 %v4373_v44, %v4373_v44  ;;  %v430_v60 = vrot.slane %v4386_v10, 4 }
 0x15e   :  { %v3659_v59 = vpop.eup %3658  ;;  %3668 = vrcp.f32 %v1595_v54  ;;  %v672_v24 = vadd.f32 %v671_v8, %v670_v58  ;;  %v402_v18 = vrot.slane %v401_v15, 2  ;;  %v1358_v9 = vrot.slane %v1151_v62, %v4309_v27 }
 0x15f   :  { %v4384_v3 = vmul.f32 %v3659_v59, %v4296_v4  ;;  %v3661_v11 = vpop.eup %3660  ;;  %v931_v41 = vadd.f32 1e-05, %v899_v14  ;;  %v1090_v22 = vrot.slane %v1026_v2, 7  ;;  %v657_v25 = vrot.slane %v580_v20, 4 }
 0x160   :  { %v4397_v21 = vadd.f32 1.0, %v3661_v11  ;;  %v673_v5 = vrot.slane %v672_v24, 1  ;;  %v431_v28 = vadd.f32 %v4386_v10, %v430_v60  ;;  %v838_v33 = vmul.f32 %v4392_v16, %v4392_v16 }
 0x161   :  { %v1024_v61 = vmul.f32 %v4384_v3, %v4331_v13  ;;  %3670 = vrsqrt.f32 %v931_v41  ;;  %v403_v13 = vadd.f32 %v402_v18, %v401_v15  ;;  %v585_v35 = vmul.f32 %v4386_v10, %v4386_v10 }
 0x162   :  { %v674_v31 = vadd.f32 %v673_v5, %v672_v24  ;;  %v658_v37 = vadd.f32 %v657_v25, %v580_v20  ;;  %v432_v38 = vrot.slane %v431_v28, 2  ;;  %v418_v39 = vrot.slane %v4400_v23, 4 }
 0x163   :  { %v1088_v29 = vrot.slane %v1024_v61, 7  ;;  %v404_v36 = vrot.slane %v403_v13, 1  ;;  %3672 = vpow2.f32 %v3405_v56  ;;  %v1154_v43 = vsub.f32 %v4296_v4, %v1090_v22 }
 0x164   :  { %v806_v30 = vmul.f32 0.125, %v674_v31  ;;  %v687_v46 = vrot.slane %v585_v35, 4  ;;  %v3663_v47 = vpop.eup %3662  ;;  %v659_v48 = vrot.slane %v658_v37, 2  ;;  %v433_v7 = vadd.f32 %v432_v38, %v431_v28  ;;  %v4434_v31 = vpop.f32.mrf.mxu0 }
 0x165   :  { %v405_v1 = vadd.f32 %v404_v36, %v403_v13  ;;  %v419_v34 = vadd.f32 %v418_v39, %v4400_v23  ;;  %v1314_v49 = vmul.f32 %v4274_v17, %v1210_v55  ;;  %v1152_v51 = vsub.f32 %v4296_v4, %v1088_v29  ;;  %v3632_v39 = vld [vmem:[#allocation7 + $0x38] sm:$0xff]  }
 0x166   :  { %v870_v52 = vsub.f32 %v806_v30, %v838_v33  ;;  %v688_v53 = vadd.f32 %v687_v46, %v585_v35  ;;  %v4412_v42 = vpop.eup %3664  ;;  %v660_v57 = vadd.f32 %v659_v48, %v658_v37  ;;  %v434_v58 = vrot.slane %v433_v7, 1  ;;  %3567 = vmatprep.subr.bf16.mxu1 %v3632_v39 }
 0x167   :  { %v4414_v54 = vmul.f32 0.125, %v405_v1  ;;  %v420_v59 = vrot.slane %v419_v34, 2  ;;  %v1471_v62 = vadd.f32 %v1358_v9, %v1311_v45  ;;  %v1370_v2 = vrot.slane %v1154_v43, %v4309_v27  ;;  %3568 = vmatpush3.bf16.msra.mxu1 %v3632_v39 }
 0x168   :  { %v902_v8 = vmax.f32 %v870_v52, 0.0  ;;  %v689_v11 = vrot.slane %v688_v53, 2  ;;  %v1202_v17 = vrot.slane %v4384_v3, %v4301_v12  ;;  %v661_v55 = vrot.slane %v660_v57, 1  ;;  %v4445_v52 = vpop.f32.mrf.mxu0 }
 0x169   :  { %v435_v14 = vadd.f32 %v434_v58, %v433_v7  ;;  %v421_v24 = vadd.f32 %v420_v59, %v419_v34  ;;  %v583_v41 = vmul.f32 %v4400_v23, %v4400_v23  ;;  %v1596_v45 = vadd.f32 1.0, %v3663_v47 }
 0x16a   :  { %v3667_v63 = vpop.eup %3666  ;;  %v934_v15 = vadd.f32 1e-05, %v902_v8  ;;  %v690_v61 = vadd.f32 %v689_v11, %v688_v53  ;;  %v1362_v20 = vrot.slane %v1152_v51, %v4309_v27  ;;  %v662_v60 = vadd.f32 %v661_v55, %v660_v57 }
 0x16b   :  { %v4420_v56 = vmul.f32 %v3667_v63, %v4296_v4  ;;  %v4424_v18 = vpop.eup %3668  ;;  %v836_v3 = vmul.f32 %v4414_v54, %v4414_v54  ;;  %v4429_v9 = vmul.f32 0.125, %v435_v14  ;;  %v422_v5 = vrot.slane %v421_v24, 1 }
 0x16c   :  { %3674 = vrsqrt.f32 %v934_v15  ;;  %v691_v22 = vrot.slane %v690_v61, 1  ;;  %v1474_v13 = vadd.f32 %v1370_v2, %v1314_v49  ;;  %v1312_v25 = vmul.f32 %v1202_v17, %v4280_v32 }
 0x16d   :  { %v1029_v28 = vmul.f32 %v4420_v56, %v4357_v0  ;;  %v804_v29 = vmul.f32 0.125, %v662_v60  ;;  %v3403_v35 = vmul.f32 -1.442695, %v1471_v62  ;;  %v841_v37 = vmul.f32 %v4429_v9, %v4429_v9 }
 0x16e   :  { %v3671_v33 = vpop.eup %3670  ;;  %v692_v36 = vadd.f32 %v691_v22, %v690_v61  ;;  %v675_v38 = vrot.slane %v583_v41, 4  ;;  %3676 = vrcp.f32 %v4397_v21  ;;  %v1472_v43 = vadd.f32 %v1362_v20, %v1312_v25 }
 0x16f   :  { %v868_v30 = vsub.f32 %v804_v29, %v836_v3  ;;  %v423_v46 = vadd.f32 %v422_v5, %v421_v24  ;;  %3678 = vrcp.f32 %v1596_v45  ;;  %v436_v0 = vrot.slane %v4434_v31, 4 }
 0x170   :  { %v809_v32 = vmul.f32 0.125, %v692_v36  ;;  %v676_v47 = vadd.f32 %v675_v38, %v583_v41  ;;  %v4440_v1 = vpop.eup %3672  ;;  %v3406_v48 = vmul.f32 -1.442695, %v1474_v13  ;;  %v1093_v7 = vrot.slane %v1029_v28, 7  ;;  %v4468_v38 = vpop.f32.mrf.mxu0 }
 0x171   :  { %v4443_v34 = vmul.f32 %v3671_v33, %v4296_v4  ;;  %v900_v49 = vmax.f32 %v868_v30, 0.0  ;;  %3680 = vpow2.f32 %v3403_v35  ;;  %v3404_v53 = vmul.f32 -1.442695, %v1472_v43 }
 0x172   :  { %v873_v21 = vsub.f32 %v809_v32, %v841_v37  ;;  %v677_v51 = vrot.slane %v676_v47, 2  ;;  %v1222_v57 = vrot.slane %v4420_v56, %v4301_v12  ;;  %v4449_v59 = vmul.f32 0.125, %v423_v46 }
 0x173   :  { %v932_v58 = vadd.f32 1e-05, %v900_v49  ;;  %v437_v2 = vadd.f32 %v4434_v31, %v436_v0  ;;  %v586_v8 = vmul.f32 %v4434_v31, %v4434_v31  ;;  %3682 = vpow2.f32 %v3406_v48 }
 0x174   :  { %v905_v63 = vmax.f32 %v873_v21, 0.0  ;;  %v678_v62 = vadd.f32 %v677_v51, %v676_v47  ;;  %v1157_v11 = vsub.f32 %v4296_v4, %v1093_v7  ;;  %v1027_v17 = vmul.f32 %v4443_v34, %v4368_v26  ;;  %v3633_v47 = vld [vmem:[#allocation7 + $0x30] sm:$0xff]  }
 0x175   :  { %v424_v55 = vrot.slane %v4445_v52, 4  ;;  %3684 = vrsqrt.f32 %v932_v58  ;;  %v438_v14 = vrot.slane %v437_v2, 2  ;;  %v693_v15 = vrot.slane %v586_v8, 4  ;;  %3569 = vmatprep.subr.bf16.mxu1 %v3633_v47 }
 0x176   :  { %v679_v56 = vrot.slane %v678_v62, 1  ;;  %3686 = vpow2.f32 %v3404_v53  ;;  %v937_v61 = vadd.f32 1e-05, %v905_v63  ;;  %v584_v41 = vmul.f32 %v4445_v52, %v4445_v52  ;;  %3570 = vmatpush3.bf16.msra.mxu1 %v3633_v47 }
 0x177   :  { %v425_v24 = vadd.f32 %v424_v55, %v4445_v52  ;;  %v1317_v45 = vmul.f32 %v4288_v50, %v1222_v57  ;;  %v839_v60 = vmul.f32 %v4449_v59, %v4449_v59  ;;  %v439_v26 = vadd.f32 %v438_v14, %v437_v2  ;;  %v3634_v14 = vld [vmem:[#allocation7 + $0x28] sm:$0xff]  }
 0x178   :  { %v680_v20 = vadd.f32 %v679_v56, %v678_v62  ;;  %v1382_v22 = vrot.slane %v1157_v11, %v4309_v27  ;;  %v694_v5 = vadd.f32 %v693_v15, %v586_v8  ;;  %v681_v25 = vrot.slane %v584_v41, 4  ;;  %v4482_v8 = vpop.f32.mrf.mxu0  ;;  %3571 = vmatprep.subr.bf16.mxu1 %v3634_v14 }
 0x179   :  { %v3675_v3 = vpop.eup %3674  ;;  %v426_v13 = vrot.slane %v425_v24, 2  ;;  %v1091_v28 = vrot.slane %v1027_v17, 7  ;;  %v440_v35 = vrot.slane %v439_v26, 1  ;;  %3688 = vrsqrt.f32 %v937_v61 }
 0x17a   :  { %v4466_v29 = vmul.f32 %v3675_v3, %v4296_v4  ;;  %v807_v33 = vmul.f32 0.125, %v680_v20  ;;  %v695_v36 = vrot.slane %v694_v5, 2  ;;  %v682_v37 = vadd.f32 %v681_v25, %v584_v41  ;;  %3572 = vmatpush3.bf16.msra.mxu1 %v3634_v14 }
 0x17b   :  { %v427_v50 = vadd.f32 %v426_v13, %v425_v24  ;;  %v4470_v39 = vpop.eup %3676  ;;  %v1214_v43 = vrot.slane %v4443_v34, %v4301_v12  ;;  %v441_v32 = vadd.f32 %v440_v35, %v439_v26  ;;  %v1477_v48 = vadd.f32 %v1382_v22, %v1317_v45 }
 0x17c   :  { %v1030_v30 = vmul.f32 %v4466_v29, %v4392_v16  ;;  %v871_v46 = vsub.f32 %v807_v33, %v839_v60  ;;  %v4476_v0 = vpop.eup %3678  ;;  %v696_v7 = vadd.f32 %v695_v36, %v694_v5  ;;  %v683_v21 = vrot.slane %v682_v37, 2 }
 0x17d   :  { %v428_v49 = vrot.slane %v427_v50, 1  ;;  %v1155_v51 = vsub.f32 %v4296_v4, %v1091_v28  ;;  %v4479_v58 = vmul.f32 0.125, %v441_v32  ;;  %v454_v2 = vrot.slane %v4468_v38, 4 }
 0x17e   :  { %v1094_v53 = vrot.slane %v1030_v30, 7  ;;  %v903_v57 = vmax.f32 %v871_v46, 0.0  ;;  %v3681_v34 = vpop.eup %3680  ;;  %v697_v63 = vrot.slane %v696_v7, 1  ;;  %v684_v16 = vadd.f32 %v683_v21, %v682_v37 }
 0x17f   :  { %v429_v62 = vadd.f32 %v428_v49, %v427_v50  ;;  %v842_v55 = vmul.f32 %v4479_v58, %v4479_v58  ;;  %v589_v56 = vmul.f32 %v4468_v38, %v4468_v38  ;;  %v455_v41 = vadd.f32 %v4468_v38, %v454_v2  ;;  %v3635_v50 = vld [vmem:[#allocation7 + $0x20] sm:$0xff]  }
 0x180   :  { %v1158_v11 = vsub.f32 %v4296_v4, %v1094_v53  ;;  %v935_v17 = vadd.f32 1e-05, %v903_v57  ;;  %v698_v15 = vadd.f32 %v697_v63, %v696_v7  ;;  %v685_v24 = vrot.slane %v684_v16, 1  ;;  %v3683_v45 = vpop.eup %3682  ;;  %3573 = vmatprep.subr.bf16.mxu1 %v3635_v50  ;;  %v3636_v57 = vld [vmem:[#allocation7 + $0x18] sm:$0xff]  }
 0x181   :  { %v4489_v61 = vmul.f32 0.125, %v429_v62  ;;  %v1601_v20 = vadd.f32 1.0, %v4440_v1  ;;  %v711_v60 = vrot.slane %v589_v56, 4  ;;  %v442_v26 = vrot.slane %v4482_v8, 4  ;;  %3574 = vmatpush3.bf16.msra.mxu1 %v3635_v50 }
 0x182   :  { %3690 = vrsqrt.f32 %v935_v17  ;;  %v3685_v3 = vpop.eup %3684  ;;  %v1599_v22 = vadd.f32 1.0, %v3681_v34  ;;  %v1226_v5 = vrot.slane %v4466_v29, %v4301_v12  ;;  %v810_v13 = vmul.f32 0.125, %v698_v15  ;;  %3575 = vmatprep.subr.bf16.mxu1 %v3636_v57 }
 0x183   :  { %v686_v25 = vadd.f32 %v685_v24, %v684_v16  ;;  %v4496_v28 = vpop.eup %3686  ;;  %v1315_v33 = vmul.f32 %v1214_v43, %v4336_v19  ;;  %v1374_v35 = vrot.slane %v1155_v51, %v4309_v27  ;;  %v840_v1 = vmul.f32 %v4489_v61, %v4489_v61  ;;  %v4513_v24 = vpop.f32.mrf.mxu0 }
 0x184   :  { %v456_v36 = vrot.slane %v455_v41, 2  ;;  %v3409_v37 = vmul.f32 -1.442695, %v1477_v48  ;;  %v1386_v30 = vrot.slane %v1158_v11, %v4309_v27  ;;  %v874_v46 = vsub.f32 %v810_v13, %v842_v55 }
 0x185   :  { %v712_v32 = vadd.f32 %v711_v60, %v589_v56  ;;  %v4504_v29 = vmul.f32 %v3685_v3, %v4296_v4  ;;  %v808_v47 = vmul.f32 0.125, %v686_v25  ;;  %v443_v49 = vadd.f32 %v442_v26, %v4482_v8  ;;  %3576 = vmatpush3.bf16.msra.mxu1 %v3636_v57 }
 0x186   :  { %v457_v7 = vadd.f32 %v456_v36, %v455_v41  ;;  %3692 = vrcp.f32 %v1601_v20  ;;  %v1602_v19 = vadd.f32 1.0, %v3683_v45  ;;  %v1318_v43 = vmul.f32 %v4347_v40, %v1226_v5  ;;  %v3689_v51 = vpop.eup %3688  ;;  %v3637_v41 = vld [vmem:[#allocation7 + $0x10] sm:$0xff]  }
 0x187   :  { %v906_v21 = vmax.f32 %v874_v46, 0.0  ;;  %3694 = vrcp.f32 %v1599_v22  ;;  %v1475_v48 = vadd.f32 %v1374_v35, %v1315_v33  ;;  %v872_v53 = vsub.f32 %v808_v47, %v840_v1  ;;  %3577 = vmatprep.subr.bf16.mxu1 %v3637_v41 }
 0x188   :  { %v1478_v34 = vadd.f32 %v1386_v30, %v1318_v43  ;;  %v458_v62 = vrot.slane %v457_v7, 1  ;;  %v713_v16 = vrot.slane %v712_v32, 2  ;;  %3696 = vpow2.f32 %v3409_v37  ;;  %v3638_v30 = vld [vmem:[#allocation7 + $0x8] sm:$0xff]  }
 0x189   :  { %v938_v63 = vadd.f32 1e-05, %v906_v21  ;;  %v1028_v2 = vmul.f32 %v4504_v29, %v4414_v54  ;;  %v904_v11 = vmax.f32 %v872_v53, 0.0  ;;  %v444_v17 = vrot.slane %v443_v49, 2  ;;  %3578 = vmatpush3.bf16.msra.mxu1 %v3637_v41 }
 0x18a   :  { %3698 = vrcp.f32 %v1602_v19  ;;  %v4511_v40 = vmul.f32 %v3689_v51, %v4296_v4  ;;  %v459_v55 = vadd.f32 %v458_v62, %v457_v7  ;;  %v714_v14 = vadd.f32 %v713_v16, %v712_v32  ;;  %3579 = vmatprep.subr.bf16.mxu1 %v3638_v30  ;;  %v4535_v51 = vpop.f32.mrf.mxu0  ;;  %v3639_v62 = vld [vmem:[#allocation7] sm:$0xff]  }
 0x18b   :  { %3700 = vrsqrt.f32 %v938_v63  ;;  %v936_v56 = vadd.f32 1e-05, %v904_v11  ;;  %v445_v15 = vadd.f32 %v444_v17, %v443_v49  ;;  %v3407_v45 = vmul.f32 -1.442695, %v1475_v48 }
 0x18c   :  { %v3410_v20 = vmul.f32 -1.442695, %v1478_v34  ;;  %v4515_v60 = vmul.f32 0.125, %v459_v55  ;;  %v587_v54 = vmul.f32 %v4482_v8, %v4482_v8  ;;  %v1092_v26 = vrot.slane %v1028_v2, 7 }
 0x18d   :  { %3702 = vrsqrt.f32 %v936_v56  ;;  %v715_v3 = vrot.slane %v714_v14, 1  ;;  %v446_v22 = vrot.slane %v445_v15, 1  ;;  %v1218_v13 = vrot.slane %v4504_v29, %v4301_v12  ;;  %3580 = vmatpush3.bf16.msra.mxu1 %v3638_v30 }
 0x18e   :  { %v1033_v25 = vmul.f32 %v4511_v40, %v4429_v9  ;;  %v699_v33 = vrot.slane %v587_v54, 4  ;;  %v460_v35 = vrot.slane %v4513_v24, 4  ;;  %v845_v50 = vmul.f32 %v4515_v60, %v4515_v60  ;;  %3581 = vmatprep.subr.bf16.mxu1 %v3639_v62 }
 0x18f   :  { %v3691_v5 = vpop.eup %3690  ;;  %v716_v36 = vadd.f32 %v715_v3, %v714_v14  ;;  %v447_v37 = vadd.f32 %v446_v22, %v445_v15  ;;  %3704 = vpow2.f32 %v3407_v45  ;;  %v590_v9 = vmul.f32 %v4513_v24, %v4513_v24 }
 0x190   :  { %v4525_v1 = vmul.f32 %v3691_v5, %v4296_v4  ;;  %v700_v46 = vadd.f32 %v699_v33, %v587_v54  ;;  %v461_v32 = vadd.f32 %v4513_v24, %v460_v35  ;;  %3706 = vpow2.f32 %v3410_v20 }
 0x191   :  { %v1156_v29 = vsub.f32 %v4296_v4, %v1092_v26  ;;  %v813_v7 = vmul.f32 0.125, %v716_v36  ;;  %v1097_v49 = vrot.slane %v1033_v25, 7  ;;  %v717_v21 = vrot.slane %v590_v9, 4  ;;  %3582 = vmatpush3.bf16.msra.mxu1 %v3639_v62 }
 0x192   :  { %v1031_v47 = vmul.f32 %v4525_v1, %v4449_v59  ;;  %v701_v19 = vrot.slane %v700_v46, 2  ;;  %v462_v43 = vrot.slane %v461_v32, 2  ;;  %v1600_v53 = vadd.f32 1.0, %v4496_v28 }
 0x193   :  { %v4537_v48 = vpop.eup %3692  ;;  %v1316_v57 = vmul.f32 %v1218_v13, %v4373_v44  ;;  %v877_v34 = vsub.f32 %v813_v7, %v845_v50  ;;  %v4541_v63 = vmul.f32 0.125, %v447_v37  ;;  %v718_v17 = vadd.f32 %v717_v21, %v590_v9 }
 0x194   :  { %v4543_v59 = vpop.eup %3694  ;;  %v1095_v16 = vrot.slane %v1031_v47, 7  ;;  %v702_v2 = vadd.f32 %v701_v19, %v700_v46  ;;  %v463_v11 = vadd.f32 %v462_v43, %v461_v32  ;;  %v1378_v55 = vrot.slane %v1156_v29, %v4309_v27 }
 0x195   :  { %v1238_v56 = vrot.slane %v4511_v40, %v4301_v12  ;;  %v909_v14 = vmax.f32 %v877_v34, 0.0  ;;  %v448_v28 = vrot.slane %v4535_v51, 4  ;;  %v3697_v44 = vpop.eup %3696  ;;  %v1161_v15 = vsub.f32 %v4296_v4, %v1097_v49 }
 0x196   :  { %v703_v41 = vrot.slane %v702_v2, 1  ;;  %v464_v45 = vrot.slane %v463_v11, 1  ;;  %v719_v20 = vrot.slane %v718_v17, 2  ;;  %v843_v3 = vmul.f32 %v4541_v63, %v4541_v63 }
 0x197   :  { %v4550_v54 = vpop.eup %3698  ;;  %v941_v26 = vadd.f32 1e-05, %v909_v14  ;;  %v449_v22 = vadd.f32 %v448_v28, %v4535_v51  ;;  %v588_v40 = vmul.f32 %v4535_v51, %v4535_v51  ;;  %v1159_v13 = vsub.f32 %v4296_v4, %v1095_v16  ;;  %v4572_v28 = vpop.f32.mrf.mxu0 }
 0x198   :  { %v3701_v5 = vpop.eup %3700  ;;  %v704_v25 = vadd.f32 %v703_v41, %v702_v2  ;;  %v465_v33 = vadd.f32 %v464_v45, %v463_v11  ;;  %v720_v35 = vadd.f32 %v719_v20, %v718_v17  ;;  %v1605_v36 = vadd.f32 1.0, %v3697_v44 }
 0x199   :  { %v1476_v50 = vadd.f32 %v1378_v55, %v1316_v57  ;;  %3708 = vrsqrt.f32 %v941_v26  ;;  %v450_v37 = vrot.slane %v449_v22, 2  ;;  %v1398_v46 = vrot.slane %v1161_v15, %v4309_v27 }
 0x19a   :  { %v3703_v30 = vpop.eup %3702  ;;  %v1230_v32 = vrot.slane %v4525_v1, %v4301_v12  ;;  %v811_v9 = vmul.f32 0.125, %v704_v25  ;;  %v4561_v29 = vmul.f32 0.125, %v465_v33  ;;  %v1002_v47 = vmul.f32 %v3701_v5, %v4296_v4 }
 0x19b   :  { %v721_v7 = vrot.slane %v720_v35, 1  ;;  %v451_v49 = vadd.f32 %v450_v37, %v449_v22  ;;  %v705_v19 = vrot.slane %v588_v40, 4  ;;  %3710 = vrcp.f32 %v1600_v53 }
 0x19c   :  { %v1321_v43 = vmul.f32 %v4386_v10, %v1238_v56  ;;  %v1390_v21 = vrot.slane %v1159_v13, %v4309_v27  ;;  %v875_v57 = vsub.f32 %v811_v9, %v843_v3  ;;  %v3705_v34 = vpop.eup %3704  ;;  %v3408_v62 = vmul.f32 -1.442695, %v1476_v50 }
 0x19d   :  { %v4567_v16 = vmul.f32 %v3703_v30, %v4296_v4  ;;  %v722_v1 = vadd.f32 %v721_v7, %v720_v35  ;;  %v846_v2 = vmul.f32 %v4561_v29, %v4561_v29  ;;  %v3707_v11 = vpop.eup %3706  ;;  %v1319_v55 = vmul.f32 %v1230_v32, %v4400_v23 }
 0x19e   :  { %v1481_v17 = vadd.f32 %v1398_v46, %v1321_v43  ;;  %v907_v14 = vmax.f32 %v875_v57, 0.0  ;;  %v452_v53 = vrot.slane %v451_v49, 1  ;;  %3712 = vrcp.f32 %v1605_v36 }
 0x19f   :  { %v1034_v10 = vmul.f32 %v1002_v47, %v4479_v58  ;;  %v814_v56 = vmul.f32 0.125, %v722_v1  ;;  %v706_v44 = vadd.f32 %v705_v19, %v588_v40  ;;  %v1479_v15 = vadd.f32 %v1390_v21, %v1319_v55  ;;  %v4585_v40 = vpop.f32.mrf.mxu0 }
 0x1a0   :  { %v1242_v4 = vrot.slane %v1002_v47, %v4301_v12  ;;  %v939_v41 = vadd.f32 1e-05, %v907_v14  ;;  %v453_v45 = vadd.f32 %v452_v53, %v451_v49  ;;  %v4576_v20 = vadd.f32 1.0, %v3705_v34 }
 0x1a1   :  { %v1032_v26 = vmul.f32 %v4567_v16, %v4489_v61  ;;  %v878_v23 = vsub.f32 %v814_v56, %v846_v2  ;;  %v707_v3 = vrot.slane %v706_v44, 2  ;;  %v4580_v22 = vadd.f32 1.0, %v3707_v11 }
 0x1a2   :  { %3714 = vpow2.f32 %v3408_v62  ;;  %v4582_v5 = vmul.f32 -1.442695, %v1481_v17  ;;  %v478_v58 = vrot.slane %v4572_v28, 4  ;;  %v1098_v13 = vrot.slane %v1034_v10, 7 }
 0x1a3   :  { %3716 = vrsqrt.f32 %v939_v41  ;;  %v4587_v25 = vmul.f32 0.125, %v453_v45  ;;  %v708_v33 = vadd.f32 %v707_v3, %v706_v44  ;;  %v3411_v35 = vmul.f32 -1.442695, %v1479_v15  ;;  %v4610_v15 = vpop.f32.mrf.mxu0 }
 0x1a4   :  { %v1322_v36 = vmul.f32 %v4434_v31, %v1242_v4  ;;  %v479_v61 = vadd.f32 %v4572_v28, %v478_v58  ;;  %v593_v50 = vmul.f32 %v4572_v28, %v4572_v28  ;;  %v1096_v37 = vrot.slane %v1032_v26, 7  ;;  %v4598_v31 = vld [vmem:[#allocation8] sm:$0xff] }
 0x1a5   :  { %v910_v30 = vmax.f32 %v878_v23, 0.0  ;;  %v709_v46 = vrot.slane %v708_v33, 1  ;;  %v466_v32 = vrot.slane %v4585_v40, 4  ;;  %v1234_v47 = vrot.slane %v4567_v16, %v4301_v12 }
 0x1a6   :  { %v3709_v9 = vpop.eup %3708  ;;  %v480_v7 = vrot.slane %v479_v61, 2  ;;  %v735_v49 = vrot.slane %v593_v50, 4  ;;  %v591_v19 = vmul.f32 %v4585_v40, %v4585_v40  ;;  %v1162_v43 = vsub.f32 %v4598_v31, %v1098_v13 }
 0x1a7   :  { %v4602_v21 = vmul.f32 %v4598_v31, %v3709_v9  ;;  %v710_v57 = vadd.f32 %v709_v46, %v708_v33  ;;  %v844_v34 = vmul.f32 %v4587_v25, %v4587_v25  ;;  %v467_v16 = vadd.f32 %v466_v32, %v4585_v40 }
 0x1a8   :  { %v481_v62 = vadd.f32 %v480_v7, %v479_v61  ;;  %v736_v1 = vadd.f32 %v735_v49, %v593_v50  ;;  %v723_v2 = vrot.slane %v591_v19, 4  ;;  %v4607_v11 = vpop.eup %3710  ;;  %3718 = vpow2.f32 %v3411_v35 }
 0x1a9   :  { %v1160_v17 = vsub.f32 %v4598_v31, %v1096_v37  ;;  %v942_v55 = vadd.f32 1e-05, %v910_v30  ;;  %v812_v14 = vmul.f32 0.125, %v710_v57  ;;  %v468_v56 = vrot.slane %v467_v16, 2 }
 0x1aa   :  { %v482_v53 = vrot.slane %v481_v62, 1  ;;  %v737_v10 = vrot.slane %v736_v1, 2  ;;  %v724_v44 = vadd.f32 %v723_v2, %v591_v19  ;;  %v1402_v4 = vrot.slane %v1162_v43, %v4309_v27 }
 0x1ab   :  { %v1320_v41 = vmul.f32 %v1234_v47, %v4445_v52  ;;  %v1037_v45 = vmul.f32 %v4602_v21, %v4515_v60  ;;  %v876_v26 = vsub.f32 %v812_v14, %v844_v34  ;;  %v4616_v23 = vpop.eup %3712  ;;  %v469_v13 = vadd.f32 %v468_v56, %v467_v16 }
 0x1ac   :  { %5593 = vst [vmem:[#allocation16_spill] sm:$0xff] %v4616_v23  ;;  %v483_v3 = vadd.f32 %v482_v53, %v481_v62  ;;  %v738_v58 = vadd.f32 %v737_v10, %v736_v1  ;;  %v725_v33 = vrot.slane %v724_v44, 2  ;;  %v1394_v35 = vrot.slane %v1160_v17, %v4309_v27 }
 0x1ad   :  { %3720 = vrsqrt.f32 %v942_v55  ;;  %v908_v61 = vmax.f32 %v876_v26, 0.0  ;;  %v484_v50 = vrot.slane %v4610_v15, 4  ;;  %v470_v52 = vrot.slane %v469_v13, 1  ;;  %v4638_v26 = vpop.f32.mrf.mxu0 }
 0x1ae   :  { %v4620_v37 = vmul.f32 0.125, %v483_v3  ;;  %v739_v30 = vrot.slane %v738_v58, 1  ;;  %v726_v46 = vadd.f32 %v725_v33, %v724_v44  ;;  %v1482_v60 = vadd.f32 %v1402_v4, %v1322_v36 }
 0x1af   :  { %v3715_v32 = vpop.eup %3714  ;;  %v1101_v9 = vrot.slane %v1037_v45, 7  ;;  %v940_v47 = vadd.f32 1e-05, %v908_v61  ;;  %v485_v7 = vadd.f32 %v4610_v15, %v484_v50  ;;  %v471_v57 = vadd.f32 %v470_v52, %v469_v13 }
 0x1b0   :  { %v3717_v49 = vpop.eup %3716  ;;  %v740_v19 = vadd.f32 %v739_v30, %v738_v58  ;;  %v849_v43 = vmul.f32 %v4620_v37, %v4620_v37  ;;  %v594_v34 = vmul.f32 %v4610_v15, %v4610_v15  ;;  %v1480_v62 = vadd.f32 %v1394_v35, %v1320_v41 }
 0x1b1   :  { %3722 = vrsqrt.f32 %v940_v47  ;;  %v727_v1 = vrot.slane %v726_v46, 1  ;;  %v486_v16 = vrot.slane %v485_v7, 2  ;;  %v1604_v36 = vadd.f32 1.0, %v3715_v32 }
 0x1b2   :  { %3724 = vrcp.f32 %v4576_v20  ;;  %v817_v2 = vmul.f32 0.125, %v740_v19  ;;  %v4628_v17 = vmul.f32 0.125, %v471_v57  ;;  %v3414_v55 = vmul.f32 -1.442695, %v1482_v60 }
 0x1b3   :  { %v4631_v14 = vmul.f32 %v4598_v31, %v3717_v49  ;;  %v728_v53 = vadd.f32 %v727_v1, %v726_v46  ;;  %v487_v10 = vadd.f32 %v486_v16, %v485_v7  ;;  %3726 = vpow2.f32 %v4582_v5  ;;  %v4645_v46 = vpop.f32.mrf.mxu0 }
 0x1b4   :  { %v1165_v56 = vsub.f32 %v4598_v31, %v1101_v9  ;;  %v881_v44 = vsub.f32 %v817_v2, %v849_v43  ;;  %v741_v4 = vrot.slane %v594_v34, 4  ;;  %3728 = vrcp.f32 %v4580_v22 }
 0x1b5   :  { %v3412_v41 = vmul.f32 -1.442695, %v1480_v62  ;;  %v815_v20 = vmul.f32 0.125, %v728_v53  ;;  %v847_v45 = vmul.f32 %v4628_v17, %v4628_v17  ;;  %v3719_v3 = vpop.eup %3718  ;;  %3730 = vrcp.f32 %v1604_v36 }
 0x1b6   :  { %v1254_v58 = vrot.slane %v4602_v21, %v4301_v12  ;;  %v913_v13 = vmax.f32 %v881_v44, 0.0  ;;  %v488_v5 = vrot.slane %v487_v10, 1  ;;  %3732 = vpow2.f32 %v3414_v55 }
 0x1b7   :  { %v1035_v33 = vmul.f32 %v4631_v14, %v4541_v63  ;;  %v879_v35 = vsub.f32 %v815_v20, %v847_v45  ;;  %v1414_v22 = vrot.slane %v1165_v56, %v4309_v27  ;;  %v742_v30 = vadd.f32 %v741_v4, %v594_v34 }
 0x1b8   :  { %v945_v61 = vadd.f32 1e-05, %v913_v13  ;;  %v489_v50 = vadd.f32 %v488_v5, %v487_v10  ;;  %3734 = vpow2.f32 %v3412_v41  ;;  %v4647_v60 = vadd.f32 1.0, %v3719_v3  ;;  %v4665_v10 = vpop.f32.mrf.mxu0 }
 0x1b9   :  { %v911_v52 = vmax.f32 %v879_v35, 0.0  ;;  %v1325_v21 = vmul.f32 %v4468_v38, %v1254_v58  ;;  %v743_v9 = vrot.slane %v742_v30, 2  ;;  %v1099_v47 = vrot.slane %v1035_v33, 7 }
 0x1ba   :  { %v3721_v32 = vpop.eup %3720  ;;  %3736 = vrsqrt.f32 %v945_v61  ;;  %v472_v63 = vrot.slane %v4638_v26, 4  ;;  %v592_v49 = vmul.f32 %v4638_v26, %v4638_v26  ;;  %v4653_v43 = vmul.f32 0.125, %v489_v50 }
 0x1bb   :  { %v943_v7 = vadd.f32 1e-05, %v911_v52  ;;  %v1485_v19 = vadd.f32 %v1414_v22, %v1325_v21  ;;  %v744_v57 = vadd.f32 %v743_v9, %v742_v30  ;;  %v502_v34 = vrot.slane %v4645_v46, 4 }
 0x1bc   :  { %v1246_v62 = vrot.slane %v4631_v14, %v4301_v12  ;;  %v473_v38 = vadd.f32 %v472_v63, %v4638_v26  ;;  %v729_v1 = vrot.slane %v592_v49, 4  ;;  %v4660_v36 = vmul.f32 %v4598_v31, %v3721_v32 }
 0x1bd   :  { %3738 = vrsqrt.f32 %v943_v7  ;;  %v745_v2 = vrot.slane %v744_v57, 1  ;;  %v503_v55 = vadd.f32 %v4645_v46, %v502_v34  ;;  %v597_v53 = vmul.f32 %v4645_v46, %v4645_v46 }
 0x1be   :  { %v3723_v16 = vpop.eup %3722  ;;  %v1163_v14 = vsub.f32 %v4598_v31, %v1099_v47  ;;  %v474_v4 = vrot.slane %v473_v38, 2  ;;  %v730_v41 = vadd.f32 %v729_v1, %v592_v49  ;;  %v850_v45 = vmul.f32 %v4653_v43, %v4653_v43 }
 0x1bf   :  { %v4667_v56 = vpop.eup %3724  ;;  %v1004_v44 = vmul.f32 %v4598_v31, %v3723_v16  ;;  %v746_v20 = vadd.f32 %v745_v2, %v744_v57  ;;  %v504_v3 = vrot.slane %v503_v55, 2  ;;  %v759_v58 = vrot.slane %v597_v53, 4 }
 0x1c0   :  { %v4673_v13 = vpop.eup %3726  ;;  %v3417_v5 = vmul.f32 -1.442695, %v1485_v19  ;;  %v475_v35 = vadd.f32 %v474_v4, %v473_v38  ;;  %v490_v22 = vrot.slane %v4665_v10, 4  ;;  %v731_v30 = vrot.slane %v730_v41, 2 }
 0x1c1   :  { %v1036_v33 = vmul.f32 %v1004_v44, %v4587_v25  ;;  %v4677_v61 = vpop.eup %3728  ;;  %v818_v50 = vmul.f32 0.125, %v746_v20  ;;  %v505_v52 = vadd.f32 %v504_v3, %v503_v55  ;;  %v760_v32 = vadd.f32 %v759_v58, %v597_v53 }
 0x1c2   :  { %v4679_v21 = vpop.eup %3730  ;;  %v1323_v9 = vmul.f32 %v1246_v62, %v4482_v8  ;;  %v1406_v47 = vrot.slane %v1163_v14, %v4309_v27  ;;  %v1038_v7 = vmul.f32 %v4660_v36, %v4561_v29  ;;  %v476_v19 = vrot.slane %v475_v35, 1 }
 0x1c3   :  { %v1100_v63 = vrot.slane %v1036_v33, 7  ;;  %v4685_v25 = vpop.eup %3732  ;;  %v882_v49 = vsub.f32 %v818_v50, %v850_v45  ;;  %v732_v57 = vadd.f32 %v731_v30, %v730_v41  ;;  %v506_v34 = vrot.slane %v505_v52, 1 }
 0x1c4   :  { %v1250_v1 = vrot.slane %v1004_v44, %v4301_v12  ;;  %v761_v16 = vrot.slane %v760_v32, 2  ;;  %v491_v2 = vadd.f32 %v490_v22, %v4665_v10  ;;  %v477_v55 = vadd.f32 %v476_v19, %v475_v35  ;;  %v4704_v19 = vpop.f32.mrf.mxu0 }
 0x1c5   :  { %v1164_v38 = vsub.f32 %v4598_v31, %v1100_v63  ;;  %v3735_v8 = vpop.eup %3734  ;;  %v914_v62 = vmax.f32 %v882_v49, 0.0  ;;  %v733_v53 = vrot.slane %v732_v57, 1  ;;  %v507_v14 = vadd.f32 %v506_v34, %v505_v52 }
 0x1c6   :  { %v1102_v4 = vrot.slane %v1038_v7, 7  ;;  %v762_v45 = vadd.f32 %v761_v16, %v760_v32  ;;  %v492_v3 = vrot.slane %v491_v2, 2  ;;  %v1483_v41 = vadd.f32 %v1406_v47, %v1323_v9 }
 0x1c7   :  { %v3737_v29 = vpop.eup %3736  ;;  %v1410_v20 = vrot.slane %v1164_v38, %v4309_v27  ;;  %v946_v58 = vadd.f32 1e-05, %v914_v62  ;;  %v4691_v33 = vmul.f32 0.125, %v477_v55  ;;  %v734_v50 = vadd.f32 %v733_v53, %v732_v57 }
 0x1c8   :  { %v1324_v44 = vmul.f32 %v1250_v1, %v4535_v51  ;;  %v4694_v30 = vmul.f32 0.125, %v507_v14  ;;  %v763_v22 = vrot.slane %v762_v45, 1  ;;  %v595_v35 = vmul.f32 %v4665_v10, %v4665_v10 }
 0x1c9   :  { %v1009_v7 = vmul.f32 %v4598_v31, %v3737_v29  ;;  %3740 = vrsqrt.f32 %v946_v58  ;;  %v816_v63 = vmul.f32 0.125, %v734_v50  ;;  %v493_v32 = vadd.f32 %v492_v3, %v491_v2 }
 0x1ca   :  { %v3739_v52 = vpop.eup %3738  ;;  %v1484_v49 = vadd.f32 %v1410_v20, %v1324_v44  ;;  %v848_v47 = vmul.f32 %v4691_v33, %v4691_v33  ;;  %v764_v51 = vadd.f32 %v763_v22, %v762_v45  ;;  %3742 = vrcp.f32 %v4647_v60 }
 0x1cb   :  { %v4700_v9 = vmul.f32 %v4598_v31, %v3739_v52  ;;  %v1166_v57 = vsub.f32 %v4598_v31, %v1102_v4  ;;  %v853_v34 = vmul.f32 %v4694_v30, %v4694_v30  ;;  %3744 = vpow2.f32 %v3417_v5  ;;  %v4715_v4 = vpop.f32.mrf.mxu0 }
 0x1cc   :  { %v1258_v38 = vrot.slane %v4660_v36, %v4301_v12  ;;  %v880_v1 = vsub.f32 %v816_v63, %v848_v47  ;;  %v3415_v16 = vmul.f32 -1.442695, %v1483_v41  ;;  %v1041_v2 = vmul.f32 %v1009_v7, %v4620_v37 }
 0x1cd   :  { %v821_v62 = vmul.f32 0.125, %v764_v51  ;;  %v494_v55 = vrot.slane %v493_v32, 1  ;;  %v3416_v53 = vmul.f32 -1.442695, %v1484_v49  ;;  %v1039_v14 = vmul.f32 %v4700_v9, %v4628_v17  ;;  %v4726_v63 = vpop.f32.mrf.mxu0 }
 0x1ce   :  { %v912_v60 = vmax.f32 %v880_v1, 0.0  ;;  %v747_v29 = vrot.slane %v595_v35, 4  ;;  %v1418_v20 = vrot.slane %v1166_v57, %v4309_v27  ;;  %v1270_v5 = vrot.slane %v1009_v7, %v4301_v12 }
 0x1cf   :  { %v885_v45 = vsub.f32 %v821_v62, %v853_v34  ;;  %v508_v36 = vrot.slane %v4704_v19, 4  ;;  %v4720_v3 = vadd.f32 1.0, %v3735_v8  ;;  %v495_v41 = vadd.f32 %v494_v55, %v493_v32 }
 0x1d0   :  { %v944_v37 = vadd.f32 1e-05, %v912_v60  ;;  %v748_v58 = vadd.f32 %v747_v29, %v595_v35  ;;  %3746 = vpow2.f32 %v3415_v16  ;;  %v1326_v50 = vmul.f32 %v4513_v24, %v1258_v38 }
 0x1d1   :  { %v1105_v17 = vrot.slane %v1041_v2, 7  ;;  %v509_v44 = vadd.f32 %v4704_v19, %v508_v36  ;;  %3748 = vpow2.f32 %v3416_v53  ;;  %v1103_v22 = vrot.slane %v1039_v14, 7 }
 0x1d2   :  { %v749_v52 = vrot.slane %v748_v58, 2  ;;  %v598_v7 = vmul.f32 %v4704_v19, %v4704_v19  ;;  %v4728_v49 = vadd.f32 %v1418_v20, %v1326_v50  ;;  %v1329_v8 = vmul.f32 %v4572_v28, %v1270_v5 }
 0x1d3   :  { %3750 = vrsqrt.f32 %v944_v37  ;;  %v917_v35 = vmax.f32 %v885_v45, 0.0  ;;  %v4731_v32 = vmul.f32 0.125, %v495_v41  ;;  %v510_v47 = vrot.slane %v509_v44, 2 }
 0x1d4   :  { %v750_v24 = vadd.f32 %v749_v52, %v748_v58  ;;  %v765_v51 = vrot.slane %v598_v7, 4  ;;  %v1262_v57 = vrot.slane %v4700_v9, %v4301_v12  ;;  %v496_v34 = vrot.slane %v4715_v4, 4 }
 0x1d5   :  { %v596_v38 = vmul.f32 %v4715_v4, %v4715_v4  ;;  %v526_v1 = vrot.slane %v4726_v63, 4  ;;  %v1169_v28 = vsub.f32 %v4598_v31, %v1105_v17  ;;  %v1167_v2 = vsub.f32 %v4598_v31, %v1103_v22 }
 0x1d6   :  { %v3741_v16 = vpop.eup %3740  ;;  %v751_v62 = vrot.slane %v750_v24, 1  ;;  %v511_v55 = vadd.f32 %v510_v47, %v509_v44  ;;  %v766_v14 = vadd.f32 %v765_v51, %v598_v7  ;;  %v497_v9 = vadd.f32 %v496_v34, %v4715_v4 }
 0x1d7   :  { %v4742_v53 = vmul.f32 %v4598_v31, %v3741_v16  ;;  %v753_v60 = vrot.slane %v596_v38, 4  ;;  %v4745_v29 = vpop.eup %3742  ;;  %v949_v20 = vadd.f32 1e-05, %v917_v35  ;;  %v851_v45 = vmul.f32 %v4731_v32, %v4731_v32 }
 0x1d8   :  { %5594 = vst [vmem:[#allocation17_spill] sm:$0xff] %v4745_v29  ;;  %v752_v5 = vadd.f32 %v751_v62, %v750_v24  ;;  %v512_v36 = vrot.slane %v511_v55, 1  ;;  %v4749_v37 = vpop.eup %3744  ;;  %v767_v58 = vrot.slane %v766_v14, 2  ;;  %v498_v50 = vrot.slane %v497_v9, 2 }
 0x1d9   :  { %v1042_v41 = vmul.f32 %v4742_v53, %v4653_v43  ;;  %v527_v17 = vadd.f32 %v4726_v63, %v526_v1  ;;  %v1430_v44 = vrot.slane %v1169_v28, %v4309_v27  ;;  %v754_v7 = vadd.f32 %v753_v60, %v596_v38 }
 0x1da   :  { %v819_v22 = vmul.f32 0.125, %v752_v5  ;;  %v513_v52 = vadd.f32 %v512_v36, %v511_v55  ;;  %v1327_v35 = vmul.f32 %v1262_v57, %v4585_v40  ;;  %v1422_v24 = vrot.slane %v1167_v2, %v4309_v27 }
 0x1db   :  { %v768_v47 = vadd.f32 %v767_v58, %v766_v14  ;;  %v499_v51 = vadd.f32 %v498_v50, %v497_v9  ;;  %3752 = vrsqrt.f32 %v949_v20  ;;  %v755_v43 = vrot.slane %v754_v7, 2 }
 0x1dc   :  { %v883_v34 = vsub.f32 %v819_v22, %v851_v45  ;;  %v4757_v16 = vmul.f32 0.125, %v513_v52  ;;  %v1106_v62 = vrot.slane %v1042_v41, 7  ;;  %v528_v1 = vrot.slane %v527_v17, 2 }
 0x1dd   :  { %v769_v6 = vrot.slane %v768_v47, 1  ;;  %v500_v23 = vrot.slane %v499_v51, 1  ;;  %v3747_v29 = vpop.eup %3746  ;;  %v1489_v28 = vadd.f32 %v1430_v44, %v1329_v8  ;;  %v756_v55 = vadd.f32 %v755_v43, %v754_v7 }
 0x1de   :  { %v915_v5 = vmax.f32 %v883_v34, 0.0  ;;  %v601_v40 = vmul.f32 %v4726_v63, %v4726_v63  ;;  %v4761_v57 = vpop.eup %3748  ;;  %v1487_v38 = vadd.f32 %v1422_v24, %v1327_v35  ;;  %v529_v9 = vadd.f32 %v528_v1, %v527_v17  ;;  %v4773_v24 = vpop.f32.mrf.mxu0 }
 0x1df   :  { %v770_v2 = vadd.f32 %v769_v6, %v768_v47  ;;  %v501_v14 = vadd.f32 %v500_v23, %v499_v51  ;;  %v854_v45 = vmul.f32 %v4757_v16, %v4757_v16  ;;  %v757_v36 = vrot.slane %v756_v55, 1 }
 0x1e0   :  { %v3751_v60 = vpop.eup %3750  ;;  %v947_v20 = vadd.f32 1e-05, %v915_v5  ;;  %v783_v41 = vrot.slane %v601_v40, 4  ;;  %v1170_v8 = vsub.f32 %v4598_v31, %v1106_v62  ;;  %v3418_v22 = vmul.f32 -1.442695, %v4728_v49 }
 0x1e1   :  { %v1008_v58 = vmul.f32 %v4598_v31, %v3751_v60  ;;  %v822_v50 = vmul.f32 0.125, %v770_v2  ;;  %v4767_v44 = vmul.f32 0.125, %v501_v14  ;;  %v758_v6 = vadd.f32 %v757_v36, %v756_v55 }
 0x1e2   :  { %3754 = vrsqrt.f32 %v947_v20  ;;  %v530_v23 = vrot.slane %v529_v9, 1  ;;  %v3421_v17 = vmul.f32 -1.442695, %v1489_v28  ;;  %v3419_v52 = vmul.f32 -1.442695, %v1487_v38 }
 0x1e3   :  { %v1274_v7 = vrot.slane %v4742_v53, %v4301_v12  ;;  %v1040_v35 = vmul.f32 %v1008_v58, %v4691_v33  ;;  %v886_v47 = vsub.f32 %v822_v50, %v854_v45  ;;  %v820_v51 = vmul.f32 0.125, %v758_v6 }
 0x1e4   :  { %v852_v34 = vmul.f32 %v4767_v44, %v4767_v44  ;;  %v784_v43 = vadd.f32 %v783_v41, %v601_v40  ;;  %3756 = vrcp.f32 %v4720_v3  ;;  %v1434_v49 = vrot.slane %v1170_v8, %v4309_v27  ;;  %v4786_v3 = vpop.f32.mrf.mxu0 }
 0x1e5   :  { %v1104_v62 = vrot.slane %v1040_v35, 7  ;;  %3758 = vpow2.f32 %v3418_v22  ;;  %v531_v1 = vadd.f32 %v530_v23, %v529_v9  ;;  %v514_v28 = vrot.slane %v4773_v24, 4 }
 0x1e6   :  { %3760 = vpow2.f32 %v3421_v17  ;;  %v1330_v33 = vmul.f32 %v4610_v15, %v1274_v7  ;;  %v918_v53 = vmax.f32 %v886_v47, 0.0  ;;  %v884_v5 = vsub.f32 %v820_v51, %v852_v34  ;;  %v4799_v17 = vpop.f32.mrf.mxu0 }
 0x1e7   :  { %v4782_v55 = vadd.f32 1.0, %v4685_v25  ;;  %v4784_v38 = vadd.f32 1.0, %v3747_v29  ;;  %3762 = vpow2.f32 %v3419_v52  ;;  %v785_v40 = vrot.slane %v784_v43, 2 }
 0x1e8   :  { %v3753_v2 = vpop.eup %3752  ;;  %v1490_v14 = vadd.f32 %v1434_v49, %v1330_v33  ;;  %v1168_v9 = vsub.f32 %v4598_v31, %v1104_v62  ;;  %v950_v60 = vadd.f32 1e-05, %v918_v53  ;;  %v916_v20 = vmax.f32 %v884_v5, 0.0 }
 0x1e9   :  { %v4789_v45 = vmul.f32 0.125, %v531_v1  ;;  %v786_v15 = vadd.f32 %v785_v40, %v784_v43  ;;  %v515_v36 = vadd.f32 %v514_v28, %v4773_v24  ;;  %v599_v25 = vmul.f32 %v4773_v24, %v4773_v24 }
 0x1ea   :  { %v1266_v29 = vrot.slane %v1008_v58, %v4301_v12  ;;  %3764 = vrsqrt.f32 %v950_v60  ;;  %v948_v41 = vadd.f32 1e-05, %v916_v20  ;;  %v532_v8 = vrot.slane %v4786_v3, 4 }
 0x1eb   :  { %v4797_v50 = vmul.f32 %v4598_v31, %v3753_v2  ;;  %v787_v22 = vrot.slane %v786_v15, 1  ;;  %v516_v6 = vrot.slane %v515_v36, 2  ;;  %v771_v23 = vrot.slane %v599_v25, 4 }
 0x1ec   :  { %v1426_v52 = vrot.slane %v1168_v9, %v4309_v27  ;;  %3766 = vrsqrt.f32 %v948_v41  ;;  %v533_v7 = vadd.f32 %v4786_v3, %v532_v8  ;;  %v602_v58 = vmul.f32 %v4786_v3, %v4786_v3 }
 0x1ed   :  { %v788_v35 = vadd.f32 %v787_v22, %v786_v15  ;;  %v857_v47 = vmul.f32 %v4789_v45, %v4789_v45  ;;  %v517_v51 = vadd.f32 %v516_v6, %v515_v36  ;;  %v772_v34 = vadd.f32 %v771_v23, %v599_v25 }
 0x1ee   :  { %v1328_v49 = vmul.f32 %v1266_v29, %v4638_v26  ;;  %v534_v62 = vrot.slane %v533_v7, 2  ;;  %v789_v1 = vrot.slane %v602_v58, 4  ;;  %v520_v28 = vrot.slane %v4799_v17, 4 }
 0x1ef   :  { %v3755_v43 = vpop.eup %3754  ;;  %v1045_v33 = vmul.f32 %v4797_v50, %v4694_v30  ;;  %v825_v5 = vmul.f32 0.125, %v788_v35  ;;  %v518_v40 = vrot.slane %v517_v51, 1  ;;  %v4813_v2 = vadd.f32 1.0, %v4761_v57 }
 0x1f0   :  { %v1011_v53 = vmul.f32 %v4598_v31, %v3755_v43  ;;  %v773_v9 = vrot.slane %v772_v34, 2  ;;  %v535_v60 = vadd.f32 %v534_v62, %v533_v7  ;;  %v790_v20 = vadd.f32 %v789_v1, %v602_v58 }
 0x1f1   :  { %v4815_v15 = vpop.eup %3756  ;;  %v1488_v26 = vadd.f32 %v1426_v52, %v1328_v49  ;;  %v889_v25 = vsub.f32 %v825_v5, %v857_v47  ;;  %v521_v29 = vadd.f32 %v520_v28, %v4799_v17  ;;  %v519_v30 = vadd.f32 %v518_v40, %v517_v51 }
 0x1f2   :  { %v1043_v36 = vmul.f32 %v1011_v53, %v4731_v32  ;;  %v4819_v41 = vpop.eup %3758  ;;  %v774_v8 = vadd.f32 %v773_v9, %v772_v34  ;;  %v536_v22 = vrot.slane %v535_v60, 1  ;;  %v791_v6 = vrot.slane %v790_v20, 2 }
 0x1f3   :  { %v4821_v23 = vpop.eup %3760  ;;  %v3422_v57 = vmul.f32 -1.442695, %v1490_v14  ;;  %v1109_v35 = vrot.slane %v1045_v33, 7  ;;  %v921_v58 = vmax.f32 %v889_v25, 0.0  ;;  %v4825_v52 = vmul.f32 0.125, %v519_v30 }
 0x1f4   :  { %v1107_v7 = vrot.slane %v1043_v36, 7  ;;  %v4823_v43 = vpop.eup %3762  ;;  %v775_v32 = vrot.slane %v774_v8, 1  ;;  %v537_v47 = vadd.f32 %v536_v22, %v535_v60  ;;  %v792_v49 = vadd.f32 %v791_v6, %v790_v20 }
 0x1f5   :  { %v3420_v62 = vmul.f32 -1.442695, %v1488_v26  ;;  %v1278_v51 = vrot.slane %v1011_v53, %v4301_v12  ;;  %v522_v34 = vrot.slane %v521_v29, 2  ;;  %v855_v14 = vmul.f32 %v4825_v52, %v4825_v52 }
 0x1f6   :  { %v1171_v1 = vsub.f32 %v4598_v31, %v1107_v7  ;;  %v776_v28 = vadd.f32 %v775_v32, %v774_v8  ;;  %v4831_v33 = vmul.f32 0.125, %v537_v47  ;;  %v793_v5 = vrot.slane %v792_v49, 1 }
 0x1f7   :  { %v3765_v40 = vpop.eup %3764  ;;  %v953_v36 = vadd.f32 1e-05, %v921_v58  ;;  %v523_v25 = vadd.f32 %v522_v34, %v521_v29  ;;  %v600_v60 = vmul.f32 %v4799_v17, %v4799_v17  ;;  %v1286_v20 = vrot.slane %v4797_v50, %v4301_v12 }
 0x1f8   :  { %v1438_v9 = vrot.slane %v1171_v1, %v4309_v27  ;;  %v1014_v53 = vmul.f32 %v4598_v31, %v3765_v40  ;;  %v823_v26 = vmul.f32 0.125, %v776_v28  ;;  %v794_v30 = vadd.f32 %v793_v5, %v792_v49 }
 0x1f9   :  { %v3767_v8 = vpop.eup %3766  ;;  %v1331_v22 = vmul.f32 %v1278_v51, %v4665_v10  ;;  %v858_v6 = vmul.f32 %v4831_v33, %v4831_v33  ;;  %v524_v7 = vrot.slane %v523_v25, 1  ;;  %v777_v32 = vrot.slane %v600_v60, 4 }
 0x1fa   :  { %3768 = vpow2.f32 %v3420_v62  ;;  %v1046_v29 = vmul.f32 %v1014_v53, %v4757_v16  ;;  %v1012_v58 = vmul.f32 %v4598_v31, %v3767_v8  ;;  %v887_v47 = vsub.f32 %v823_v26, %v855_v14 }
 0x1fb   :  { %v1173_v50 = vsub.f32 %v4598_v31, %v1109_v35  ;;  %v1491_v1 = vadd.f32 %v1438_v9, %v1331_v22  ;;  %3770 = vrsqrt.f32 %v953_v36  ;;  %v826_v34 = vmul.f32 0.125, %v794_v30  ;;  %v4025_v30 = vld [vmem:[#allocation2] sm:$0xff] }
 0x1fc   :  { %v1110_v49 = vrot.slane %v1046_v29, 7  ;;  %v1290_v28 = vrot.slane %v1014_v53, %v4301_v12  ;;  %v1044_v10 = vmul.f32 %v1012_v58, %v4767_v44  ;;  %v778_v51 = vadd.f32 %v777_v32, %v600_v60 }
 0x1fd   :  { %3772 = vpow2.f32 %v3422_v57  ;;  %v919_v5 = vmax.f32 %v887_v47, 0.0  ;;  %v890_v40 = vsub.f32 %v826_v34, %v858_v6  ;;  %v525_v62 = vadd.f32 %v524_v7, %v523_v25  ;;  %v4026_v6 = vld [vmem:[#allocation2 + $0x8] sm:$0xff] }
 0x1fe   :  { %v1333_v16 = vmul.f32 %v4645_v46, %v1286_v20  ;;  %v1174_v8 = vsub.f32 %v4598_v31, %v1110_v49  ;;  %v1108_v14 = vrot.slane %v1044_v10, 7  ;;  %v1282_v35 = vrot.slane %v1012_v58, %v4301_v12  ;;  %v4027_v58 = vld [vmem:[#allocation2 + $0x10] sm:$0xff]  ;;  %v4029_v49 = vld [vmem:[#allocation2 + $0x20] sm:$0xff] }
 0x1ff   :  { %v1446_v9 = vrot.slane %v1173_v50, %v4309_v27  ;;  %v951_v36 = vadd.f32 1e-05, %v919_v5  ;;  %v922_v26 = vmax.f32 %v890_v40, 0.0  ;;  %v4852_v53 = vmul.f32 %v4025_v30, %v4424_v18  ;;  %v4028_v50 = vld [vmem:[#allocation2 + $0x18] sm:$0xff] }
 0x200   :  { %v3423_v44 = vmul.f32 -1.442695, %v1491_v1  ;;  %v1334_v57 = vmul.f32 %v4704_v19, %v1290_v28  ;;  %v1172_v25 = vsub.f32 %v4598_v31, %v1108_v14  ;;  %v779_v60 = vrot.slane %v778_v51, 2  ;;  %v4030_v28 = vld [vmem:[#allocation2 + $0x28] sm:$0xff] }
 0x201   :  { %v1450_v46 = vrot.slane %v1174_v8, %v4309_v27  ;;  %v954_v20 = vadd.f32 1e-05, %v922_v26  ;;  %v4857_v22 = vmul.f32 0.125, %v525_v62  ;;  %v4860_v7 = vmul.f32 %v4026_v6, %v4476_v0  ;;  %v4032_v26 = vld [vmem:[#allocation2 + $0x38] sm:$0xff] }
 0x202   :  { %v1332_v32 = vmul.f32 %v1282_v35, %v4715_v4  ;;  %v1442_v18 = vrot.slane %v1172_v25, %v4309_v27  ;;  %3774 = vrsqrt.f32 %v951_v36  ;;  %v780_v29 = vadd.f32 %v779_v60, %v778_v51  ;;  %v4031_v35 = vld [vmem:[#allocation2 + $0x48] sm:$0xff] }
 0x203   :  { %3776 = vrsqrt.f32 %v954_v20  ;;  %v1739_v19 = vpack.c.bf16 %v4860_v7, %v4852_v53  ;;  %v4867_v47 = vmul.f32 %v4027_v58, %v4412_v42  ;;  %v4870_v1 = vmul.f32 %v4028_v50, %v4470_v39 }
 0x204   :  { %v1492_v0 = vadd.f32 %v1442_v18, %v1332_v32  ;;  %v781_v34 = vrot.slane %v780_v29, 1  ;;  %v4873_v4 = vmul.f32 %v4029_v49, %v4543_v59  ;;  %v4876_v10 = vmul.f32 %v4030_v28, %v4607_v11  ;;  %v4037_v49 = vld [vmem:[#allocation2 + $0x60] sm:$0xff]  ;;  %v5595_v28 = vld [vmem:[#allocation17_spill] sm:$0xff] }
 0x205   :  { %v1493_v51 = vadd.f32 %v1446_v9, %v1333_v16  ;;  %3778 = vpow2.f32 %v3423_v44  ;;  %v1494_v5 = vadd.f32 %v1450_v46, %v1334_v57  ;;  %3583 = vmatprep.mubr.bf16.mxu1 %v1739_v19  ;;  %v1740_v42 = vpack.c.bf16 %v4870_v1, %v4867_v47  ;;  %v4033_v57 = vld [vmem:[#allocation2 + $0x40] sm:$0xff] }
 0x206   :  { %v3424_v40 = vmul.f32 -1.442695, %v1492_v0  ;;  %v782_v39 = vadd.f32 %v781_v34, %v780_v29  ;;  %v856_v62 = vmul.f32 %v4857_v22, %v4857_v22  ;;  %v1741_v59 = vpack.c.bf16 %v4876_v10, %v4873_v4  ;;  %v4036_v0 = vld [vmem:[#allocation2 + $0x58] sm:$0xff] }
 0x207   :  { %v3769_v8 = vpop.eup %3768  ;;  %v1609_v14 = vadd.f32 1.0, %v4673_v13  ;;  %3780 = vrcp.f32 %v4813_v2  ;;  %3584 = vmatmul.mubr.bf16.vlgmr.msra.gmra.mxu1 %v1740_v42  ;;  %v4887_v9 = vmul.f32 %v4031_v35, %v4679_v21  ;;  %v3426_v36 = vmul.f32 -1.442695, %v1494_v5  ;;  %v4038_v42 = vld [vmem:[#allocation2 + $0x50] sm:$0xff] }
 0x208   :  { %v3771_v11 = vpop.eup %3770  ;;  %3782 = vpow2.f32 %v3424_v40  ;;  %v824_v16 = vmul.f32 0.125, %v782_v39  ;;  %3587 = vmatprep.mubr.bf16.mxu1 %v1741_v59  ;;  %v4891_v30 = vmul.f32 %v4032_v26, %v4550_v54  ;;  %v3425_v13 = vmul.f32 -1.442695, %v1493_v51  ;;  %v5596_v40 = vld [vmem:[#allocation16_spill] sm:$0xff] }
 0x209   :  { %3784 = vrcp.f32 %v4782_v55  ;;  %v4895_v25 = vmul.f32 %v4033_v57, %v4667_v56  ;;  %v1616_v60 = vadd.f32 1.0, %v3769_v8  ;;  %v4898_v21 = vmul.f32 %v4598_v31, %v3771_v11  ;;  %v4034_v55 = vld [vmem:[#allocation2 + $0x30] sm:$0xff] }
 0x20a   :  { %v3773_v44 = vpop.eup %3772  ;;  %3786 = vrcp.f32 %v4784_v38  ;;  %v888_v2 = vsub.f32 %v824_v16, %v856_v62  ;;  %v4901_v46 = vmul.f32 %v4034_v55, %v4537_v48  ;;  %v1614_v38 = vadd.f32 1.0, %v4819_v41  ;;  %v4035_v41 = vld [vmem:[#allocation2 + $0x68] sm:$0xff] }
 0x20b   :  { %3788 = vrcp.f32 %v1609_v14  ;;  %v1743_v20 = vpack.c.bf16 %v4887_v9, %v4895_v25  ;;  %v1615_v6 = vadd.f32 1.0, %v4823_v43  ;;  %v1613_v29 = vadd.f32 1.0, %v4749_v37 }
 0x20c   :  { %v920_v54 = vmax.f32 %v888_v2, 0.0  ;;  %3790 = vpow2.f32 %v3426_v36  ;;  %v1742_v56 = vpack.c.bf16 %v4891_v30, %v4901_v46  ;;  %v1049_v48 = vmul.f32 %v4898_v21, %v4789_v45 }
 0x20d   :  { %3792 = vpow2.f32 %v3425_v13  ;;  %v4914_v50 = vmul.f32 %v4035_v41, %v4815_v15  ;;  %v4918_v37 = vmul.f32 %v4036_v0, %v4677_v61  ;;  %v4922_v51 = vmul.f32 %v4037_v49, %v5595_v28  ;;  %v4042_v41 = vld [vmem:[#allocation2 + $0x70] sm:$0xff] }
 0x20e   :  { %v952_v32 = vadd.f32 1e-05, %v920_v54  ;;  %3794 = vrcp.f32 %v1616_v60  ;;  %v1113_v5 = vrot.slane %v1049_v48, 7  ;;  %v4926_v39 = vmul.f32 %v4038_v42, %v5596_v40  ;;  %v4039_v54 = vld [vmem:[#allocation2 + $0x88] sm:$0xff] }
 0x20f   :  { %v3775_v18 = vpop.eup %3774  ;;  %3588 = vmatmul.mubr.bf16.gmra.mxu1 %v1742_v56  ;;  %v1745_v61 = vpack.c.bf16 %v4914_v50, %v4922_v51  ;;  %v1618_v14 = vadd.f32 1.0, %v3773_v44  ;;  %v1617_v13 = vadd.f32 1.0, %v4821_v23  ;;  %v4040_v56 = vld [vmem:[#allocation2 + $0x78] sm:$0xff] }
 0x210   :  { %v3777_v19 = vpop.eup %3776  ;;  %v1015_v58 = vmul.f32 %v4598_v31, %v3775_v18  ;;  %3796 = vrsqrt.f32 %v952_v32  ;;  %3591 = vmatprep.mubr.bf16.mxu1 %v1743_v20  ;;  %v1744_v11 = vpack.c.bf16 %v4918_v37, %v4926_v39  ;;  %v1177_v2 = vsub.f32 %v4598_v31, %v1113_v5  ;;  %v4041_v18 = vld [vmem:[#allocation2 + $0x80] sm:$0xff] }
 0x211   :  { %3798 = vrcp.f32 %v1614_v38  ;;  %v1018_v43 = vmul.f32 %v4598_v31, %v3777_v19  ;;  %v1302_v38 = vrot.slane %v4898_v21, %v4301_v12 }
 0x212   :  { %v3779_v34 = vpop.eup %3778  ;;  %3800 = vrcp.f32 %v1615_v6  ;;  %v1047_v45 = vmul.f32 %v1015_v58, %v4825_v52  ;;  %v1294_v55 = vrot.slane %v1015_v58, %v4301_v12  ;;  %v1462_v19 = vrot.slane %v1177_v2, %v4309_v27 }
 0x213   :  { %3802 = vrcp.f32 %v1613_v29  ;;  %v1050_v15 = vmul.f32 %v1018_v43, %v4831_v33  ;;  %v1619_v35 = vadd.f32 1.0, %v3779_v34  ;;  %v1306_v60 = vrot.slane %v1018_v43, %v4301_v12 }
 0x214   :  { %v3781_v62 = vpop.eup %3780  ;;  %v1111_v59 = vrot.slane %v1047_v45, 7  ;;  %v1335_v0 = vmul.f32 %v1294_v55, %v4773_v24  ;;  %v1337_v28 = vmul.f32 %v4726_v63, %v1302_v38 }
 0x215   :  { %v3783_v8 = vpop.eup %3782  ;;  %v1114_v52 = vrot.slane %v1050_v15, 7  ;;  %v4938_v20 = vmul.f32 %v4039_v54, %v3781_v62  ;;  %v1338_v58 = vmul.f32 %v4786_v3, %v1306_v60  ;;  %v4958_v3 = vld [vmem:[#allocation8] sm:$0xff]  ;;  %v4047_v60 = vld [vmem:[#allocation2 + $0x90] sm:$0xff] }
 0x216   :  { %v3785_v16 = vpop.eup %3784  ;;  %v1620_v36 = vadd.f32 1.0, %v3783_v8  ;;  %v1175_v33 = vsub.f32 %v4598_v31, %v1111_v59  ;;  %v1497_v24 = vadd.f32 %v1462_v19, %v1337_v28 }
 0x217   :  { %v3787_v26 = vpop.eup %3786  ;;  %v1178_v57 = vsub.f32 %v4598_v31, %v1114_v52  ;;  %3592 = vmatmul.mubr.bf16.gmra.mxu1 %v1744_v11  ;;  %5597 = vst [vmem:[#allocation17_spill] sm:$0xff] %v4938_v20  ;;  %v4943_v6 = vmul.f32 %v4040_v56, %v3785_v16  ;;  %v4044_v52 = vld [vmem:[#allocation2 + $0xa8] sm:$0xff]  ;;  %v4045_v16 = vld [vmem:[#allocation2 + $0x98] sm:$0xff] }
 0x218   :  { %v3789_v44 = vpop.eup %3788  ;;  %3804 = vrcp.f32 %v1620_v36  ;;  %3595 = vmatprep.mubr.bf16.mxu1 %v1745_v61  ;;  %v1454_v32 = vrot.slane %v1175_v33, %v4309_v27  ;;  %v4946_v29 = vmul.f32 %v4041_v18, %v3787_v26 }
 0x219   :  { %3806 = vrcp.f32 %v1618_v14  ;;  %v1466_v23 = vrot.slane %v1178_v57, %v4309_v27  ;;  %v3791_v31 = vpop.eup %3790  ;;  %v4950_v21 = vmul.f32 %v4042_v41, %v3789_v44  ;;  %v3429_v57 = vmul.f32 -1.442695, %v1497_v24 }
 0x21a   :  { %3808 = vrcp.f32 %v1619_v35  ;;  %v3793_v48 = vpop.eup %3792  ;;  %v1747_v34 = vpack.c.bf16 %v4938_v20, %v4946_v29  ;;  %v1622_v49 = vadd.f32 1.0, %v3791_v31  ;;  %v1495_v40 = vadd.f32 %v1454_v32, %v1335_v0  ;;  %v4050_v0 = vld [vmem:[#allocation2 + $0xc0] sm:$0xff] }
 0x21b   :  { %3810 = vrcp.f32 %v1617_v13  ;;  %v3795_v43 = vpop.eup %3794  ;;  %v1498_v5 = vadd.f32 %v1466_v23, %v1338_v58  ;;  %v1746_v15 = vpack.c.bf16 %v4943_v6, %v4950_v21  ;;  %v1621_v61 = vadd.f32 1.0, %v3793_v48  ;;  %v4046_v13 = vld [vmem:[#allocation2 + $0xa0] sm:$0xff]  ;;  %v4048_v48 = vld [vmem:[#allocation2 + $0xc8] sm:$0xff]  ;;  %v4049_v58 = vld [vmem:[#allocation2 + $0xb8] sm:$0xff] }
 0x21c   :  { %v4962_v63 = vmul.f32 %v4044_v52, %v3795_v43  ;;  %3812 = vrcp.f32 %v1622_v49  ;;  %v3427_v36 = vmul.f32 -1.442695, %v1495_v40 }
 0x21d   :  { %v3797_v45 = vpop.eup %3796  ;;  %v3430_v11 = vmul.f32 -1.442695, %v1498_v5  ;;  %3814 = vrcp.f32 %v1621_v61 }
 0x21e   :  { %v3799_v42 = vpop.eup %3798  ;;  %v1016_v62 = vmul.f32 %v4958_v3, %v3797_v45  ;;  %5598 = vst [vmem:[#allocation16_spill] sm:$0xff] %v4962_v63  ;;  %v4051_v45 = vld [vmem:[#allocation2 + $0xb0] sm:$0xff] }
 0x21f   :  { %v3801_v59 = vpop.eup %3800  ;;  %3596 = vmatmul.mubr.bf16.gmra.mxu1 %v1746_v15  ;;  %v4964_v35 = vmul.f32 %v4045_v16, %v3799_v42  ;;  %3816 = vpow2.f32 %v3430_v11  ;;  %v4052_v15 = vld [vmem:[#allocation2 + $0xd8] sm:$0xff] }
 0x220   :  { %v3803_v8 = vpop.eup %3802  ;;  %v1048_v14 = vmul.f32 %v1016_v62, %v4857_v22  ;;  %3599 = vmatprep.mubr.bf16.mxu1 %v1747_v34  ;;  %v1298_v26 = vrot.slane %v1016_v62, %v4301_v12  ;;  %v4967_v2 = vmul.f32 %v4046_v13, %v3801_v59  ;;  %3818 = vpow2.f32 %v3427_v36  ;;  %v4053_v59 = vld [vmem:[#allocation2 + $0xd0] sm:$0xff] }
 0x221   :  { %v4969_v22 = vmul.f32 %v4047_v60, %v3803_v8  ;;  %3820 = vpow2.f32 %v3429_v57  ;;  %v4054_v60 = vld [vmem:[#allocation2 + $0xf8] sm:$0xff] }
 0x222   :  { %v1112_v33 = vrot.slane %v1048_v14, 7  ;;  %5599 = vst [vmem:[#allocation18_spill] sm:$0xff] %v4967_v2  ;;  %v1749_v55 = vpack.c.bf16 %v4962_v63, %v4967_v2  ;;  %v1336_v12 = vmul.f32 %v1298_v26, %v4799_v17 }
 0x223   :  { %v1748_v38 = vpack.c.bf16 %v4964_v35, %v4969_v22 }
 0x224   :  { %v1176_v44 = vsub.f32 %v4958_v3, %v1112_v33 }
 0x225   :  { %v3805_v54 = vpop.eup %3804 }
 0x226   :  { %v3807_v23 = vpop.eup %3806  ;;  %v1458_v56 = vrot.slane %v1176_v44, %v4309_v27  ;;  %v4978_v19 = vmul.f32 %v4048_v48, %v3805_v54 }
 0x227   :  { %v3809_v31 = vpop.eup %3808  ;;  %3600 = vmatmul.mubr.bf16.gmra.mxu1 %v1748_v38  ;;  %v4980_v41 = vmul.f32 %v4049_v58, %v3807_v23  ;;  %v4056_v38 = vld [vmem:[#allocation2 + $0xe8] sm:$0xff] }
 0x228   :  { %v3811_v32 = vpop.eup %3810  ;;  %v1496_v18 = vadd.f32 %v1458_v56, %v1336_v12  ;;  %3603 = vmatprep.mubr.bf16.mxu1 %v1749_v55  ;;  %5600 = vst [vmem:[#allocation19_spill] sm:$0xff] %v4978_v19  ;;  %v4982_v34 = vmul.f32 %v4050_v0, %v3809_v31  ;;  %v4055_v55 = vld [vmem:[#allocation2 + $0xe0] sm:$0xff]  ;;  %v4057_v12 = vld [vmem:[#allocation2 + $0xf0] sm:$0xff] }
 0x229   :  { %5601 = vst [vmem:[#allocation20_spill] sm:$0xff] %v4980_v41  ;;  %v4984_v17 = vmul.f32 %v4051_v45, %v3811_v32  ;;  %v3813_v28 = vpop.eup %3812 }
 0x22a   :  { %v3428_v43 = vmul.f32 -1.442695, %v1496_v18  ;;  %5602 = vst [vmem:[#allocation21_spill] sm:$0xff] %v4982_v34  ;;  %v1751_v27 = vpack.c.bf16 %v4978_v19, %v4982_v34  ;;  %v3815_v5 = vpop.eup %3814  ;;  %v4990_v42 = vmul.f32 %v4052_v15, %v3813_v28 }
 0x22b   :  { %5603 = vst [vmem:[#allocation22_spill] sm:$0xff] %v4984_v17  ;;  %v1750_v49 = vpack.c.bf16 %v4980_v41, %v4984_v17  ;;  %v4992_v61 = vmul.f32 %v4053_v59, %v3815_v5  ;;  %v5610_v59 = vld [vmem:[#allocation15_spill] sm:$0xff] }
 0x22c   :  { %3822 = vpow2.f32 %v3428_v43  ;;  %5604 = vst [vmem:[#allocation23_spill] sm:$0xff] %v4990_v42  ;;  %v3817_v40 = vpop.eup %3816 }
 0x22d   :  { %v3819_v62 = vpop.eup %3818  ;;  %5605 = vst [vmem:[#allocation24_spill] sm:$0xff] %v4992_v61  ;;  %v1626_v8 = vadd.f32 1.0, %v3817_v40  ;;  %v1752_v14 = vpack.c.bf16 %v4990_v42, %v4992_v61 }
 0x22e   :  { %v3821_v24 = vpop.eup %3820  ;;  %v1623_v52 = vadd.f32 1.0, %v3819_v62 }
 0x22f   :  { %3604 = vmatmul.mubr.bf16.gmra.mxu1 %v1750_v49  ;;  %v1625_v11 = vadd.f32 1.0, %v3821_v24  ;;  %3824 = vrcp.f32 %v1626_v8  ;;  %v5023_v24 = vsub.s32 2, %v5610_v59  ;;  %v5026_v8 = vsub.s32 3, %v5610_v59 }
 0x230   :  { %3607 = vmatprep.mubr.bf16.mxu1 %v1751_v27  ;;  %3826 = vrcp.f32 %v1623_v52 }
 0x231   :  { %3828 = vrcp.f32 %v1625_v11 }
 0x237   :  { %3608 = vmatmul.mubr.bf16.gmra.mxu1 %v1752_v14 }
 0x239   :  { %v3823_v16 = vpop.eup %3822 }
 0x23a   :  { %v1624_v36 = vadd.f32 1.0, %v3823_v16 }
 0x23c   :  { %3830 = vrcp.f32 %v1624_v36  ;;  %v3825_v33 = vpop.eup %3824 }
 0x23d   :  { %v3827_v26 = vpop.eup %3826  ;;  %v4996_v44 = vmul.f32 %v4054_v60, %v3825_v33 }
 0x23e   :  { %v3829_v13 = vpop.eup %3828  ;;  %v4998_v54 = vmul.f32 %v4055_v55, %v3827_v26 }
 0x23f   :  { %5606 = vst [vmem:[#allocation25_spill] sm:$0xff] %v4996_v44  ;;  %v5002_v56 = vmul.f32 %v4057_v12, %v3829_v13 }
 0x240   :  { %5607 = vst [vmem:[#allocation26_spill] sm:$0xff] %v4998_v54 }
 0x241   :  { %5609 = vst [vmem:[#allocation28_spill] sm:$0xff] %v5002_v56  ;;  %v1754_v32 = vpack.c.bf16 %v4996_v44, %v5002_v56 }
 0x249   :  { %v3831_v57 = vpop.eup %3830 }
 0x24a   :  { %v5000_v23 = vmul.f32 %v4056_v38, %v3831_v57 }
 0x24c   :  { %5608 = vst [vmem:[#allocation27_spill] sm:$0xff] %v5000_v23  ;;  %v1753_v31 = vpack.c.bf16 %v5000_v23, %v4998_v54 }
 0x24e   :  { %3611 = vmatprep.mubr.bf16.mxu1 %v1753_v31 }
 0x24f   :  { %3612 = vmatmul.mubr.bf16.gmra.mxu1 %v1754_v32 }
 0x2c7   :  { %v5008_v18 = vpop.f32.mrf.mxu1 }
 0x2c8   :  { %v1976_v48 = vrot.slane %v5008_v18, 4  ;;  %v2190_v58 = vmul.f32 %v5008_v18, %v5008_v18 }
 0x2c9   :  { %v5013_v43 = vpop.f32.mrf.mxu1 }
 0x2ca   :  { %v1977_v0 = vadd.f32 %v5008_v18, %v1976_v48  ;;  %v2232_v45 = vrot.slane %v2190_v58, 4  ;;  %v1964_v27 = vrot.slane %v5013_v43, 4  ;;  %v2188_v49 = vmul.f32 %v5013_v43, %v5013_v43 }
 0x2cb   :  { %v5019_v28 = vpop.f32.mrf.mxu1 }
 0x2cc   :  { %v1978_v5 = vrot.slane %v1977_v0, 2  ;;  %v2233_v15 = vadd.f32 %v2232_v45, %v2190_v58  ;;  %v1965_v40 = vadd.f32 %v1964_v27, %v5013_v43  ;;  %v2220_v62 = vrot.slane %v2188_v49, 4 }
 0x2cd   :  { %v1982_v14 = vrot.slane %v5019_v28, 4  ;;  %v2191_v52 = vmul.f32 %v5019_v28, %v5019_v28  ;;  %v5031_v11 = vpop.f32.mrf.mxu1 }
 0x2ce   :  { %v1979_v16 = vadd.f32 %v1978_v5, %v1977_v0  ;;  %v2234_v36 = vrot.slane %v2233_v15, 2  ;;  %v1966_v33 = vrot.slane %v1965_v40, 2  ;;  %v2221_v26 = vadd.f32 %v2220_v62, %v2188_v49 }
 0x2cf   :  { %v1983_v13 = vadd.f32 %v5019_v28, %v1982_v14  ;;  %v2238_v57 = vrot.slane %v2191_v52, 4  ;;  %v1970_v60 = vrot.slane %v5031_v11, 4  ;;  %v2189_v55 = vmul.f32 %v5031_v11, %v5031_v11 }
 0x2d0   :  { %v1980_v38 = vrot.slane %v1979_v16, 1  ;;  %v2235_v12 = vadd.f32 %v2234_v36, %v2233_v15  ;;  %v1967_v31 = vadd.f32 %v1966_v33, %v1965_v40  ;;  %v2222_v32 = vrot.slane %v2221_v26, 2 }
 0x2d1   :  { %v1984_v48 = vrot.slane %v1983_v13, 2  ;;  %v2239_v58 = vadd.f32 %v2238_v57, %v2191_v52  ;;  %v1971_v45 = vadd.f32 %v1970_v60, %v5031_v11  ;;  %v2226_v0 = vrot.slane %v2189_v55, 4  ;;  %v5040_v57 = vpop.f32.mrf.mxu1 }
 0x2d2   :  { %v1981_v27 = vadd.f32 %v1980_v38, %v1979_v16  ;;  %v2236_v5 = vrot.slane %v2235_v12, 1  ;;  %v1968_v49 = vrot.slane %v1967_v31, 1  ;;  %v2223_v62 = vadd.f32 %v2222_v32, %v2221_v26 }
 0x2d3   :  { %v1985_v59 = vadd.f32 %v1984_v48, %v1983_v13  ;;  %v2240_v14 = vrot.slane %v2239_v58, 2  ;;  %v1972_v23 = vrot.slane %v1971_v45, 2  ;;  %v2227_v44 = vadd.f32 %v2226_v0, %v2189_v55 }
 0x2d4   :  { %v5038_v54 = vmul.f32 0.125, %v1981_v27  ;;  %v2237_v56 = vadd.f32 %v2236_v5, %v2235_v12  ;;  %v1969_v19 = vadd.f32 %v1968_v49, %v1967_v31  ;;  %v2224_v15 = vrot.slane %v2223_v62, 1  ;;  %v5051_v5 = vpop.f32.mrf.mxu1 }
 0x2d5   :  { %v1986_v40 = vrot.slane %v1985_v59, 1  ;;  %v2241_v36 = vadd.f32 %v2240_v14, %v2239_v58  ;;  %v1973_v33 = vadd.f32 %v1972_v23, %v1971_v45  ;;  %v2228_v52 = vrot.slane %v2227_v44, 2 }
 0x2d6   :  { %v2414_v60 = vmul.f32 0.125, %v2237_v56  ;;  %v2446_v16 = vmul.f32 %v5038_v54, %v5038_v54  ;;  %v5044_v26 = vmul.f32 0.125, %v1969_v19  ;;  %v2225_v13 = vadd.f32 %v2224_v15, %v2223_v62 }
 0x2d7   :  { %v1987_v38 = vadd.f32 %v1986_v40, %v1985_v59  ;;  %v2242_v55 = vrot.slane %v2241_v36, 1  ;;  %v1974_v32 = vrot.slane %v1973_v33, 1  ;;  %v2229_v48 = vadd.f32 %v2228_v52, %v2227_v44 }
 0x2d8   :  { %v2478_v12 = vsub.f32 %v2414_v60, %v2446_v16  ;;  %v2412_v31 = vmul.f32 0.125, %v2225_v13  ;;  %v2444_v58 = vmul.f32 %v5044_v26, %v5044_v26  ;;  %v2000_v23 = vrot.slane %v5040_v57, 4 }
 0x2d9   :  { %v5049_v45 = vmul.f32 0.125, %v1987_v38  ;;  %v2243_v56 = vadd.f32 %v2242_v55, %v2241_v36  ;;  %v1975_v0 = vadd.f32 %v1974_v32, %v1973_v33  ;;  %v2230_v27 = vrot.slane %v2229_v48, 1  ;;  %v5063_v32 = vpop.f32.mrf.mxu1 }
 0x2da   :  { %v2510_v19 = vmax.f32 %v2478_v12, 0.0  ;;  %v2476_v49 = vsub.f32 %v2412_v31, %v2444_v58  ;;  %v2001_v62 = vadd.f32 %v5040_v57, %v2000_v23  ;;  %v2194_v44 = vmul.f32 %v5040_v57, %v5040_v57 }
 0x2db   :  { %v2415_v59 = vmul.f32 0.125, %v2243_v56  ;;  %v2447_v14 = vmul.f32 %v5049_v45, %v5049_v45  ;;  %v5058_v15 = vmul.f32 0.125, %v1975_v0  ;;  %v2231_v40 = vadd.f32 %v2230_v27, %v2229_v48 }
 0x2dc   :  { %v2542_v52 = vadd.f32 1e-05, %v2510_v19  ;;  %v2508_v36 = vmax.f32 %v2476_v49, 0.0  ;;  %v2002_v33 = vrot.slane %v2001_v62, 2  ;;  %v2256_v60 = vrot.slane %v2194_v44, 4 }
 0x2dd   :  { %v2479_v16 = vsub.f32 %v2415_v59, %v2447_v14  ;;  %v2413_v13 = vmul.f32 0.125, %v2231_v40  ;;  %v2445_v38 = vmul.f32 %v5058_v15, %v5058_v15  ;;  %v1988_v55 = vrot.slane %v5051_v5, 4 }
 0x2de   :  { %3832 = vrsqrt.f32 %v2542_v52  ;;  %v2540_v12 = vadd.f32 1e-05, %v2508_v36  ;;  %v2003_v31 = vadd.f32 %v2002_v33, %v2001_v62  ;;  %v2257_v58 = vadd.f32 %v2256_v60, %v2194_v44  ;;  %v5069_v52 = vpop.f32.mrf.mxu1 }
 0x2df   :  { %v2511_v23 = vmax.f32 %v2479_v16, 0.0  ;;  %v2477_v56 = vsub.f32 %v2413_v13, %v2445_v38  ;;  %v1989_v48 = vadd.f32 %v1988_v55, %v5051_v5  ;;  %v2192_v0 = vmul.f32 %v5051_v5, %v5051_v5 }
 0x2e0   :  { %3834 = vrsqrt.f32 %v2540_v12  ;;  %v2004_v27 = vrot.slane %v2003_v31, 1  ;;  %v2258_v19 = vrot.slane %v2257_v58, 2  ;;  %v2006_v49 = vrot.slane %v5063_v32, 4 }
 0x2e1   :  { %v2543_v59 = vadd.f32 1e-05, %v2511_v23  ;;  %v2509_v14 = vmax.f32 %v2477_v56, 0.0  ;;  %v1990_v40 = vrot.slane %v1989_v48, 2  ;;  %v2244_v42 = vrot.slane %v2192_v0, 4 }
 0x2e2   :  { %v2005_v62 = vadd.f32 %v2004_v27, %v2003_v31  ;;  %v2259_v44 = vadd.f32 %v2258_v19, %v2257_v58  ;;  %v2007_v36 = vadd.f32 %v5063_v32, %v2006_v49  ;;  %v2195_v33 = vmul.f32 %v5063_v32, %v5063_v32  ;;  %v5077_v58 = vpop.f32.mrf.mxu1 }
 0x2e3   :  { %3836 = vrsqrt.f32 %v2543_v59  ;;  %v2541_v60 = vadd.f32 1e-05, %v2509_v14  ;;  %v1991_v16 = vadd.f32 %v1990_v40, %v1989_v48  ;;  %v2245_v13 = vadd.f32 %v2244_v42, %v2192_v0 }
 0x2e4   :  { %v5074_v38 = vmul.f32 0.125, %v2005_v62  ;;  %v2260_v55 = vrot.slane %v2259_v44, 1  ;;  %v2008_v12 = vrot.slane %v2007_v36, 2  ;;  %v2262_v23 = vrot.slane %v2195_v33, 4 }
 0x2e5   :  { %3838 = vrsqrt.f32 %v2541_v60  ;;  %v1992_v56 = vrot.slane %v1991_v16, 1  ;;  %v2246_v34 = vrot.slane %v2245_v13, 2  ;;  %v1994_v31 = vrot.slane %v5069_v52, 4 }
 0x2e6   :  { %v2261_v27 = vadd.f32 %v2260_v55, %v2259_v44  ;;  %v2450_v19 = vmul.f32 %v5074_v38, %v5074_v38  ;;  %v2009_v49 = vadd.f32 %v2008_v12, %v2007_v36  ;;  %v2263_v59 = vadd.f32 %v2262_v23, %v2195_v33 }
 0x2e7   :  { %v1993_v48 = vadd.f32 %v1992_v56, %v1991_v16  ;;  %v2247_v42 = vadd.f32 %v2246_v34, %v2245_v13  ;;  %v1995_v0 = vadd.f32 %v1994_v31, %v5069_v52  ;;  %v2193_v14 = vmul.f32 %v5069_v52, %v5069_v52 }
 0x2e8   :  { %v2418_v40 = vmul.f32 0.125, %v2261_v27  ;;  %v2010_v62 = vrot.slane %v2009_v49, 1  ;;  %v2264_v60 = vrot.slane %v2263_v59, 2  ;;  %v2024_v61 = vrot.slane %v5077_v58, 4 }
 0x2e9   :  { %v5085_v63 = vmul.f32 0.125, %v1993_v48  ;;  %v2248_v44 = vrot.slane %v2247_v42, 1  ;;  %v1996_v55 = vrot.slane %v1995_v0, 2  ;;  %v2250_v41 = vrot.slane %v2193_v14, 4 }
 0x2ea   :  { %v2482_v2 = vsub.f32 %v2418_v40, %v2450_v19  ;;  %v2011_v36 = vadd.f32 %v2010_v62, %v2009_v49  ;;  %v2265_v33 = vadd.f32 %v2264_v60, %v2263_v59  ;;  %v5088_v34 = vadd.f32 %v5077_v58, %v2024_v61 }
 0x2eb   :  { %v3833_v16 = vpop.eup %3832  ;;  %v2249_v13 = vadd.f32 %v2248_v44, %v2247_v42  ;;  %v2448_v12 = vmul.f32 %v5085_v63, %v5085_v63  ;;  %v1997_v23 = vadd.f32 %v1996_v55, %v1995_v0  ;;  %v2251_v56 = vadd.f32 %v2250_v41, %v2193_v14 }
 0x2ec   :  { %v2606_v31 = vmul.f32 %v4958_v3, %v3833_v16  ;;  %v2514_v27 = vmax.f32 %v2482_v2, 0.0  ;;  %v5093_v48 = vmul.f32 0.125, %v2011_v36  ;;  %v2266_v17 = vrot.slane %v2265_v33, 1 }
 0x2ed   :  { %v3835_v20 = vpop.eup %3834  ;;  %v2416_v19 = vmul.f32 0.125, %v2249_v13  ;;  %v1998_v49 = vrot.slane %v1997_v23, 1  ;;  %v2252_v59 = vrot.slane %v2251_v56, 2  ;;  %v2026_v61 = vrot.slane %v5088_v34, 2 }
 0x2ee   :  { %v2638_v40 = vmul.f32 %v2606_v31, %v5038_v54  ;;  %v2807_v42 = vrot.slane %v2606_v31, %v5023_v24  ;;  %v2604_v62 = vmul.f32 %v4958_v3, %v3835_v20  ;;  %v2546_v0 = vadd.f32 1e-05, %v2514_v27 }
 0x2ef   :  { %v2480_v41 = vsub.f32 %v2416_v19, %v2448_v12  ;;  %v2267_v14 = vadd.f32 %v2266_v17, %v2265_v33  ;;  %v2451_v2 = vmul.f32 %v5093_v48, %v5093_v48  ;;  %v1999_v60 = vadd.f32 %v1998_v49, %v1997_v23 }
 0x2f0   :  { %v3837_v44 = vpop.eup %3836  ;;  %v2702_v55 = vrot.slane %v2638_v40, 7  ;;  %v2926_v36 = vmul.f32 %v5008_v18, %v2807_v42  ;;  %v2636_v16 = vmul.f32 %v2604_v62, %v5044_v26  ;;  %v2799_v13 = vrot.slane %v2604_v62, %v5023_v24 }
 0x2f1   :  { %v2607_v54 = vmul.f32 %v4958_v3, %v3837_v44  ;;  %3840 = vrsqrt.f32 %v2546_v0  ;;  %v2512_v31 = vmax.f32 %v2480_v41, 0.0  ;;  %v2419_v20 = vmul.f32 0.125, %v2267_v14 }
 0x2f2   :  { %v3839_v27 = vpop.eup %3838  ;;  %v2766_v17 = vsub.f32 %v4958_v3, %v2702_v55  ;;  %v2700_v33 = vrot.slane %v2636_v16, 7  ;;  %v2924_v12 = vmul.f32 %v2799_v13, %v5013_v43  ;;  %v5107_v23 = vmul.f32 0.125, %v1999_v60 }
 0x2f3   :  { %v2639_v19 = vmul.f32 %v2607_v54, %v5049_v45  ;;  %v2811_v18 = vrot.slane %v2607_v54, %v5023_v24  ;;  %v2605_v26 = vmul.f32 %v4958_v3, %v3839_v27  ;;  %v2544_v49 = vadd.f32 1e-05, %v2512_v31 }
 0x2f4   :  { %v2967_v40 = vrot.slane %v2766_v17, %v5026_v8  ;;  %v2764_v42 = vsub.f32 %v4958_v3, %v2700_v33  ;;  %v2483_v62 = vsub.f32 %v2419_v20, %v2451_v2  ;;  %v2253_v0 = vadd.f32 %v2252_v59, %v2251_v56  ;;  %v5120_v2 = vpop.f32.mrf.mxu1 }
 0x2f5   :  { %v2703_v41 = vrot.slane %v2639_v19, 7  ;;  %v2927_v14 = vmul.f32 %v5019_v28, %v2811_v18  ;;  %v2637_v43 = vmul.f32 %v2605_v26, %v5058_v15  ;;  %v2803_v60 = vrot.slane %v2605_v26, %v5023_v24 }
 0x2f6   :  { %v3086_v44 = vadd.f32 %v2967_v40, %v2926_v36  ;;  %v2959_v45 = vrot.slane %v2764_v42, %v5026_v8  ;;  %3842 = vrsqrt.f32 %v2544_v49  ;;  %v2515_v55 = vmax.f32 %v2483_v62, 0.0  ;;  %v5131_v49 = vpop.f32.mrf.mxu1 }
 0x2f7   :  { %v2767_v16 = vsub.f32 %v4958_v3, %v2703_v41  ;;  %v2701_v13 = vrot.slane %v2637_v43, 7  ;;  %v2925_v54 = vmul.f32 %v2803_v60, %v5031_v11  ;;  %v2254_v31 = vrot.slane %v2253_v0, 1 }
 0x2f8   :  { %v3441_v56 = vmul.f32 -1.442695, %v3086_v44  ;;  %v3084_v59 = vadd.f32 %v2959_v45, %v2924_v12  ;;  %v2547_v28 = vadd.f32 1e-05, %v2515_v55  ;;  %v2449_v15 = vmul.f32 %v5107_v23, %v5107_v23 }
 0x2f9   :  { %v2971_v36 = vrot.slane %v2767_v16, %v5026_v8  ;;  %v2765_v20 = vsub.f32 %v4958_v3, %v2701_v13  ;;  %v2255_v27 = vadd.f32 %v2254_v31, %v2253_v0  ;;  %v2027_v17 = vadd.f32 %v2026_v61, %v5088_v34 }
 0x2fa   :  { %3844 = vpow2.f32 %v3441_v56  ;;  %v3439_v33 = vmul.f32 -1.442695, %v3084_v59  ;;  %v2198_v11 = vmul.f32 %v5077_v58, %v5077_v58  ;;  %v2012_v19 = vrot.slane %v5120_v2, 4 }
 0x2fb   :  { %v3087_v18 = vadd.f32 %v2971_v36, %v2927_v14  ;;  %v2963_v12 = vrot.slane %v2765_v20, %v5026_v8  ;;  %3846 = vrsqrt.f32 %v2547_v28  ;;  %v2417_v26 = vmul.f32 0.125, %v2255_v27 }
 0x2fc   :  { %3848 = vpow2.f32 %v3439_v33  ;;  %v2028_v40 = vrot.slane %v2027_v17, 1  ;;  %v2280_v42 = vrot.slane %v2198_v11, 4  ;;  %v2013_v62 = vadd.f32 %v2012_v19, %v5120_v2 }
 0x2fd   :  { %v3442_v34 = vmul.f32 -1.442695, %v3087_v18  ;;  %v3085_v61 = vadd.f32 %v2963_v12, %v2925_v54  ;;  %v2481_v0 = vsub.f32 %v2417_v26, %v2449_v15  ;;  %v2196_v41 = vmul.f32 %v5120_v2, %v5120_v2 }
 0x2fe   :  { %v3841_v43 = vpop.eup %3840  ;;  %v2029_v60 = vadd.f32 %v2028_v40, %v2027_v17  ;;  %v2281_v14 = vadd.f32 %v2280_v42, %v2198_v11  ;;  %v2014_v44 = vrot.slane %v2013_v62, 2  ;;  %v2030_v45 = vrot.slane %v5131_v49, 4  ;;  %v5144_v11 = vpop.f32.mrf.mxu1 }
 0x2ff   :  { %3850 = vpow2.f32 %v3442_v34  ;;  %v3440_v55 = vmul.f32 -1.442695, %v3085_v61  ;;  %v2610_v16 = vmul.f32 %v4958_v3, %v3841_v43  ;;  %v2513_v13 = vmax.f32 %v2481_v0, 0.0 }
 0x300   :  { %v5138_v31 = vmul.f32 0.125, %v2029_v60  ;;  %v2282_v56 = vrot.slane %v2281_v14, 2  ;;  %v2015_v59 = vadd.f32 %v2014_v44, %v2013_v62  ;;  %v2268_v54 = vrot.slane %v2196_v41, 4 }
 0x301   :  { %3852 = vpow2.f32 %v3440_v55  ;;  %v2642_v28 = vmul.f32 %v2610_v16, %v5074_v38  ;;  %v2823_v15 = vrot.slane %v2610_v16, %v5023_v24  ;;  %v2545_v36 = vadd.f32 1e-05, %v2513_v13 }
 0x302   :  { %v2283_v20 = vadd.f32 %v2282_v56, %v2281_v14  ;;  %v2454_v27 = vmul.f32 %v5138_v31, %v5138_v31  ;;  %v2016_v17 = vrot.slane %v2015_v59, 1  ;;  %v2269_v33 = vadd.f32 %v2268_v54, %v2196_v41 }
 0x303   :  { %v3843_v19 = vpop.eup %3842  ;;  %v2706_v18 = vrot.slane %v2642_v28, 7  ;;  %v2930_v12 = vmul.f32 %v5040_v57, %v2823_v15  ;;  %3854 = vrsqrt.f32 %v2545_v36  ;;  %v2031_v26 = vadd.f32 %v5131_v49, %v2030_v45 }
 0x304   :  { %v2608_v38 = vmul.f32 %v4958_v3, %v3843_v19  ;;  %v2284_v40 = vrot.slane %v2283_v20, 1  ;;  %v2017_v42 = vadd.f32 %v2016_v17, %v2015_v59  ;;  %v2270_v62 = vrot.slane %v2269_v33, 2 }
 0x305   :  { %v2770_v34 = vsub.f32 %v4958_v3, %v2706_v18  ;;  %v2032_v61 = vrot.slane %v2031_v26, 2  ;;  %v2199_v0 = vmul.f32 %v5131_v49, %v5131_v49  ;;  %v2018_v41 = vrot.slane %v5144_v11, 4 }
 0x306   :  { %v2640_v43 = vmul.f32 %v2608_v38, %v5085_v63  ;;  %v2815_v57 = vrot.slane %v2608_v38, %v5023_v24  ;;  %v2285_v60 = vadd.f32 %v2284_v40, %v2283_v20  ;;  %v5155_v14 = vmul.f32 0.125, %v2017_v42 }
 0x307   :  { %v3845_v44 = vpop.eup %3844  ;;  %v2983_v45 = vrot.slane %v2770_v34, %v5026_v8  ;;  %v2271_v55 = vadd.f32 %v2270_v62, %v2269_v33  ;;  %v2033_v16 = vadd.f32 %v2032_v61, %v2031_v26  ;;  %v2286_v13 = vrot.slane %v2199_v0, 4 }
 0x308   :  { %v3847_v56 = vpop.eup %3846  ;;  %v3214_v59 = vadd.f32 1.0, %v3845_v44  ;;  %v2704_v54 = vrot.slane %v2640_v43, 7  ;;  %v2928_v28 = vmul.f32 %v2815_v57, %v5051_v5  ;;  %v2422_v15 = vmul.f32 0.125, %v2285_v60 }
 0x309   :  { %v3849_v36 = vpop.eup %3848  ;;  %v3090_v17 = vadd.f32 %v2983_v45, %v2930_v12  ;;  %v2611_v63 = vmul.f32 %v4958_v3, %v3847_v56  ;;  %v2272_v19 = vrot.slane %v2271_v55, 1  ;;  %v2452_v20 = vmul.f32 %v5155_v14, %v5155_v14 }
 0x30a   :  { %3856 = vrcp.f32 %v3214_v59  ;;  %v3212_v18 = vadd.f32 1.0, %v3849_v36  ;;  %v2768_v33 = vsub.f32 %v4958_v3, %v2704_v54  ;;  %v2486_v26 = vsub.f32 %v2422_v15, %v2454_v27 }
 0x30b   :  { %v3445_v38 = vmul.f32 -1.442695, %v3090_v17  ;;  %v2643_v40 = vmul.f32 %v2611_v63, %v5093_v48  ;;  %v2827_v42 = vrot.slane %v2611_v63, %v5023_v24  ;;  %v2273_v5 = vadd.f32 %v2272_v19, %v2271_v55 }
 0x30c   :  { %v3851_v62 = vpop.eup %3850  ;;  %3858 = vrcp.f32 %v3212_v18  ;;  %v2975_v12 = vrot.slane %v2768_v33, %v5026_v8  ;;  %v2518_v34 = vmax.f32 %v2486_v26, 0.0  ;;  %v2034_v61 = vrot.slane %v2033_v16, 1  ;;  %v5172_v18 = vpop.f32.mrf.mxu1 }
 0x30d   :  { %v3215_v43 = vadd.f32 1.0, %v3851_v62  ;;  %3860 = vpow2.f32 %v3445_v38  ;;  %v2707_v57 = vrot.slane %v2643_v40, 7  ;;  %v2931_v60 = vmul.f32 %v5063_v32, %v2827_v42 }
 0x30e   :  { %v3853_v44 = vpop.eup %3852  ;;  %v3088_v45 = vadd.f32 %v2975_v12, %v2928_v28  ;;  %v2550_v27 = vadd.f32 1e-05, %v2518_v34  ;;  %v2420_v56 = vmul.f32 0.125, %v2273_v5  ;;  %v2035_v59 = vadd.f32 %v2034_v61, %v2033_v16 }
 0x30f   :  { %3862 = vrcp.f32 %v3215_v43  ;;  %v3213_v48 = vadd.f32 1.0, %v3853_v44  ;;  %v2771_v55 = vsub.f32 %v4958_v3, %v2707_v57  ;;  %v2287_v54 = vadd.f32 %v2286_v13, %v2199_v0 }
 0x310   :  { %v3855_v15 = vpop.eup %3854  ;;  %v3443_v36 = vmul.f32 -1.442695, %v3088_v45  ;;  %3864 = vrsqrt.f32 %v2550_v27  ;;  %v2484_v17 = vsub.f32 %v2420_v56, %v2452_v20  ;;  %v5168_v63 = vmul.f32 0.125, %v2035_v59 }
 0x311   :  { %3866 = vrcp.f32 %v3213_v48  ;;  %v2987_v19 = vrot.slane %v2771_v55, %v5026_v8  ;;  %v2609_v32 = vmul.f32 %v4958_v3, %v3855_v15  ;;  %v2288_v28 = vrot.slane %v2287_v54, 2 }
 0x312   :  { %3868 = vpow2.f32 %v3443_v36  ;;  %v2516_v16 = vmax.f32 %v2484_v17, 0.0  ;;  %v2455_v33 = vmul.f32 %v5168_v63, %v5168_v63  ;;  %v2019_v0 = vadd.f32 %v2018_v41, %v5144_v11 }
 0x313   :  { %v3091_v13 = vadd.f32 %v2987_v19, %v2931_v60  ;;  %v2641_v20 = vmul.f32 %v2609_v32, %v5107_v23  ;;  %v2819_v26 = vrot.slane %v2609_v32, %v5023_v24  ;;  %v2289_v38 = vadd.f32 %v2288_v28, %v2287_v54  ;;  %v5184_v60 = vpop.f32.mrf.mxu1 }
 0x314   :  { %v2548_v40 = vadd.f32 1e-05, %v2516_v16  ;;  %v2020_v42 = vrot.slane %v2019_v0, 2  ;;  %v2197_v5 = vmul.f32 %v5144_v11, %v5144_v11  ;;  %v2048_v62 = vrot.slane %v5172_v18, 4 }
 0x315   :  { %v3446_v12 = vmul.f32 -1.442695, %v3091_v13  ;;  %v2705_v34 = vrot.slane %v2641_v20, 7  ;;  %v2929_v61 = vmul.f32 %v2819_v26, %v5069_v52  ;;  %v2290_v43 = vrot.slane %v2289_v38, 1 }
 0x316   :  { %3870 = vrsqrt.f32 %v2548_v40  ;;  %v2021_v41 = vadd.f32 %v2020_v42, %v2019_v0  ;;  %v2274_v57 = vrot.slane %v2197_v5, 4  ;;  %v2049_v23 = vadd.f32 %v5172_v18, %v2048_v62 }
 0x317   :  { %v3857_v44 = vpop.eup %3856  ;;  %3872 = vpow2.f32 %v3446_v12  ;;  %v2769_v45 = vsub.f32 %v4958_v3, %v2705_v34  ;;  %v2291_v27 = vadd.f32 %v2290_v43, %v2289_v38  ;;  %v2202_v56 = vmul.f32 %v5172_v18, %v5172_v18 }
 0x318   :  { %v3310_v59 = vmul.f32 %v3857_v44, %v4867_v47  ;;  %v2022_v48 = vrot.slane %v2021_v41, 1  ;;  %v2275_v52 = vadd.f32 %v2274_v57, %v2197_v5  ;;  %v2050_v55 = vrot.slane %v2049_v23, 2 }
 0x319   :  { %v3859_v54 = vpop.eup %3858  ;;  %v2979_v15 = vrot.slane %v2769_v45, %v5026_v8  ;;  %v2423_v36 = vmul.f32 0.125, %v2291_v27  ;;  %v2304_v17 = vrot.slane %v2202_v56, 4  ;;  %v2036_v19 = vrot.slane %v5184_v60, 4 }
 0x31a   :  { %v3861_v32 = vpop.eup %3860  ;;  %3342 = vst [vmem:[#allocation10 + $0x10] sm:$0xff] %v3310_v59  ;;  %v3308_v28 = vmul.f32 %v3859_v54, %v4852_v53  ;;  %v2023_v16 = vadd.f32 %v2022_v48, %v2021_v41  ;;  %v2276_v0 = vrot.slane %v2275_v52, 2  ;;  %v2051_v13 = vadd.f32 %v2050_v55, %v2049_v23 }
 0x31b   :  { %v3218_v20 = vadd.f32 1.0, %v3861_v32  ;;  %v3089_v26 = vadd.f32 %v2979_v15, %v2929_v61  ;;  %v2487_v47 = vsub.f32 %v2423_v36, %v2455_v33  ;;  %v2305_v38 = vadd.f32 %v2304_v17, %v2202_v56  ;;  %v5205_v17 = vpop.f32.mrf.mxu1 }
 0x31c   :  { %v3863_v40 = vpop.eup %3862  ;;  %3340 = vst [vmem:[#allocation10] sm:$0xff] %v3308_v28  ;;  %v5193_v42 = vmul.f32 0.125, %v2023_v16  ;;  %v2277_v5 = vadd.f32 %v2276_v0, %v2275_v52  ;;  %v2052_v62 = vrot.slane %v2051_v13, 1  ;;  %v2037_v12 = vadd.f32 %v2036_v19, %v5184_v60 }
 0x31d   :  { %v3865_v34 = vpop.eup %3864  ;;  %v3311_v43 = vmul.f32 %v3863_v40, %v4870_v1  ;;  %3874 = vrcp.f32 %v3218_v20  ;;  %v3444_v53 = vmul.f32 -1.442695, %v3089_v26  ;;  %v2519_v41 = vmax.f32 %v2487_v47, 0.0 }
 0x31e   :  { %v3867_v57 = vpop.eup %3866  ;;  %v2614_v23 = vmul.f32 %v4958_v3, %v3865_v34  ;;  %v2278_v61 = vrot.slane %v2277_v5, 1  ;;  %v2453_v33 = vmul.f32 %v5193_v42, %v5193_v42  ;;  %v2053_v44 = vadd.f32 %v2052_v62, %v2051_v13 }
 0x31f   :  { %v3869_v45 = vpop.eup %3868  ;;  %3343 = vst [vmem:[#allocation10 + $0x18] sm:$0xff] %v3311_v43  ;;  %v3309_v27 = vmul.f32 %v3867_v57, %v4860_v7  ;;  %3876 = vpow2.f32 %v3444_v53  ;;  %v2551_v56 = vadd.f32 1e-05, %v2519_v41  ;;  %v2306_v59 = vrot.slane %v2305_v38, 2 }
 0x320   :  { %v3216_v48 = vadd.f32 1.0, %v3869_v45  ;;  %v2646_v1 = vmul.f32 %v2614_v23, %v5138_v31  ;;  %v2839_v52 = vrot.slane %v2614_v23, %v5023_v24  ;;  %v2279_v55 = vadd.f32 %v2278_v61, %v2277_v5 }
 0x321   :  { %3341 = vst [vmem:[#allocation10 + $0x8] sm:$0xff] %v3309_v27  ;;  %3878 = vrsqrt.f32 %v2551_v56  ;;  %v5203_v54 = vmul.f32 0.125, %v2053_v44  ;;  %v2307_v15 = vadd.f32 %v2306_v59, %v2305_v38  ;;  %v2038_v36 = vrot.slane %v2037_v12, 2 }
 0x322   :  { %3880 = vrcp.f32 %v3216_v48  ;;  %v2710_v19 = vrot.slane %v2646_v1, 7  ;;  %v2934_v7 = vmul.f32 %v5077_v58, %v2839_v52  ;;  %v2421_v32 = vmul.f32 0.125, %v2279_v55 }
 0x323   :  { %v3871_v28 = vpop.eup %3870  ;;  %v2308_v16 = vrot.slane %v2307_v15, 1  ;;  %v2458_v31 = vmul.f32 %v5203_v54, %v5203_v54  ;;  %v2039_v0 = vadd.f32 %v2038_v36, %v2037_v12  ;;  %v2200_v13 = vmul.f32 %v5184_v60, %v5184_v60  ;;  %v5225_v36 = vpop.f32.mrf.mxu1 }
 0x324   :  { %v3873_v20 = vpop.eup %3872  ;;  %v2774_v26 = vsub.f32 %v4958_v3, %v2710_v19  ;;  %v2612_v47 = vmul.f32 %v4958_v3, %v3871_v28  ;;  %v2485_v38 = vsub.f32 %v2421_v32, %v2453_v33  ;;  %v2054_v40 = vrot.slane %v5205_v17, 4 }
 0x325   :  { %v3219_v5 = vadd.f32 1.0, %v3873_v20  ;;  %v2309_v58 = vadd.f32 %v2308_v16, %v2307_v15  ;;  %v2040_v62 = vrot.slane %v2039_v0, 1  ;;  %v2292_v34 = vrot.slane %v2200_v13, 4 }
 0x326   :  { %v2999_v43 = vrot.slane %v2774_v26, %v5026_v8  ;;  %v2644_v53 = vmul.f32 %v2612_v47, %v5155_v14  ;;  %v2831_v12 = vrot.slane %v2612_v47, %v5023_v24  ;;  %v2517_v41 = vmax.f32 %v2485_v38, 0.0 }
 0x327   :  { %3882 = vrcp.f32 %v3219_v5  ;;  %v2426_v57 = vmul.f32 0.125, %v2309_v58  ;;  %v2041_v23 = vadd.f32 %v2040_v62, %v2039_v0  ;;  %v2293_v61 = vadd.f32 %v2292_v34, %v2200_v13  ;;  %v5234_v62 = vld [vmem:[#allocation8] sm:$0xff] }
 0x328   :  { %v3094_v44 = vadd.f32 %v2999_v43, %v2934_v7  ;;  %v2708_v45 = vrot.slane %v2644_v53, 7  ;;  %v2932_v33 = vmul.f32 %v2831_v12, %v5120_v2  ;;  %v2549_v27 = vadd.f32 1e-05, %v2517_v41 }
 0x329   :  { %v2490_v56 = vsub.f32 %v2426_v57, %v2458_v31  ;;  %v5219_v59 = vmul.f32 0.125, %v2041_v23  ;;  %v2294_v48 = vrot.slane %v2293_v61, 2  ;;  %v2055_v1 = vadd.f32 %v5205_v17, %v2054_v40 }
 0x32a   :  { %v3875_v52 = vpop.eup %3874  ;;  %v3449_v14 = vmul.f32 -1.442695, %v3094_v44  ;;  %v2772_v55 = vsub.f32 %v4958_v3, %v2708_v45  ;;  %3884 = vrsqrt.f32 %v2549_v27  ;;  %v2203_v15 = vmul.f32 %v5205_v17, %v5205_v17 }
 0x32b   :  { %v3314_v19 = vmul.f32 %v3875_v52, %v4901_v46  ;;  %v2522_v2 = vmax.f32 %v2490_v56, 0.0  ;;  %v2295_v7 = vadd.f32 %v2294_v48, %v2293_v61  ;;  %v2456_v32 = vmul.f32 %v5219_v59, %v5219_v59 }
 0x32c   :  { %v3877_v28 = vpop.eup %3876  ;;  %3886 = vpow2.f32 %v3449_v14  ;;  %v2991_v16 = vrot.slane %v2772_v55, %v5026_v8  ;;  %v2056_v31 = vrot.slane %v2055_v1, 2  ;;  %v2310_v0 = vrot.slane %v2203_v15, 4 }
 0x32d   :  { %3346 = vst [vmem:[#allocation10 + $0x30] sm:$0xff] %v3314_v19  ;;  %v3217_v3 = vadd.f32 1.0, %v3877_v28  ;;  %v2554_v13 = vadd.f32 1e-05, %v2522_v2  ;;  %v2296_v20 = vrot.slane %v2295_v7, 1  ;;  %v2042_v26 = vrot.slane %v5225_v36, 4 }
 0x32e   :  { %v3879_v47 = vpop.eup %3878  ;;  %v3092_v38 = vadd.f32 %v2991_v16, %v2932_v33  ;;  %v2057_v46 = vadd.f32 %v2056_v31, %v2055_v1  ;;  %v2311_v40 = vadd.f32 %v2310_v0, %v2203_v15  ;;  %v2201_v5 = vmul.f32 %v5225_v36, %v5225_v36  ;;  %v5241_v33 = vpop.f32.mrf.mxu1 }
 0x32f   :  { %v3881_v58 = vpop.eup %3880  ;;  %3888 = vrcp.f32 %v3217_v3  ;;  %v2615_v34 = vmul.f32 %v5234_v62, %v3879_v47  ;;  %v2297_v43 = vadd.f32 %v2296_v20, %v2295_v7  ;;  %v2043_v53 = vadd.f32 %v2042_v26, %v5225_v36 }
 0x330   :  { %v3312_v12 = vmul.f32 %v3881_v58, %v4873_v4  ;;  %v3447_v41 = vmul.f32 -1.442695, %v3092_v38  ;;  %3890 = vrsqrt.f32 %v2554_v13  ;;  %v2058_v57 = vrot.slane %v2057_v46, 1 }
 0x331   :  { %v2647_v23 = vmul.f32 %v2615_v34, %v5168_v63  ;;  %v2843_v61 = vrot.slane %v2615_v34, %v5023_v24  ;;  %v2424_v44 = vmul.f32 0.125, %v2297_v43  ;;  %v2312_v45 = vrot.slane %v2311_v40, 2 }
 0x332   :  { %3344 = vst [vmem:[#allocation10 + $0x20] sm:$0xff] %v3312_v12  ;;  %3892 = vpow2.f32 %v3447_v41  ;;  %v2059_v27 = vadd.f32 %v2058_v57, %v2057_v46  ;;  %v2044_v56 = vrot.slane %v2043_v53, 2  ;;  %v2298_v48 = vrot.slane %v2201_v5, 4 }
 0x333   :  { %v2711_v1 = vrot.slane %v2647_v23, 7  ;;  %v2935_v52 = vmul.f32 %v5131_v49, %v2843_v61  ;;  %v2488_v4 = vsub.f32 %v2424_v44, %v2456_v32  ;;  %v2313_v14 = vadd.f32 %v2312_v45, %v2311_v40 }
 0x334   :  { %v3883_v55 = vpop.eup %3882  ;;  %v5244_v15 = vmul.f32 0.125, %v2059_v27  ;;  %v2045_v63 = vadd.f32 %v2044_v56, %v2043_v53  ;;  %v2299_v19 = vadd.f32 %v2298_v48, %v2201_v5  ;;  %v2072_v2 = vrot.slane %v5241_v33, 4 }
 0x335   :  { %v3315_v7 = vmul.f32 %v3883_v55, %v4891_v30  ;;  %v2775_v28 = vsub.f32 %v5234_v62, %v2711_v1  ;;  %v2520_v16 = vmax.f32 %v2488_v4, 0.0  ;;  %v2314_v31 = vrot.slane %v2313_v14, 1  ;;  %v5263_v4 = vpop.f32.mrf.mxu1 }
 0x336   :  { %v2459_v0 = vmul.f32 %v5244_v15, %v5244_v15  ;;  %v2046_v3 = vrot.slane %v2045_v63, 1  ;;  %v2300_v49 = vrot.slane %v2299_v19, 2  ;;  %v2073_v32 = vadd.f32 %v5241_v33, %v2072_v2 }
 0x337   :  { %v3885_v13 = vpop.eup %3884  ;;  %3347 = vst [vmem:[#allocation10 + $0x38] sm:$0xff] %v3315_v7  ;;  %v3003_v20 = vrot.slane %v2775_v28, %v5026_v8  ;;  %v2552_v26 = vadd.f32 1e-05, %v2520_v16  ;;  %v2315_v47 = vadd.f32 %v2314_v31, %v2313_v14  ;;  %v2206_v30 = vmul.f32 %v5241_v33, %v5241_v33 }
 0x338   :  { %v2613_v38 = vmul.f32 %v5234_v62, %v3885_v13  ;;  %v2047_v46 = vadd.f32 %v2046_v3, %v2045_v63  ;;  %v2301_v40 = vadd.f32 %v2300_v49, %v2299_v19  ;;  %v2074_v5 = vrot.slane %v2073_v32, 2 }
 0x339   :  { %v3887_v58 = vpop.eup %3886  ;;  %v3095_v34 = vadd.f32 %v3003_v20, %v2935_v52  ;;  %3894 = vrsqrt.f32 %v2552_v26  ;;  %v2427_v43 = vmul.f32 0.125, %v2315_v47  ;;  %v2328_v53 = vrot.slane %v2206_v30, 4 }
 0x33a   :  { %v3222_v12 = vadd.f32 1.0, %v3887_v58  ;;  %v2645_v41 = vmul.f32 %v2613_v38, %v5193_v42  ;;  %v2835_v57 = vrot.slane %v2613_v38, %v5023_v24  ;;  %v5258_v23 = vmul.f32 0.125, %v2047_v46 }
 0x33b   :  { %v3450_v61 = vmul.f32 -1.442695, %v3095_v34  ;;  %v2491_v44 = vsub.f32 %v2427_v43, %v2459_v0  ;;  %v2302_v45 = vrot.slane %v2301_v40, 1  ;;  %v2075_v27 = vadd.f32 %v2074_v5, %v2073_v32 }
 0x33c   :  { %v3889_v56 = vpop.eup %3888  ;;  %3896 = vrcp.f32 %v3222_v12  ;;  %v2709_v48 = vrot.slane %v2645_v41, 7  ;;  %v2933_v1 = vmul.f32 %v2835_v57, %v5144_v11  ;;  %v2457_v52 = vmul.f32 %v5258_v23, %v5258_v23 }
 0x33d   :  { %v3891_v14 = vpop.eup %3890  ;;  %v3313_v42 = vmul.f32 %v3889_v56, %v4876_v10  ;;  %3898 = vpow2.f32 %v3450_v61  ;;  %v2523_v55 = vmax.f32 %v2491_v44, 0.0  ;;  %v2303_v63 = vadd.f32 %v2302_v45, %v2301_v40 }
 0x33e   :  { %v2773_v19 = vsub.f32 %v5234_v62, %v2709_v48  ;;  %v2618_v2 = vmul.f32 %v5234_v62, %v3891_v14  ;;  %v2076_v7 = vrot.slane %v2075_v27, 1  ;;  %v2329_v28 = vadd.f32 %v2328_v53, %v2206_v30  ;;  %v5274_v30 = vpop.f32.mrf.mxu1 }
 0x33f   :  { %v3893_v16 = vpop.eup %3892  ;;  %3345 = vst [vmem:[#allocation10 + $0x28] sm:$0xff] %v3313_v42  ;;  %v2555_v11 = vadd.f32 1e-05, %v2523_v55  ;;  %v2425_v31 = vmul.f32 0.125, %v2303_v63  ;;  %v2060_v0 = vrot.slane %v5263_v4, 4  ;;  %v2204_v3 = vmul.f32 %v5263_v4, %v5263_v4 }
 0x340   :  { %v3220_v49 = vadd.f32 1.0, %v3893_v16  ;;  %v2995_v10 = vrot.slane %v2773_v19, %v5026_v8  ;;  %v2650_v32 = vmul.f32 %v2618_v2, %v5203_v54  ;;  %v2855_v13 = vrot.slane %v2618_v2, %v5023_v24 }
 0x341   :  { %3900 = vrsqrt.f32 %v2555_v11  ;;  %v2489_v20 = vsub.f32 %v2425_v31, %v2457_v52  ;;  %v2077_v26 = vadd.f32 %v2076_v7, %v2075_v27  ;;  %v2330_v47 = vrot.slane %v2329_v28, 2 }
 0x342   :  { %3902 = vrcp.f32 %v3220_v49  ;;  %v3093_v38 = vadd.f32 %v2995_v10, %v2933_v1  ;;  %v2714_v46 = vrot.slane %v2650_v32, 7  ;;  %v2938_v40 = vmul.f32 %v5172_v18, %v2855_v13 }
 0x343   :  { %v2521_v5 = vmax.f32 %v2489_v20, 0.0  ;;  %v5277_v58 = vmul.f32 0.125, %v2077_v26  ;;  %v2331_v34 = vadd.f32 %v2330_v47, %v2329_v28  ;;  %v2061_v43 = vadd.f32 %v2060_v0, %v5263_v4  ;;  %v5293_v47 = vpop.f32.mrf.mxu1 }
 0x344   :  { %v3448_v54 = vmul.f32 -1.442695, %v3093_v38  ;;  %v2778_v53 = vsub.f32 %v5234_v62, %v2714_v46  ;;  %v2316_v12 = vrot.slane %v2204_v3, 4  ;;  %v2078_v41 = vrot.slane %v5274_v30, 4 }
 0x345   :  { %v2553_v57 = vadd.f32 1e-05, %v2521_v5  ;;  %v2332_v61 = vrot.slane %v2331_v34, 1  ;;  %v2462_v44 = vmul.f32 %v5277_v58, %v5277_v58  ;;  %v2062_v45 = vrot.slane %v2061_v43, 2 }
 0x346   :  { %v3895_v27 = vpop.eup %3894  ;;  %3904 = vpow2.f32 %v3448_v54  ;;  %v3015_v18 = vrot.slane %v2778_v53, %v5026_v8  ;;  %v2317_v56 = vadd.f32 %v2316_v12, %v2204_v3  ;;  %v2079_v48 = vadd.f32 %v5274_v30, %v2078_v41 }
 0x347   :  { %v2616_v1 = vmul.f32 %v5234_v62, %v3895_v27  ;;  %3906 = vrsqrt.f32 %v2553_v57  ;;  %v2333_v52 = vadd.f32 %v2332_v61, %v2331_v34  ;;  %v2063_v14 = vadd.f32 %v2062_v45, %v2061_v43 }
 0x348   :  { %v3098_v42 = vadd.f32 %v3015_v18, %v2938_v40  ;;  %v2318_v55 = vrot.slane %v2317_v56, 2  ;;  %v2080_v63 = vrot.slane %v2079_v48, 2  ;;  %v2207_v19 = vmul.f32 %v5274_v30, %v5274_v30 }
 0x349   :  { %v3897_v2 = vpop.eup %3896  ;;  %v2648_v7 = vmul.f32 %v2616_v1, %v5219_v59  ;;  %v2847_v28 = vrot.slane %v2616_v1, %v5023_v24  ;;  %v2430_v16 = vmul.f32 0.125, %v2333_v52  ;;  %v2064_v11 = vrot.slane %v2063_v14, 1 }
 0x34a   :  { %v3899_v31 = vpop.eup %3898  ;;  %v3318_v0 = vmul.f32 %v3897_v2, %v4926_v39  ;;  %v3453_v3 = vmul.f32 -1.442695, %v3098_v42  ;;  %v2319_v49 = vadd.f32 %v2318_v55, %v2317_v56  ;;  %v2081_v10 = vadd.f32 %v2080_v63, %v2079_v48 }
 0x34b   :  { %v3223_v32 = vadd.f32 1.0, %v3899_v31  ;;  %v2712_v13 = vrot.slane %v2648_v7, 7  ;;  %v2936_v20 = vmul.f32 %v2847_v28, %v5184_v60  ;;  %v2494_v26 = vsub.f32 %v2430_v16, %v2462_v44 }
 0x34c   :  { %3350 = vst [vmem:[#allocation10 + $0x50] sm:$0xff] %v3318_v0  ;;  %3908 = vpow2.f32 %v3453_v3  ;;  %v2065_v59 = vadd.f32 %v2064_v11, %v2063_v14  ;;  %v2320_v38 = vrot.slane %v2319_v49, 1  ;;  %v2082_v46 = vrot.slane %v2081_v10, 1 }
 0x34d   :  { %3910 = vrcp.f32 %v3223_v32  ;;  %v2776_v40 = vsub.f32 %v5234_v62, %v2712_v13  ;;  %v2526_v5 = vmax.f32 %v2494_v26, 0.0  ;;  %v2334_v39 = vrot.slane %v2207_v19, 4  ;;  %v5316_v32 = vpop.f32.mrf.mxu1 }
 0x34e   :  { %v3901_v34 = vpop.eup %3900  ;;  %v5296_v43 = vmul.f32 0.125, %v2065_v59  ;;  %v2321_v54 = vadd.f32 %v2320_v38, %v2319_v49  ;;  %v2083_v53 = vadd.f32 %v2082_v46, %v2081_v10  ;;  %v2066_v60 = vrot.slane %v5293_v47, 4 }
 0x34f   :  { %v3903_v12 = vpop.eup %3902  ;;  %v3007_v41 = vrot.slane %v2776_v40, %v5026_v8  ;;  %v2619_v57 = vmul.f32 %v5234_v62, %v3901_v34  ;;  %v2558_v61 = vadd.f32 1e-05, %v2526_v5  ;;  %v2335_v44 = vadd.f32 %v2334_v39, %v2207_v19 }
 0x350   :  { %v3316_v45 = vmul.f32 %v3903_v12, %v4895_v25  ;;  %v2428_v27 = vmul.f32 0.125, %v2321_v54  ;;  %v2460_v18 = vmul.f32 %v5296_v43, %v5296_v43  ;;  %v5304_v56 = vmul.f32 0.125, %v2083_v53 }
 0x351   :  { %v3096_v48 = vadd.f32 %v3007_v41, %v2936_v20  ;;  %v2651_v1 = vmul.f32 %v2619_v57, %v5244_v15  ;;  %v2859_v52 = vrot.slane %v2619_v57, %v5023_v24  ;;  %3912 = vrsqrt.f32 %v2558_v61 }
 0x352   :  { %3348 = vst [vmem:[#allocation10 + $0x40] sm:$0xff] %v3316_v45  ;;  %v2492_v14 = vsub.f32 %v2428_v27, %v2460_v18  ;;  %v2336_v42 = vrot.slane %v2335_v44, 2  ;;  %v2463_v55 = vmul.f32 %v5304_v56, %v5304_v56  ;;  %v2067_v25 = vadd.f32 %v2066_v60, %v5293_v47 }
 0x353   :  { %v3905_v63 = vpop.eup %3904  ;;  %v3451_v19 = vmul.f32 -1.442695, %v3096_v48  ;;  %v2715_v2 = vrot.slane %v2651_v1, 7  ;;  %v2939_v7 = vmul.f32 %v5205_v17, %v2859_v52  ;;  %v2205_v28 = vmul.f32 %v5293_v47, %v5293_v47  ;;  %v5326_v1 = vpop.f32.mrf.mxu1 }
 0x354   :  { %v3907_v15 = vpop.eup %3906  ;;  %v3221_v16 = vadd.f32 1.0, %v3905_v63  ;;  %v2524_v11 = vmax.f32 %v2492_v14, 0.0  ;;  %v2337_v31 = vadd.f32 %v2336_v42, %v2335_v44  ;;  %v2068_v0 = vrot.slane %v2067_v25, 2 }
 0x355   :  { %3914 = vpow2.f32 %v3451_v19  ;;  %v2779_v3 = vsub.f32 %v5234_v62, %v2715_v2  ;;  %v2617_v49 = vmul.f32 %v5234_v62, %v3907_v15  ;;  %v2322_v10 = vrot.slane %v2205_v28, 4 }
 0x356   :  { %3916 = vrcp.f32 %v3221_v16  ;;  %v2556_v13 = vadd.f32 1e-05, %v2524_v11  ;;  %v2338_v20 = vrot.slane %v2337_v31, 1  ;;  %v2069_v17 = vadd.f32 %v2068_v0, %v2067_v25 }
 0x357   :  { %v3019_v26 = vrot.slane %v2779_v3, %v5026_v8  ;;  %v2649_v59 = vmul.f32 %v2617_v49, %v5258_v23  ;;  %v2851_v38 = vrot.slane %v2617_v49, %v5023_v24  ;;  %v2323_v46 = vadd.f32 %v2322_v10, %v2205_v28 }
 0x358   :  { %3918 = vrsqrt.f32 %v2556_v13  ;;  %v2339_v40 = vadd.f32 %v2338_v20, %v2337_v31  ;;  %v2070_v5 = vrot.slane %v2069_v17, 1  ;;  %v2096_v39 = vrot.slane %v5316_v32, 4 }
 0x359   :  { %v3909_v34 = vpop.eup %3908  ;;  %v3099_v54 = vadd.f32 %v3019_v26, %v2939_v7  ;;  %v2713_v53 = vrot.slane %v2649_v59, 7  ;;  %v2937_v60 = vmul.f32 %v2851_v38, %v5225_v36  ;;  %v2324_v12 = vrot.slane %v2323_v46, 2 }
 0x35a   :  { %v3911_v41 = vpop.eup %3910  ;;  %v3226_v57 = vadd.f32 1.0, %v3909_v34  ;;  %v2431_v61 = vmul.f32 0.125, %v2339_v40  ;;  %v2071_v44 = vadd.f32 %v2070_v5, %v2069_v17  ;;  %v2097_v23 = vadd.f32 %v5316_v32, %v2096_v39 }
 0x35b   :  { %v3319_v45 = vmul.f32 %v3911_v41, %v4918_v37  ;;  %v3454_v27 = vmul.f32 -1.442695, %v3099_v54  ;;  %v2777_v18 = vsub.f32 %v5234_v62, %v2713_v53  ;;  %v2325_v48 = vadd.f32 %v2324_v12, %v2323_v46  ;;  %v5346_v12 = vpop.f32.mrf.mxu1 }
 0x35c   :  { %3920 = vrcp.f32 %v3226_v57  ;;  %v2495_v52 = vsub.f32 %v2431_v61, %v2463_v55  ;;  %v5328_v14 = vmul.f32 0.125, %v2071_v44  ;;  %v2098_v36 = vrot.slane %v2097_v23, 2 }
 0x35d   :  { %3351 = vst [vmem:[#allocation10 + $0x58] sm:$0xff] %v3319_v45  ;;  %3922 = vpow2.f32 %v3454_v27  ;;  %v3011_v42 = vrot.slane %v2777_v18, %v5026_v8  ;;  %v2326_v25 = vrot.slane %v2325_v48, 1  ;;  %v2210_v63 = vmul.f32 %v5316_v32, %v5316_v32 }
 0x35e   :  { %v3913_v37 = vpop.eup %3912  ;;  %v2527_v19 = vmax.f32 %v2495_v52, 0.0  ;;  %v2461_v2 = vmul.f32 %v5328_v14, %v5328_v14  ;;  %v2099_v7 = vadd.f32 %v2098_v36, %v2097_v23  ;;  %v2084_v28 = vrot.slane %v5326_v1, 4 }
 0x35f   :  { %v3097_v55 = vadd.f32 %v3011_v42, %v2937_v60  ;;  %v2622_v15 = vmul.f32 %v5234_v62, %v3913_v37  ;;  %v2327_v16 = vadd.f32 %v2326_v25, %v2325_v48  ;;  %v2352_v11 = vrot.slane %v2210_v63, 4 }
 0x360   :  { %v2559_v31 = vadd.f32 1e-05, %v2527_v19  ;;  %v2100_v0 = vrot.slane %v2099_v7, 1  ;;  %v2085_v3 = vadd.f32 %v2084_v28, %v5326_v1  ;;  %v2208_v49 = vmul.f32 %v5326_v1, %v5326_v1 }
 0x361   :  { %v3452_v10 = vmul.f32 -1.442695, %v3097_v55  ;;  %v2654_v13 = vmul.f32 %v2622_v15, %v5277_v58  ;;  %v2871_v20 = vrot.slane %v2622_v15, %v5023_v24  ;;  %v2429_v17 = vmul.f32 0.125, %v2327_v16 }
 0x362   :  { %v3915_v26 = vpop.eup %3914  ;;  %3924 = vrsqrt.f32 %v2559_v31  ;;  %v2101_v59 = vadd.f32 %v2100_v0, %v2099_v7  ;;  %v2353_v38 = vadd.f32 %v2352_v11, %v2210_v63  ;;  %v2086_v46 = vrot.slane %v2085_v3, 2  ;;  %v5359_v31 = vpop.f32.mrf.mxu1 }
 0x363   :  { %v3917_v40 = vpop.eup %3916  ;;  %v3224_v5 = vadd.f32 1.0, %v3915_v26  ;;  %3926 = vpow2.f32 %v3452_v10  ;;  %v2718_v39 = vrot.slane %v2654_v13, 7  ;;  %v2942_v34 = vmul.f32 %v5241_v33, %v2871_v20 }
 0x364   :  { %v3317_v54 = vmul.f32 %v3917_v40, %v4887_v9  ;;  %v2493_v53 = vsub.f32 %v2429_v17, %v2461_v2  ;;  %v5344_v60 = vmul.f32 0.125, %v2101_v59  ;;  %v2354_v58 = vrot.slane %v2353_v38, 2 }
 0x365   :  { %v3919_v41 = vpop.eup %3918  ;;  %3928 = vrcp.f32 %v3224_v5  ;;  %v2782_v57 = vsub.f32 %v5234_v62, %v2718_v39  ;;  %v2087_v61 = vadd.f32 %v2086_v46, %v2085_v3  ;;  %v2340_v44 = vrot.slane %v2208_v49, 4 }
 0x366   :  { %3349 = vst [vmem:[#allocation10 + $0x48] sm:$0xff] %v3317_v54  ;;  %v2620_v23 = vmul.f32 %v5234_v62, %v3919_v41  ;;  %v2525_v45 = vmax.f32 %v2493_v53, 0.0  ;;  %v2355_v27 = vadd.f32 %v2354_v58, %v2353_v38  ;;  %v2466_v9 = vmul.f32 %v5344_v60, %v5344_v60 }
 0x367   :  { %v3031_v33 = vrot.slane %v2782_v57, %v5026_v8  ;;  %v2088_v18 = vrot.slane %v2087_v61, 1  ;;  %v2341_v48 = vadd.f32 %v2340_v44, %v2208_v49  ;;  %v2102_v52 = vrot.slane %v5346_v12, 4 }
 0x368   :  { %v2652_v36 = vmul.f32 %v2620_v23, %v5296_v43  ;;  %v2863_v42 = vrot.slane %v2620_v23, %v5023_v24  ;;  %v2557_v25 = vadd.f32 1e-05, %v2525_v45  ;;  %v2356_v63 = vrot.slane %v2355_v27, 1 }
 0x369   :  { %v3921_v37 = vpop.eup %3920  ;;  %v3102_v19 = vadd.f32 %v3031_v33, %v2942_v34  ;;  %v2089_v2 = vadd.f32 %v2088_v18, %v2087_v61  ;;  %v2342_v7 = vrot.slane %v2341_v48, 2  ;;  %v2103_v28 = vadd.f32 %v5346_v12, %v2102_v52 }
 0x36a   :  { %v3923_v55 = vpop.eup %3922  ;;  %v3322_v15 = vmul.f32 %v3921_v37, %v4950_v21  ;;  %v2716_v16 = vrot.slane %v2652_v36, 7  ;;  %v2940_v11 = vmul.f32 %v2863_v42, %v5263_v4  ;;  %3930 = vrsqrt.f32 %v2557_v25 }
 0x36b   :  { %v3227_v43 = vadd.f32 1.0, %v3923_v55  ;;  %v3457_v0 = vmul.f32 -1.442695, %v3102_v19  ;;  %v2357_v3 = vadd.f32 %v2356_v63, %v2355_v27  ;;  %v5361_v49 = vmul.f32 0.125, %v2089_v2  ;;  %v5377_v63 = vpop.f32.mrf.mxu1 }
 0x36c   :  { %3354 = vst [vmem:[#allocation10 + $0x70] sm:$0xff] %v3322_v15  ;;  %v2780_v10 = vsub.f32 %v5234_v62, %v2716_v16  ;;  %v2343_v13 = vadd.f32 %v2342_v7, %v2341_v48  ;;  %v2104_v20 = vrot.slane %v2103_v28, 2  ;;  %v2211_v17 = vmul.f32 %v5346_v12, %v5346_v12 }
 0x36d   :  { %3932 = vrcp.f32 %v3227_v43  ;;  %v2434_v21 = vmul.f32 0.125, %v2357_v3  ;;  %v2464_v4 = vmul.f32 %v5361_v49, %v5361_v49  ;;  %v2090_v26 = vrot.slane %v5359_v31, 4 }
 0x36e   :  { %3934 = vpow2.f32 %v3457_v0  ;;  %v3023_v59 = vrot.slane %v2780_v10, %v5026_v8  ;;  %v2344_v38 = vrot.slane %v2343_v13, 1  ;;  %v2105_v46 = vadd.f32 %v2104_v20, %v2103_v28 }
 0x36f   :  { %v3925_v40 = vpop.eup %3924  ;;  %v2498_v5 = vsub.f32 %v2434_v21, %v2466_v9  ;;  %v2358_v39 = vrot.slane %v2211_v17, 4  ;;  %v2091_v34 = vadd.f32 %v2090_v26, %v5359_v31  ;;  %v2209_v54 = vmul.f32 %v5359_v31, %v5359_v31 }
 0x370   :  { %v3927_v53 = vpop.eup %3926  ;;  %v3100_v58 = vadd.f32 %v3023_v59, %v2940_v11  ;;  %v2623_v41 = vmul.f32 %v5234_v62, %v3925_v40  ;;  %v2345_v57 = vadd.f32 %v2344_v38, %v2343_v13  ;;  %v2106_v61 = vrot.slane %v2105_v46, 1 }
 0x371   :  { %v3225_v44 = vadd.f32 1.0, %v3927_v53  ;;  %v2530_v23 = vmax.f32 %v2498_v5, 0.0  ;;  %v2359_v45 = vadd.f32 %v2358_v39, %v2211_v17  ;;  %v2092_v27 = vrot.slane %v2091_v34, 2 }
 0x372   :  { %v3929_v33 = vpop.eup %3928  ;;  %v3455_v18 = vmul.f32 -1.442695, %v3100_v58  ;;  %v2655_v9 = vmul.f32 %v2623_v41, %v5304_v56  ;;  %v2875_v48 = vrot.slane %v2623_v41, %v5023_v24  ;;  %v2432_v52 = vmul.f32 0.125, %v2345_v57 }
 0x373   :  { %v3320_v36 = vmul.f32 %v3929_v33, %v4922_v51  ;;  %3936 = vrcp.f32 %v3225_v44  ;;  %v2562_v42 = vadd.f32 1e-05, %v2530_v23  ;;  %v2107_v25 = vadd.f32 %v2106_v61, %v2105_v46 }
 0x374   :  { %3938 = vpow2.f32 %v3455_v18  ;;  %v2719_v37 = vrot.slane %v2655_v9, 7  ;;  %v2943_v19 = vmul.f32 %v5274_v30, %v2875_v48  ;;  %v2496_v2 = vsub.f32 %v2432_v52, %v2464_v4 }
 0x375   :  { %3352 = vst [vmem:[#allocation10 + $0x60] sm:$0xff] %v3320_v36  ;;  %3940 = vrsqrt.f32 %v2562_v42  ;;  %v5380_v7 = vmul.f32 0.125, %v2107_v25  ;;  %v2360_v56 = vrot.slane %v2359_v45, 2  ;;  %v2093_v28 = vadd.f32 %v2092_v27, %v2091_v34 }
 0x376   :  { %v2783_v55 = vsub.f32 %v5234_v62, %v2719_v37  ;;  %v2528_v15 = vmax.f32 %v2496_v2, 0.0  ;;  %v2346_v51 = vrot.slane %v2209_v54, 4  ;;  %v2120_v16 = vrot.slane %v5377_v63, 4 }
 0x377   :  { %v3931_v11 = vpop.eup %3930  ;;  %v2361_v43 = vadd.f32 %v2360_v56, %v2359_v45  ;;  %v2467_v0 = vmul.f32 %v5380_v7, %v5380_v7  ;;  %v2094_v3 = vrot.slane %v2093_v28, 1  ;;  %v2214_v30 = vmul.f32 %v5377_v63, %v5377_v63 }
 0x378   :  { %v3035_v10 = vrot.slane %v2783_v55, %v5026_v8  ;;  %v2621_v13 = vmul.f32 %v5234_v62, %v3931_v11  ;;  %v2560_v20 = vadd.f32 1e-05, %v2528_v15  ;;  %v2347_v17 = vadd.f32 %v2346_v51, %v2209_v54  ;;  %v5396_v54 = vpop.f32.mrf.mxu1 }
 0x379   :  { %v2362_v21 = vrot.slane %v2361_v43, 1  ;;  %v2095_v4 = vadd.f32 %v2094_v3, %v2093_v28  ;;  %v2121_v26 = vadd.f32 %v5377_v63, %v2120_v16  ;;  %v2376_v59 = vrot.slane %v2214_v30, 4 }
 0x37a   :  { %v3933_v38 = vpop.eup %3932  ;;  %v3103_v46 = vadd.f32 %v3035_v10, %v2943_v19  ;;  %v2653_v40 = vmul.f32 %v2621_v13, %v5328_v14  ;;  %v2867_v5 = vrot.slane %v2621_v13, %v5023_v24  ;;  %3942 = vrsqrt.f32 %v2560_v20 }
 0x37b   :  { %v3935_v39 = vpop.eup %3934  ;;  %v3323_v34 = vmul.f32 %v3933_v38, %v4943_v6  ;;  %v2363_v53 = vadd.f32 %v2362_v21, %v2361_v43  ;;  %v5394_v58 = vmul.f32 0.125, %v2095_v4  ;;  %v2348_v41 = vrot.slane %v2347_v17, 2 }
 0x37c   :  { %v3230_v57 = vadd.f32 1.0, %v3935_v39  ;;  %v3458_v61 = vmul.f32 -1.442695, %v3103_v46  ;;  %v2717_v44 = vrot.slane %v2653_v40, 7  ;;  %v2941_v23 = vmul.f32 %v2867_v5, %v5293_v47  ;;  %v5413_v40 = vpop.f32.mrf.mxu1 }
 0x37d   :  { %3355 = vst [vmem:[#allocation10 + $0x78] sm:$0xff] %v3323_v34  ;;  %v2435_v45 = vmul.f32 0.125, %v2363_v53  ;;  %v2349_v14 = vadd.f32 %v2348_v41, %v2347_v17  ;;  %v2465_v27 = vmul.f32 %v5394_v58, %v5394_v58  ;;  %v2122_v33 = vrot.slane %v2121_v26, 2 }
 0x37e   :  { %3944 = vrcp.f32 %v3230_v57  ;;  %v2781_v6 = vsub.f32 %v5234_v62, %v2717_v44  ;;  %v2377_v18 = vadd.f32 %v2376_v59, %v2214_v30  ;;  %v2108_v9 = vrot.slane %v5396_v54, 4 }
 0x37f   :  { %3946 = vpow2.f32 %v3458_v61  ;;  %v2499_v48 = vsub.f32 %v2435_v45, %v2467_v0  ;;  %v2350_v52 = vrot.slane %v2349_v14, 1  ;;  %v2123_v36 = vadd.f32 %v2122_v33, %v2121_v26 }
 0x380   :  { %v3937_v42 = vpop.eup %3936  ;;  %v3027_v47 = vrot.slane %v2781_v6, %v5026_v8  ;;  %v2378_v25 = vrot.slane %v2377_v18, 2  ;;  %v2109_v37 = vadd.f32 %v2108_v9, %v5396_v54  ;;  %v2212_v19 = vmul.f32 %v5396_v54, %v5396_v54 }
 0x381   :  { %v3939_v2 = vpop.eup %3938  ;;  %v3321_v56 = vmul.f32 %v3937_v42, %v4914_v50  ;;  %v2531_v28 = vmax.f32 %v2499_v48, 0.0  ;;  %v2351_v55 = vadd.f32 %v2350_v52, %v2349_v14  ;;  %v2124_v15 = vrot.slane %v2123_v36, 1 }
 0x382   :  { %v3941_v51 = vpop.eup %3940  ;;  %v3228_v16 = vadd.f32 1.0, %v3939_v2  ;;  %v3101_v11 = vadd.f32 %v3027_v47, %v2941_v23  ;;  %v2379_v43 = vadd.f32 %v2378_v25, %v2377_v18  ;;  %v2110_v0 = vrot.slane %v2109_v37, 2 }
 0x383   :  { %3353 = vst [vmem:[#allocation10 + $0x68] sm:$0xff] %v3321_v56  ;;  %v2626_v3 = vmul.f32 %v5234_v62, %v3941_v51  ;;  %v2563_v30 = vadd.f32 1e-05, %v2531_v28  ;;  %v2433_v10 = vmul.f32 0.125, %v2351_v55  ;;  %v2125_v13 = vadd.f32 %v2124_v15, %v2123_v36 }
 0x384   :  { %3948 = vrcp.f32 %v3228_v16  ;;  %v3456_v20 = vmul.f32 -1.442695, %v3101_v11  ;;  %v2380_v17 = vrot.slane %v2379_v43, 1  ;;  %v2111_v21 = vadd.f32 %v2110_v0, %v2109_v37 }
 0x385   :  { %v2658_v50 = vmul.f32 %v2626_v3, %v5344_v60  ;;  %v2887_v4 = vrot.slane %v2626_v3, %v5023_v24  ;;  %3950 = vrsqrt.f32 %v2563_v30  ;;  %v2497_v26 = vsub.f32 %v2433_v10, %v2465_v27 }
 0x386   :  { %3952 = vpow2.f32 %v3456_v20  ;;  %v5411_v59 = vmul.f32 0.125, %v2125_v13  ;;  %v2381_v38 = vadd.f32 %v2380_v17, %v2379_v43  ;;  %v2112_v46 = vrot.slane %v2111_v21, 1 }
 0x387   :  { %v3943_v5 = vpop.eup %3942  ;;  %v2722_v39 = vrot.slane %v2658_v50, 7  ;;  %v2946_v34 = vmul.f32 %v5316_v32, %v2887_v4  ;;  %v2529_v53 = vmax.f32 %v2497_v26, 0.0  ;;  %v2364_v41 = vrot.slane %v2212_v19, 4 }
 0x388   :  { %v2624_v57 = vmul.f32 %v5234_v62, %v3943_v5  ;;  %v2438_v60 = vmul.f32 0.125, %v2381_v38  ;;  %v2470_v61 = vmul.f32 %v5411_v59, %v5411_v59  ;;  %v2113_v44 = vadd.f32 %v2112_v46, %v2111_v21 }
 0x389   :  { %v2786_v23 = vsub.f32 %v5234_v62, %v2722_v39  ;;  %v2561_v45 = vadd.f32 1e-05, %v2529_v53  ;;  %v2365_v14 = vadd.f32 %v2364_v41, %v2212_v19  ;;  %v2126_v27 = vrot.slane %v5413_v40, 4 }
 0x38a   :  { %v2656_v33 = vmul.f32 %v2624_v57, %v5361_v49  ;;  %v2879_v6 = vrot.slane %v2624_v57, %v5023_v24  ;;  %v2502_v32 = vsub.f32 %v2438_v60, %v2470_v61  ;;  %v5423_v18 = vmul.f32 0.125, %v2113_v44  ;;  %v5429_v49 = vpop.f32.mrf.mxu1 }
 0x38b   :  { %v3945_v9 = vpop.eup %3944  ;;  %v3047_v48 = vrot.slane %v2786_v23, %v5026_v8  ;;  %3954 = vrsqrt.f32 %v2561_v45  ;;  %v2366_v52 = vrot.slane %v2365_v14, 2  ;;  %v2127_v36 = vadd.f32 %v5413_v40, %v2126_v27 }
 0x38c   :  { %v3947_v42 = vpop.eup %3946  ;;  %v3326_v47 = vmul.f32 %v3945_v9, %v4969_v22  ;;  %v2720_v25 = vrot.slane %v2656_v33, 7  ;;  %v2944_v37 = vmul.f32 %v2879_v6, %v5326_v1  ;;  %v2534_v19 = vmax.f32 %v2502_v32, 0.0  ;;  %v5447_v6 = vpop.f32.mrf.mxu1 }
 0x38d   :  { %v3231_v2 = vadd.f32 1.0, %v3947_v42  ;;  %v3106_v56 = vadd.f32 %v3047_v48, %v2946_v34  ;;  %v2367_v28 = vadd.f32 %v2366_v52, %v2365_v14  ;;  %v2468_v55 = vmul.f32 %v5423_v18, %v5423_v18 }
 0x38e   :  { %3358 = vst [vmem:[#allocation10 + $0x90] sm:$0xff] %v3326_v47  ;;  %v2784_v15 = vsub.f32 %v5234_v62, %v2720_v25  ;;  %v2566_v51 = vadd.f32 1e-05, %v2534_v19  ;;  %v2128_v16 = vrot.slane %v2127_v36, 2  ;;  %v2215_v22 = vmul.f32 %v5413_v40, %v5413_v40 }
 0x38f   :  { %3956 = vrcp.f32 %v3231_v2  ;;  %v3461_v11 = vmul.f32 -1.442695, %v3106_v56  ;;  %v2368_v1 = vrot.slane %v2367_v28, 1  ;;  %v2114_v43 = vrot.slane %v5429_v49, 4 }
 0x390   :  { %v3039_v0 = vrot.slane %v2784_v15, %v5026_v8  ;;  %3958 = vrsqrt.f32 %v2566_v51  ;;  %v2129_v3 = vadd.f32 %v2128_v16, %v2127_v36  ;;  %v2382_v30 = vrot.slane %v2215_v22, 4 }
 0x391   :  { %v3949_v10 = vpop.eup %3948  ;;  %3960 = vpow2.f32 %v3461_v11  ;;  %v2369_v13 = vadd.f32 %v2368_v1, %v2367_v28  ;;  %v2115_v20 = vadd.f32 %v2114_v43, %v5429_v49  ;;  %v2213_v17 = vmul.f32 %v5429_v49, %v5429_v49 }
 0x392   :  { %v3951_v21 = vpop.eup %3950  ;;  %v3324_v50 = vmul.f32 %v3949_v10, %v4946_v29  ;;  %v3104_v4 = vadd.f32 %v3039_v0, %v2944_v37  ;;  %v2130_v26 = vrot.slane %v2129_v3, 1  ;;  %v2383_v38 = vadd.f32 %v2382_v30, %v2215_v22 }
 0x393   :  { %v3953_v46 = vpop.eup %3952  ;;  %v2627_v5 = vmul.f32 %v5234_v62, %v3951_v21  ;;  %v2436_v39 = vmul.f32 0.125, %v2369_v13  ;;  %v2116_v34 = vrot.slane %v2115_v20, 2  ;;  %v2370_v53 = vrot.slane %v2213_v17, 4 }
 0x394   :  { %3356 = vst [vmem:[#allocation10 + $0x80] sm:$0xff] %v3324_v50  ;;  %v3229_v41 = vadd.f32 1.0, %v3953_v46  ;;  %v3459_v57 = vmul.f32 -1.442695, %v3104_v4  ;;  %v2131_v60 = vadd.f32 %v2130_v26, %v2129_v3  ;;  %v2384_v61 = vrot.slane %v2383_v38, 2  ;;  %v5468_v46 = vld [vmem:[#allocation8] sm:$0xff] }
 0x395   :  { %v2659_v44 = vmul.f32 %v2627_v5, %v5380_v7  ;;  %v2891_v23 = vrot.slane %v2627_v5, %v5023_v24  ;;  %v2500_v45 = vsub.f32 %v2436_v39, %v2468_v55  ;;  %v2117_v29 = vadd.f32 %v2116_v34, %v2115_v20 }
 0x396   :  { %3962 = vrcp.f32 %v3229_v41  ;;  %v5445_v14 = vmul.f32 0.125, %v2131_v60  ;;  %v2385_v27 = vadd.f32 %v2384_v61, %v2383_v38  ;;  %v2371_v33 = vadd.f32 %v2370_v53, %v2213_v17 }
 0x397   :  { %3964 = vpow2.f32 %v3459_v57  ;;  %v2723_v32 = vrot.slane %v2659_v44, 7  ;;  %v2947_v9 = vmul.f32 %v5346_v12, %v2891_v23  ;;  %v2532_v48 = vmax.f32 %v2500_v45, 0.0 }
 0x398   :  { %v3955_v52 = vpop.eup %3954  ;;  %v2386_v36 = vrot.slane %v2385_v27, 1  ;;  %v2471_v7 = vmul.f32 %v5445_v14, %v5445_v14  ;;  %v2118_v42 = vrot.slane %v2117_v29, 1  ;;  %v2372_v47 = vrot.slane %v2371_v33, 2 }
 0x399   :  { %v2787_v25 = vsub.f32 %v5234_v62, %v2723_v32  ;;  %v2625_v37 = vmul.f32 %v5234_v62, %v3955_v52  ;;  %v2564_v19 = vadd.f32 1e-05, %v2532_v48  ;;  %v2144_v2 = vrot.slane %v5447_v6, 4 }
 0x39a   :  { %v2387_v56 = vadd.f32 %v2386_v36, %v2385_v27  ;;  %v2119_v28 = vadd.f32 %v2118_v42, %v2117_v29  ;;  %v2373_v55 = vadd.f32 %v2372_v47, %v2371_v33  ;;  %v2218_v12 = vmul.f32 %v5447_v6, %v5447_v6 }
 0x39b   :  { %v3051_v15 = vrot.slane %v2787_v25, %v5026_v8  ;;  %v2657_v51 = vmul.f32 %v2625_v37, %v5394_v58  ;;  %v2883_v16 = vrot.slane %v2625_v37, %v5023_v24  ;;  %3966 = vrsqrt.f32 %v2564_v19 }
 0x39c   :  { %v3957_v22 = vpop.eup %3956  ;;  %v2439_v11 = vmul.f32 0.125, %v2387_v56  ;;  %v5460_v1 = vmul.f32 0.125, %v2119_v28  ;;  %v2374_v43 = vrot.slane %v2373_v55, 1  ;;  %v2145_v0 = vadd.f32 %v5447_v6, %v2144_v2 }
 0x39d   :  { %v3959_v3 = vpop.eup %3958  ;;  %v3327_v30 = vmul.f32 %v3957_v22, %v4964_v35  ;;  %v3107_v10 = vadd.f32 %v3051_v15, %v2947_v9  ;;  %v2721_v13 = vrot.slane %v2657_v51, 7  ;;  %v2945_v20 = vmul.f32 %v2883_v16, %v5359_v31  ;;  %v5611_v9 = vld [vmem:[#allocation17_spill] sm:$0xff] }
 0x39e   :  { %v3961_v17 = vpop.eup %3960  ;;  %v2630_v58 = vmul.f32 %v5234_v62, %v3959_v3  ;;  %v2503_v21 = vsub.f32 %v2439_v11, %v2471_v7  ;;  %v2375_v50 = vadd.f32 %v2374_v43, %v2373_v55  ;;  %v2469_v4 = vmul.f32 %v5460_v1, %v5460_v1  ;;  %v5473_v62 = vpop.f32.mrf.mxu1 }
 0x39f   :  { %3359 = vst [vmem:[#allocation10 + $0x98] sm:$0xff] %v3327_v30  ;;  %v3234_v26 = vadd.f32 1.0, %v3961_v17  ;;  %v3462_v38 = vmul.f32 -1.442695, %v3107_v10  ;;  %v2785_v5 = vsub.f32 %v5468_v46, %v2721_v13  ;;  %v2146_v35 = vrot.slane %v2145_v0, 2 }
 0x3a0   :  { %v2662_v39 = vmul.f32 %v2630_v58, %v5411_v59  ;;  %v2903_v31 = vrot.slane %v2630_v58, %v5023_v24  ;;  %v2535_v34 = vmax.f32 %v2503_v21, 0.0  ;;  %v2437_v53 = vmul.f32 0.125, %v2375_v50  ;;  %v5480_v7 = vpop.f32.mrf.mxu1 }
 0x3a1   :  { %3968 = vrcp.f32 %v3234_v26  ;;  %v3043_v41 = vrot.slane %v2785_v5, %v5026_v8  ;;  %v2147_v57 = vadd.f32 %v2146_v35, %v2145_v0  ;;  %v2400_v60 = vrot.slane %v2218_v12, 4 }
 0x3a2   :  { %3970 = vpow2.f32 %v3462_v38  ;;  %v2726_v61 = vrot.slane %v2662_v39, 7  ;;  %v2950_v44 = vmul.f32 %v5377_v63, %v2903_v31  ;;  %v2567_v23 = vadd.f32 1e-05, %v2535_v34  ;;  %v5497_v50 = vpop.f32.mrf.mxu1 }
 0x3a3   :  { %v3963_v45 = vpop.eup %3962  ;;  %v3105_v29 = vadd.f32 %v3043_v41, %v2945_v20  ;;  %v2501_v27 = vsub.f32 %v2437_v53, %v2469_v4  ;;  %v2148_v59 = vrot.slane %v2147_v57, 1  ;;  %v2401_v33 = vadd.f32 %v2400_v60, %v2218_v12 }
 0x3a4   :  { %v3965_v32 = vpop.eup %3964  ;;  %v3325_v48 = vmul.f32 %v3963_v45, %v5611_v9  ;;  %v2790_v52 = vsub.f32 %v5468_v46, %v2726_v61  ;;  %3972 = vrsqrt.f32 %v2567_v23  ;;  %v2132_v36 = vrot.slane %v5473_v62, 4  ;;  %v5612_v61 = vld [vmem:[#allocation22_spill] sm:$0xff] }
 0x3a5   :  { %v3232_v42 = vadd.f32 1.0, %v3965_v32  ;;  %v3460_v47 = vmul.f32 -1.442695, %v3105_v29  ;;  %v2533_v25 = vmax.f32 %v2501_v27, 0.0  ;;  %v2149_v63 = vadd.f32 %v2148_v59, %v2147_v57 }
 0x3a6   :  { %3357 = vst [vmem:[#allocation10 + $0x88] sm:$0xff] %v3325_v48  ;;  %v3063_v37 = vrot.slane %v2790_v52, %v5026_v8  ;;  %v2402_v19 = vrot.slane %v2401_v33, 2  ;;  %v2133_v2 = vadd.f32 %v2132_v36, %v5473_v62  ;;  %v2216_v56 = vmul.f32 %v5473_v62, %v5473_v62 }
 0x3a7   :  { %3974 = vrcp.f32 %v3232_v42  ;;  %v2565_v28 = vadd.f32 1e-05, %v2533_v25  ;;  %v5486_v55 = vmul.f32 0.125, %v2149_v63  ;;  %v2150_v12 = vrot.slane %v5480_v7, 4 }
 0x3a8   :  { %v3967_v15 = vpop.eup %3966  ;;  %3976 = vpow2.f32 %v3460_v47  ;;  %v3110_v51 = vadd.f32 %v3063_v37, %v2950_v44  ;;  %v2403_v16 = vadd.f32 %v2402_v19, %v2401_v33  ;;  %v2134_v22 = vrot.slane %v2133_v2, 2 }
 0x3a9   :  { %v2628_v11 = vmul.f32 %v5468_v46, %v3967_v15  ;;  %3978 = vrsqrt.f32 %v2565_v28  ;;  %v2474_v43 = vmul.f32 %v5486_v55, %v5486_v55  ;;  %v2388_v0 = vrot.slane %v2216_v56, 4 }
 0x3aa   :  { %v3465_v3 = vmul.f32 -1.442695, %v3110_v51  ;;  %v2404_v30 = vrot.slane %v2403_v16, 1  ;;  %v2135_v10 = vadd.f32 %v2134_v22, %v2133_v2  ;;  %v2151_v13 = vadd.f32 %v5480_v7, %v2150_v12  ;;  %v5613_v22 = vld [vmem:[#allocation18_spill] sm:$0xff] }
 0x3ab   :  { %v2660_v20 = vmul.f32 %v2628_v11, %v5423_v18  ;;  %v2895_v17 = vrot.slane %v2628_v11, %v5023_v24  ;;  %v2389_v58 = vadd.f32 %v2388_v0, %v2216_v56  ;;  %v2219_v21 = vmul.f32 %v5480_v7, %v5480_v7 }
 0x3ac   :  { %3980 = vpow2.f32 %v3465_v3  ;;  %v2405_v4 = vadd.f32 %v2404_v30, %v2403_v16  ;;  %v2136_v26 = vrot.slane %v2135_v10, 1  ;;  %v2152_v38 = vrot.slane %v2151_v13, 2 }
 0x3ad   :  { %v2724_v5 = vrot.slane %v2660_v20, 7  ;;  %v2948_v35 = vmul.f32 %v2895_v17, %v5396_v54  ;;  %v2390_v39 = vrot.slane %v2389_v58, 2  ;;  %v2406_v31 = vrot.slane %v2219_v21, 4 }
 0x3ae   :  { %v3969_v34 = vpop.eup %3968  ;;  %v2442_v53 = vmul.f32 0.125, %v2405_v4  ;;  %v2137_v18 = vadd.f32 %v2136_v26, %v2135_v10  ;;  %v2153_v41 = vadd.f32 %v2152_v38, %v2151_v13  ;;  %v2138_v57 = vrot.slane %v5497_v50, 4 }
 0x3af   :  { %v3971_v60 = vpop.eup %3970  ;;  %v3330_v44 = vmul.f32 %v3969_v34, %v5612_v61  ;;  %v2788_v23 = vsub.f32 %v5468_v46, %v2724_v5  ;;  %v2391_v45 = vadd.f32 %v2390_v39, %v2389_v58  ;;  %v2407_v29 = vadd.f32 %v2406_v31, %v2219_v21 }
 0x3b0   :  { %v3235_v27 = vadd.f32 1.0, %v3971_v60  ;;  %v2506_v59 = vsub.f32 %v2442_v53, %v2474_v43  ;;  %v5503_v33 = vmul.f32 0.125, %v2137_v18  ;;  %v2154_v54 = vrot.slane %v2153_v41, 1 }
 0x3b1   :  { %v3973_v32 = vpop.eup %3972  ;;  %3362 = vst [vmem:[#allocation10 + $0xb0] sm:$0xff] %v3330_v44  ;;  %v3055_v9 = vrot.slane %v2788_v23, %v5026_v8  ;;  %v2392_v48 = vrot.slane %v2391_v45, 1  ;;  %v2408_v52 = vrot.slane %v2407_v29, 2  ;;  %v2139_v36 = vadd.f32 %v2138_v57, %v5497_v50 }
 0x3b2   :  { %3982 = vrcp.f32 %v3235_v27  ;;  %v2631_v42 = vmul.f32 %v5468_v46, %v3973_v32  ;;  %v2538_v47 = vmax.f32 %v2506_v59, 0.0  ;;  %v2472_v25 = vmul.f32 %v5503_v33, %v5503_v33 }
 0x3b3   :  { %v3108_v63 = vadd.f32 %v3055_v9, %v2948_v35  ;;  %v2393_v37 = vadd.f32 %v2392_v48, %v2391_v45  ;;  %v2155_v19 = vadd.f32 %v2154_v54, %v2153_v41  ;;  %v2409_v2 = vadd.f32 %v2408_v52, %v2407_v29  ;;  %v5614_v48 = vld [vmem:[#allocation20_spill] sm:$0xff] }
 0x3b4   :  { %v3975_v56 = vpop.eup %3974  ;;  %v2663_v28 = vmul.f32 %v2631_v42, %v5445_v14  ;;  %v2907_v12 = vrot.slane %v2631_v42, %v5023_v24  ;;  %v2570_v15 = vadd.f32 1e-05, %v2538_v47  ;;  %v2140_v51 = vrot.slane %v2139_v36, 2 }
 0x3b5   :  { %v3977_v16 = vpop.eup %3976  ;;  %v3328_v11 = vmul.f32 %v3975_v56, %v5613_v22  ;;  %v3463_v43 = vmul.f32 -1.442695, %v3108_v63  ;;  %v2440_v0 = vmul.f32 0.125, %v2393_v37  ;;  %v5513_v3 = vmul.f32 0.125, %v2155_v19 }
 0x3b6   :  { %v3979_v30 = vpop.eup %3978  ;;  %v3233_v10 = vadd.f32 1.0, %v3977_v16  ;;  %v2727_v13 = vrot.slane %v2663_v28, 7  ;;  %3984 = vrsqrt.f32 %v2570_v15  ;;  %v2410_v17 = vrot.slane %v2409_v2, 1  ;;  %v5615_v15 = vld [vmem:[#allocation16_spill] sm:$0xff] }
 0x3b7   :  { %3360 = vst [vmem:[#allocation10 + $0xa0] sm:$0xff] %v3328_v11  ;;  %3986 = vpow2.f32 %v3463_v43  ;;  %v2629_v20 = vmul.f32 %v5468_v46, %v3979_v30  ;;  %v2504_v14 = vsub.f32 %v2440_v0, %v2472_v25  ;;  %v2951_v21 = vmul.f32 %v5413_v40, %v2907_v12 }
 0x3b8   :  { %3988 = vrcp.f32 %v3233_v10  ;;  %v2791_v58 = vsub.f32 %v5468_v46, %v2727_v13  ;;  %v2141_v4 = vadd.f32 %v2140_v51, %v2139_v36  ;;  %v2411_v35 = vadd.f32 %v2410_v17, %v2409_v2 }
 0x3b9   :  { %v3981_v26 = vpop.eup %3980  ;;  %v2661_v38 = vmul.f32 %v2629_v20, %v5460_v1  ;;  %v2536_v5 = vmax.f32 %v2504_v14, 0.0  ;;  %v2475_v39 = vmul.f32 %v5513_v3, %v5513_v3  ;;  %v2217_v18 = vmul.f32 %v5497_v50, %v5497_v50 }
 0x3ba   :  { %v3238_v31 = vadd.f32 1.0, %v3981_v26  ;;  %v3067_v34 = vrot.slane %v2791_v58, %v5026_v8  ;;  %v2142_v53 = vrot.slane %v2141_v4, 1  ;;  %v2899_v57 = vrot.slane %v2629_v20, %v5023_v24  ;;  %v5616_v20 = vld [vmem:[#allocation24_spill] sm:$0xff] }
 0x3bb   :  { %v2725_v41 = vrot.slane %v2661_v38, 7  ;;  %v2568_v40 = vadd.f32 1e-05, %v2536_v5  ;;  %v2443_v60 = vmul.f32 0.125, %v2411_v35  ;;  %v2394_v1 = vrot.slane %v2217_v18, 4 }
 0x3bc   :  { %3990 = vrcp.f32 %v3238_v31  ;;  %v3111_v61 = vadd.f32 %v3067_v34, %v2951_v21  ;;  %v2143_v29 = vadd.f32 %v2142_v53, %v2141_v4  ;;  %v2949_v54 = vmul.f32 %v2899_v57, %v5429_v49 }
 0x3bd   :  { %v2789_v44 = vsub.f32 %v5468_v46, %v2725_v41  ;;  %3992 = vrsqrt.f32 %v2568_v40  ;;  %v2507_v23 = vsub.f32 %v2443_v60, %v2475_v39  ;;  %v2395_v27 = vadd.f32 %v2394_v1, %v2217_v18 }
 0x3be   :  { %v3466_v45 = vmul.f32 -1.442695, %v3111_v61  ;;  %v5529_v25 = vmul.f32 0.125, %v2143_v29 }
 0x3bf   :  { %v3983_v59 = vpop.eup %3982  ;;  %v3059_v32 = vrot.slane %v2789_v44, %v5026_v8  ;;  %v2539_v9 = vmax.f32 %v2507_v23, 0.0  ;;  %v2396_v36 = vrot.slane %v2395_v27, 2 }
 0x3c0   :  { %v3331_v52 = vmul.f32 %v3983_v59, %v5614_v48  ;;  %3994 = vpow2.f32 %v3466_v45  ;;  %v2473_v11 = vmul.f32 %v5529_v25, %v5529_v25  ;;  %v5617_v45 = vld [vmem:[#allocation21_spill] sm:$0xff] }
 0x3c1   :  { %v3109_v42 = vadd.f32 %v3059_v32, %v2949_v54  ;;  %v2571_v47 = vadd.f32 1e-05, %v2539_v9  ;;  %v2397_v63 = vadd.f32 %v2396_v36, %v2395_v27 }
 0x3c2   :  { %3363 = vst [vmem:[#allocation10 + $0xb8] sm:$0xff] %v3331_v52 }
 0x3c3   :  { %v3985_v37 = vpop.eup %3984  ;;  %v3464_v19 = vmul.f32 -1.442695, %v3109_v42  ;;  %3996 = vrsqrt.f32 %v2571_v47  ;;  %v2398_v49 = vrot.slane %v2397_v63, 1  ;;  %v5618_v42 = vld [vmem:[#allocation23_spill] sm:$0xff] }
 0x3c4   :  { %v3987_v2 = vpop.eup %3986  ;;  %v2634_v56 = vmul.f32 %v5468_v46, %v3985_v37 }
 0x3c5   :  { %v3989_v28 = vpop.eup %3988  ;;  %v3236_v12 = vadd.f32 1.0, %v3987_v2  ;;  %3998 = vpow2.f32 %v3464_v19  ;;  %v2399_v22 = vadd.f32 %v2398_v49, %v2397_v63  ;;  %v5619_v49 = vld [vmem:[#allocation19_spill] sm:$0xff] }
 0x3c6   :  { %v3329_v51 = vmul.f32 %v3989_v28, %v5615_v15  ;;  %v2666_v16 = vmul.f32 %v2634_v56, %v5486_v55  ;;  %v2919_v0 = vrot.slane %v2634_v56, %v5023_v24 }
 0x3c7   :  { %4000 = vrcp.f32 %v3236_v12  ;;  %v2441_v30 = vmul.f32 0.125, %v2399_v22 }
 0x3c8   :  { %3361 = vst [vmem:[#allocation10 + $0xa8] sm:$0xff] %v3329_v51  ;;  %v2730_v43 = vrot.slane %v2666_v16, 7  ;;  %v2954_v55 = vmul.f32 %v5447_v6, %v2919_v0 }
 0x3c9   :  { %v3991_v10 = vpop.eup %3990  ;;  %v2505_v58 = vsub.f32 %v2441_v30, %v2473_v11 }
 0x3ca   :  { %v3993_v13 = vpop.eup %3992  ;;  %v3334_v14 = vmul.f32 %v3991_v10, %v5616_v20  ;;  %v2794_v17 = vsub.f32 %v5468_v46, %v2730_v43 }
 0x3cb   :  { %v2632_v21 = vmul.f32 %v5468_v46, %v3993_v13  ;;  %v2537_v26 = vmax.f32 %v2505_v58, 0.0  ;;  %v5620_v13 = vld [vmem:[#allocation28_spill] sm:$0xff] }
 0x3cc   :  { %3366 = vst [vmem:[#allocation10 + $0xd0] sm:$0xff] %v3334_v14  ;;  %v3079_v4 = vrot.slane %v2794_v17, %v5026_v8  ;;  %v5621_v14 = vld [vmem:[#allocation26_spill] sm:$0xff] }
 0x3cd   :  { %v3995_v38 = vpop.eup %3994  ;;  %v2664_v5 = vmul.f32 %v2632_v21, %v5503_v33  ;;  %v2569_v31 = vadd.f32 1e-05, %v2537_v26  ;;  %v2911_v53 = vrot.slane %v2632_v21, %v5023_v24  ;;  %v5622_v21 = vld [vmem:[#allocation25_spill] sm:$0xff] }
 0x3ce   :  { %v3239_v35 = vadd.f32 1.0, %v3995_v38  ;;  %v3114_v39 = vadd.f32 %v3079_v4, %v2954_v55  ;;  %v5623_v4 = vld [vmem:[#allocation27_spill] sm:$0xff] }
 0x3cf   :  { %v2728_v34 = vrot.slane %v2664_v5, 7  ;;  %v2952_v61 = vmul.f32 %v2911_v53, %v5473_v62 }
 0x3d0   :  { %v3997_v18 = vpop.eup %3996  ;;  %4002 = vrcp.f32 %v3239_v35  ;;  %v3469_v41 = vmul.f32 -1.442695, %v3114_v39 }
 0x3d1   :  { %v2792_v57 = vsub.f32 %v5468_v46, %v2728_v34  ;;  %v2635_v40 = vmul.f32 %v5468_v46, %v3997_v18  ;;  %4004 = vrsqrt.f32 %v2569_v31 }
 0x3d2   :  { %v3999_v6 = vpop.eup %3998  ;;  %4006 = vpow2.f32 %v3469_v41 }
 0x3d3   :  { %v3237_v60 = vadd.f32 1.0, %v3999_v6  ;;  %v3071_v33 = vrot.slane %v2792_v57, %v5026_v8  ;;  %v2667_v1 = vmul.f32 %v2635_v40, %v5513_v3  ;;  %v2923_v23 = vrot.slane %v2635_v40, %v5023_v24 }
 0x3d4   :  { %v4001_v44 = vpop.eup %4000 }
 0x3d5   :  { %v3332_v29 = vmul.f32 %v4001_v44, %v5617_v45  ;;  %4008 = vrcp.f32 %v3237_v60  ;;  %v3112_v27 = vadd.f32 %v3071_v33, %v2952_v61  ;;  %v2731_v59 = vrot.slane %v2667_v1, 7 }
 0x3d6   :  { %v2955_v9 = vmul.f32 %v5480_v7, %v2923_v23 }
 0x3d7   :  { %3364 = vst [vmem:[#allocation10 + $0xc0] sm:$0xff] %v3332_v29  ;;  %v3467_v54 = vmul.f32 -1.442695, %v3112_v27  ;;  %v2795_v32 = vsub.f32 %v5468_v46, %v2731_v59 }
 0x3d9   :  { %4010 = vpow2.f32 %v3467_v54  ;;  %v3083_v62 = vrot.slane %v2795_v32, %v5026_v8 }
 0x3db   :  { %v3115_v48 = vadd.f32 %v3083_v62, %v2955_v9 }
 0x3dd   :  { %v4003_v52 = vpop.eup %4002  ;;  %v3470_v3 = vmul.f32 -1.442695, %v3115_v48 }
 0x3de   :  { %v4005_v36 = vpop.eup %4004  ;;  %v3335_v47 = vmul.f32 %v4003_v52, %v5618_v42 }
 0x3df   :  { %v4007_v63 = vpop.eup %4006  ;;  %4012 = vpow2.f32 %v3470_v3  ;;  %v2633_v37 = vmul.f32 %v5468_v46, %v4005_v36 }
 0x3e0   :  { %3367 = vst [vmem:[#allocation10 + $0xd8] sm:$0xff] %v3335_v47  ;;  %v3242_v19 = vadd.f32 1.0, %v4007_v63 }
 0x3e1   :  { %v2665_v2 = vmul.f32 %v2633_v37, %v5529_v25  ;;  %v2915_v12 = vrot.slane %v2633_v37, %v5023_v24 }
 0x3e2   :  { %v4009_v56 = vpop.eup %4008  ;;  %4014 = vrcp.f32 %v3242_v19 }
 0x3e3   :  { %v3333_v7 = vmul.f32 %v4009_v56, %v5619_v49  ;;  %v2729_v28 = vrot.slane %v2665_v2, 7  ;;  %v2953_v22 = vmul.f32 %v2915_v12, %v5497_v50 }
 0x3e5   :  { %3365 = vst [vmem:[#allocation10 + $0xc8] sm:$0xff] %v3333_v7  ;;  %v2793_v15 = vsub.f32 %v5468_v46, %v2729_v28 }
 0x3e6   :  { %v4011_v51 = vpop.eup %4010 }
 0x3e7   :  { %v3240_v16 = vadd.f32 1.0, %v4011_v51  ;;  %v3075_v11 = vrot.slane %v2793_v15, %v5026_v8 }
 0x3e9   :  { %4016 = vrcp.f32 %v3240_v16  ;;  %v3113_v43 = vadd.f32 %v3075_v11, %v2953_v22 }
 0x3eb   :  { %v3468_v0 = vmul.f32 -1.442695, %v3113_v43 }
 0x3ec   :  { %v4013_v25 = vpop.eup %4012 }
 0x3ed   :  { %v3243_v30 = vadd.f32 1.0, %v4013_v25  ;;  %4018 = vpow2.f32 %v3468_v0 }
 0x3ef   :  { %v4015_v10 = vpop.eup %4014  ;;  %4020 = vrcp.f32 %v3243_v30 }
 0x3f0   :  { %v3338_v20 = vmul.f32 %v4015_v10, %v5620_v13 }
 0x3f2   :  { %3370 = vst [vmem:[#allocation10 + $0xf0] sm:$0xff] %v3338_v20 }
 0x3f6   :  { %v4017_v24 = vpop.eup %4016 }
 0x3f7   :  { %v3336_v46 = vmul.f32 %v4017_v24, %v5621_v14 }
 0x3f9   :  { %3368 = vst [vmem:[#allocation10 + $0xe0] sm:$0xff] %v3336_v46 }
 0x3fa   :  { %v4019_v17 = vpop.eup %4018 }
 0x3fb   :  { %v3241_v58 = vadd.f32 1.0, %v4019_v17 }
 0x3fc   :  { %v4021_v50 = vpop.eup %4020 }
 0x3fd   :  { %v3339_v8 = vmul.f32 %v4021_v50, %v5622_v21  ;;  %4022 = vrcp.f32 %v3241_v58 }
 0x3ff   :  { %3371 = vst [vmem:[#allocation10 + $0xf8] sm:$0xff] %v3339_v8 }
 0x40a   :  { %v4023_v55 = vpop.eup %4022 }
 0x40b   :  { %v3337_v26 = vmul.f32 %v4023_v55, %v5623_v4 }
 0x40d   :  { %3369 = vst [vmem:[#allocation10 + $0xe8] sm:$0xff] %v3337_v26 }
 0x40e   :  { %4151 = shalt.err (!%p4148_p10)
}
 0x40f   :  { %3383 = dma.vmem_to_hbm [thread:$0]  %s3378_s3, 4096, %s5576_s4, [#allocation4], %s4172_s25, %s4172_s25, %s4173_s26  }
 0x410   :  { %4166 = dma.done.wait [#allocation4], 4096  }
 0x411   :  { %4167 = vsyncadd [#allocation4], 4294963200 }
 0x412   :  { %3387 = vsyncpa [#allocation3], 1 }
 0x413   :  { %3388 = vsyncpa [#allocation6], 1 }
 0x414   :  { %3389 = vsyncpa [#allocation9], 1 }
 0x415   :  { %3390 = vsyncpa [#allocation4], 1 }

</bundles_post_ra>
